<compile_context>
chip_gen: v7x
topology: tpu7x:2x2x1
jax: 0.10.0
libtpu: 0.0.40
codegen_flags: <defaults>
</compile_context>

<pallas_src>
import functools

import jax
import jax.numpy as jnp
from jax.experimental import pallas as pl
from jax.experimental.pallas import tpu as pltpu


def _coupling_kernel(reverse,
                     zT_ref, ldj_ref, inv_mask_ref,
                     w1_ref, b1_ref, w2_ref, b2_ref,
                     w3s_ref, b3s_ref, w3t_ref, b3t_ref,
                     z_out_ref, ldj_out_ref):
    """One batch tile (batch on lanes): 3-layer MLP + affine coupling update.

    Activations are [feature, batch_tile] so the ldj reduction over features is
    a sublane reduction producing a lane-dense [1, batch_tile] row. Weights are
    in PyTorch [out, in] layout, pre-cast to bf16 in the wrapper; all matmuls
    accumulate in f32 on the MXU.
    """
    zT = zT_ref[...]                                   # [C, TB] f32
    # Broadcast (1 - mask) once and reuse; repeated implicit broadcasts of the
    # [C, 1] column would each materialize a fresh broadcast_in_dim.
    inv_b = jnp.broadcast_to(inv_mask_ref[...], zT.shape)   # [C, TB]

    # --- MLP hot path: bf16 MXU matmuls, f32 accumulation, VPU ReLUs, EUP tanh/exp ---
    # mask is already folded into w1 (w1_masked = w1 * mask) on the host, so the
    # MLP sees exactly mask*z without any in-kernel masking multiply.
    zb = zT.astype(jnp.bfloat16)
    h = jnp.dot(w1_ref[...], zb,
                preferred_element_type=jnp.float32) + b1_ref[...]                      # [H, TB]
    h = jnp.maximum(h, 0.0)
    h = jnp.dot(w2_ref[...], h.astype(jnp.bfloat16),
                preferred_element_type=jnp.float32) + b2_ref[...]                      # [H, TB]
    h = jnp.maximum(h, 0.0)
    hb = h.astype(jnp.bfloat16)
    # w3 split into scale / translate halves on the host: no in-kernel slicing.
    log_scale = jnp.tanh(jnp.dot(w3s_ref[...], hb,
                                 preferred_element_type=jnp.float32) + b3s_ref[...])   # [C, TB]
    translate = jnp.dot(w3t_ref[...], hb,
                        preferred_element_type=jnp.float32) + b3t_ref[...]             # [C, TB]

    # Coupling update in the algebraically-equivalent form
    #   mask*z + (1-mask)*f(z)  ==  z + (1-mask)*(f(z) - z)
    # which needs only the (1-mask) broadcast.
    if not reverse:   # static python flag, baked at trace time
        f = zT * jnp.exp(log_scale) + translate
        z_out_ref[...] = zT + inv_b * (f - zT)
        # reduction over the feature (sublane) axis -> lane-dense [1, TB] row
        ldj_out_ref[...] = ldj_ref[...] + jnp.sum(inv_b * log_scale,
                                                  axis=0, keepdims=True)
    else:
        f = (zT - translate) * jnp.exp(-log_scale)
        z_out_ref[...] = zT + inv_b * (f - zT)
        ldj_out_ref[...] = ldj_ref[...]


def coupling_forward(z, ldj, mask, params, *, reverse=False, block_b=256):
    """Pallas wrapper. z: [B, C] f32, ldj: [B] f32, mask: [C] f32.

    Params use PyTorch nn.Linear layout: w* is [out, in], b* is [out].
    """
    B, c_in = z.shape
    n_hidden = params["w1"].shape[0]
    assert block_b % 128 == 0, "batch tile must be lane-aligned (multiple of 128)"

    Bp = pl.cdiv(B, block_b) * block_b
    pad = Bp - B

    # Transposed, padded activations: features on sublanes, batch on lanes.
    # (Layout plumbing in the wrapper so the kernel's outputs are lane-dense.)
    zT = jnp.pad(z.astype(jnp.float32), ((0, pad), (0, 0))).T                   # [C, Bp]
    ldj_row = jnp.pad(ldj.astype(jnp.float32), (0, pad)).reshape(1, Bp)         # [1, Bp]
    inv_mask_col = (1.0 - mask).reshape(c_in, 1).astype(jnp.float32)            # [C, 1]

    # Host-side weight prep: fold mask into w1, split w3, cast matmul weights to bf16.
    w1m = (params["w1"] * mask[None, :]).astype(jnp.bfloat16)                   # [H, C]
    w2 = params["w2"].astype(jnp.bfloat16)                                      # [H, H]
    w3s = params["w3"][:c_in].astype(jnp.bfloat16)                              # [C, H]
    w3t = params["w3"][c_in:].astype(jnp.bfloat16)                              # [C, H]
    b1 = params["b1"].reshape(n_hidden, 1).astype(jnp.float32)
    b2 = params["b2"].reshape(n_hidden, 1).astype(jnp.float32)
    b3s = params["b3"][:c_in].reshape(c_in, 1).astype(jnp.float32)
    b3t = params["b3"][c_in:].reshape(c_in, 1).astype(jnp.float32)

    grid = (Bp // block_b,)
    kernel = functools.partial(_coupling_kernel, bool(reverse))

    # NOTE: weight blocks are grid-invariant (constant index_map), so the
    # pipeliner keeps them resident; at these sizes the default double-buffering
    # is well within VMEM, so no pipeline_mode / vmem_limit override needed.
    full = lambda shape: pl.BlockSpec(shape, lambda i: (0, 0))
    batch_tile = lambda rows: pl.BlockSpec((rows, block_b), lambda i: (0, i))

    z_out_T, ldj_out = pl.pallas_call(
        kernel,
        out_shape=(
            jax.ShapeDtypeStruct((c_in, Bp), jnp.float32),
            jax.ShapeDtypeStruct((1, Bp), jnp.float32),
        ),
        grid_spec=pltpu.PrefetchScalarGridSpec(
            num_scalar_prefetch=0,
            grid=grid,
            in_specs=[
                batch_tile(c_in),                  # zT
                batch_tile(1),                     # ldj (lane-dense row)
                full((c_in, 1)),                   # 1 - mask
                full((n_hidden, c_in)),            # w1 (masked, bf16)
                full((n_hidden, 1)),               # b1
                full((n_hidden, n_hidden)),        # w2 (bf16)
                full((n_hidden, 1)),               # b2
                full((c_in, n_hidden)),            # w3 scale half (bf16)
                full((c_in, 1)),                   # b3 scale half
                full((c_in, n_hidden)),            # w3 translate half (bf16)
                full((c_in, 1)),                   # b3 translate half
            ],
            out_specs=[
                batch_tile(c_in),                  # z' (transposed)
                batch_tile(1),                     # ldj'
            ],
        ),
        compiler_params=pltpu.CompilerParams(
            dimension_semantics=("parallel",)),
    )(zT, ldj_row, inv_mask_col,
      w1m, b1, w2, b2, w3s, b3s, w3t, b3t)

    z_new = z_out_T.T[:B]
    ldj_new = ldj_out[0, :B]
    return z_new, ldj_new


def coupling_reference(z, ldj, mask, params, *, reverse=False):
    """Pure-JAX f32 reference mirroring the PyTorch forward (w: [out, in])."""
    x = mask[None, :] * z
    h = jnp.maximum(x @ params["w1"].T + params["b1"], 0.0)
    h = jnp.maximum(h @ params["w2"].T + params["b2"], 0.0)
    out = h @ params["w3"].T + params["b3"]
    c_in = z.shape[1]
    log_scale = jnp.tanh(out[:, :c_in])
    translate = out[:, c_in:]
    m = mask[None, :]
    if not reverse:
        z_new = m * z + (1 - m) * (z * jnp.exp(log_scale) + translate)
        ldj_new = ldj + jnp.sum((1 - m) * log_scale, axis=-1)
    else:
        z_new = m * z + (1 - m) * ((z - translate) * jnp.exp(-log_scale))
        ldj_new = ldj
    return z_new, ldj_new


def init_params(key, c_in, n_hidden):
    k1, k2, k3 = jax.random.split(key, 3)
    scale = 0.05
    # NOTE: the PyTorch module zero-inits the last Linear; we use small nonzero
    # values here so the kernel's compute path is actually exercised.
    return {
        "w1": scale * jax.random.normal(k1, (n_hidden, c_in), jnp.float32),
        "b1": jnp.zeros((n_hidden,), jnp.float32),
        "w2": scale * jax.random.normal(k2, (n_hidden, n_hidden), jnp.float32),
        "b2": jnp.zeros((n_hidden,), jnp.float32),
        "w3": scale * jax.random.normal(k3, (2 * c_in, n_hidden), jnp.float32),
        "b3": jnp.zeros((2 * c_in,), jnp.float32),
    }


if __name__ == "__main__":
    # batch, c_in, n_hidden: TPU-tile aligned; B/block_b = 2 grid steps so a
    # 2-TensorCore v7x chip gets one batch tile per core.
    B, C, H = 512, 128, 256

    key = jax.random.PRNGKey(0)
    kz, kl, kp = jax.random.split(key, 3)

    z = jax.random.normal(kz, (B, C), jnp.float32)
    ldj = jax.random.normal(kl, (B,), jnp.float32)
    # checkerboard-style binary mask over features
    mask = (jnp.arange(C) % 2).astype(jnp.float32)
    params = init_params(kp, C, H)

    # forward direction
    z_out, ldj_out = coupling_forward(z, ldj, mask, params, reverse=False)
    jax.block_until_ready((z_out, ldj_out))
    z_ref, ldj_ref = coupling_reference(z, ldj, mask, params, reverse=False)

    # reverse direction
    z_rev, ldj_rev = coupling_forward(z_out, ldj_out, mask, params, reverse=True)
    jax.block_until_ready((z_rev, ldj_rev))
    z_rev_ref, _ = coupling_reference(z_out, ldj_out, mask, params, reverse=True)

    # bf16 matmul inputs with f32 accumulation -> loosened tolerances vs f32 ref
    assert jnp.allclose(z_out, z_ref, atol=3e-2, rtol=3e-2), "forward z mismatch"
    assert jnp.allclose(ldj_out, ldj_ref, atol=1.5e-1, rtol=3e-2), "forward ldj mismatch"
    assert jnp.allclose(z_rev, z_rev_ref, atol=3e-2, rtol=3e-2), "reverse z mismatch"
    assert jnp.allclose(ldj_rev, ldj_out, atol=1e-6), "reverse must not change ldj"
    # reverse inverts forward back to the original z (same bf16 MLP sees the
    # identical masked input in both directions, so this stays tight)
    assert jnp.allclose(z_rev, z, atol=1e-3, rtol=1e-3), "inverse consistency failed"

    print("KERNEL_OK")
</pallas_src>

<mosaic_0001>
module attributes {stable_mosaic.version = 11 : i64} {
  func.func @_coupling_kernel(%arg0: i32, %arg1: memref<128x256xf32, #tpu.memory_space<vmem>>, %arg2: memref<1x256xf32, #tpu.memory_space<vmem>>, %arg3: memref<128x1xf32, #tpu.memory_space<vmem>>, %arg4: memref<256x128xbf16, #tpu.memory_space<vmem>>, %arg5: memref<256x1xf32, #tpu.memory_space<vmem>>, %arg6: memref<256x256xbf16, #tpu.memory_space<vmem>>, %arg7: memref<256x1xf32, #tpu.memory_space<vmem>>, %arg8: memref<128x256xbf16, #tpu.memory_space<vmem>>, %arg9: memref<128x1xf32, #tpu.memory_space<vmem>>, %arg10: memref<128x256xbf16, #tpu.memory_space<vmem>>, %arg11: memref<128x1xf32, #tpu.memory_space<vmem>>, %arg12: memref<128x256xf32, #tpu.memory_space<vmem>>, %arg13: memref<1x256xf32, #tpu.memory_space<vmem>>) attributes {dimension_semantics = [#tpu.dimension_semantics<parallel>], iteration_bounds = array<i64: 2>, scalar_prefetch = 0 : i64, scratch_operands = 0 : i64, tpu.core_type = #tpu.core_type<tc>, window_params = [{transform_indices = @transform_0, window_bounds = array<i64: 128, 256>}, {transform_indices = @transform_1, window_bounds = array<i64: 1, 256>}, {pipeline_mode = #tpu.pipeline_mode<synchronous>, transform_indices = @transform_2, window_bounds = array<i64: 128, 1>}, {pipeline_mode = #tpu.pipeline_mode<synchronous>, transform_indices = @transform_3, window_bounds = array<i64: 256, 128>}, {pipeline_mode = #tpu.pipeline_mode<synchronous>, transform_indices = @transform_4, window_bounds = array<i64: 256, 1>}, {pipeline_mode = #tpu.pipeline_mode<synchronous>, transform_indices = @transform_5, window_bounds = array<i64: 256, 256>}, {pipeline_mode = #tpu.pipeline_mode<synchronous>, transform_indices = @transform_6, window_bounds = array<i64: 256, 1>}, {pipeline_mode = #tpu.pipeline_mode<synchronous>, transform_indices = @transform_7, window_bounds = array<i64: 128, 256>}, {pipeline_mode = #tpu.pipeline_mode<synchronous>, transform_indices = @transform_8, window_bounds = array<i64: 128, 1>}, {pipeline_mode = #tpu.pipeline_mode<synchronous>, transform_indices = @transform_9, window_bounds = array<i64: 128, 256>}, {pipeline_mode = #tpu.pipeline_mode<synchronous>, transform_indices = @transform_10, window_bounds = array<i64: 128, 1>}, {transform_indices = @transform_11, window_bounds = array<i64: 128, 256>}, {transform_indices = @transform_12, window_bounds = array<i64: 1, 256>}]} {
    %c0 = arith.constant 0 : index
    %c0_0 = arith.constant 0 : index
    %0 = vector.load %arg1[%c0, %c0_0] : memref<128x256xf32, #tpu.memory_space<vmem>>, vector<128x256xf32>
    %c0_1 = arith.constant 0 : index
    %c0_2 = arith.constant 0 : index
    %1 = vector.load %arg3[%c0_1, %c0_2] : memref<128x1xf32, #tpu.memory_space<vmem>>, vector<128x1xf32>
    %2 = vector.shape_cast %1 : vector<128x1xf32> to vector<128x1xf32>
    %3 = vector.broadcast %2 : vector<128x1xf32> to vector<128x256xf32>
    %4 = arith.truncf %0 : vector<128x256xf32> to vector<128x256xbf16>
    %c0_3 = arith.constant 0 : index
    %c0_4 = arith.constant 0 : index
    %5 = vector.load %arg4[%c0_3, %c0_4] : memref<256x128xbf16, #tpu.memory_space<vmem>>, vector<256x128xbf16>
    %cst = arith.constant dense<0.000000e+00> : vector<256x256xf32>
    %6 = tpu.matmul %5, %4, %cst {dimension_numbers = #tpu.dot_dimension_numbers<[1], [0], [0], [1], [0, 0, 1, 1], [], []>} : vector<256x128xbf16>, vector<128x256xbf16>, vector<256x256xf32> -> vector<256x256xf32>
    %c0_5 = arith.constant 0 : index
    %c0_6 = arith.constant 0 : index
    %7 = vector.load %arg5[%c0_5, %c0_6] : memref<256x1xf32, #tpu.memory_space<vmem>>, vector<256x1xf32>
    %8 = vector.broadcast %7 : vector<256x1xf32> to vector<256x256xf32>
    %9 = arith.addf %6, %8 : vector<256x256xf32>
    %cst_7 = arith.constant 0.000000e+00 : f32
    %10 = vector.broadcast %cst_7 : f32 to vector<256x256xf32>
    %11 = arith.maximumf %9, %10 : vector<256x256xf32>
    %c0_8 = arith.constant 0 : index
    %c0_9 = arith.constant 0 : index
    %12 = vector.load %arg6[%c0_8, %c0_9] : memref<256x256xbf16, #tpu.memory_space<vmem>>, vector<256x256xbf16>
    %13 = arith.truncf %11 : vector<256x256xf32> to vector<256x256xbf16>
    %cst_10 = arith.constant dense<0.000000e+00> : vector<256x256xf32>
    %14 = tpu.matmul %12, %13, %cst_10 {dimension_numbers = #tpu.dot_dimension_numbers<[1], [0], [0], [1], [0, 0, 1, 1], [], []>} : vector<256x256xbf16>, vector<256x256xbf16>, vector<256x256xf32> -> vector<256x256xf32>
    %c0_11 = arith.constant 0 : index
    %c0_12 = arith.constant 0 : index
    %15 = vector.load %arg7[%c0_11, %c0_12] : memref<256x1xf32, #tpu.memory_space<vmem>>, vector<256x1xf32>
    %16 = vector.broadcast %15 : vector<256x1xf32> to vector<256x256xf32>
    %17 = arith.addf %14, %16 : vector<256x256xf32>
    %cst_13 = arith.constant 0.000000e+00 : f32
    %18 = vector.broadcast %cst_13 : f32 to vector<256x256xf32>
    %19 = arith.maximumf %17, %18 : vector<256x256xf32>
    %20 = arith.truncf %19 : vector<256x256xf32> to vector<256x256xbf16>
    %c0_14 = arith.constant 0 : index
    %c0_15 = arith.constant 0 : index
    %21 = vector.load %arg8[%c0_14, %c0_15] : memref<128x256xbf16, #tpu.memory_space<vmem>>, vector<128x256xbf16>
    %cst_16 = arith.constant dense<0.000000e+00> : vector<128x256xf32>
    %22 = tpu.matmul %21, %20, %cst_16 {dimension_numbers = #tpu.dot_dimension_numbers<[1], [0], [0], [1], [0, 0, 1, 1], [], []>} : vector<128x256xbf16>, vector<256x256xbf16>, vector<128x256xf32> -> vector<128x256xf32>
    %c0_17 = arith.constant 0 : index
    %c0_18 = arith.constant 0 : index
    %23 = vector.load %arg9[%c0_17, %c0_18] : memref<128x1xf32, #tpu.memory_space<vmem>>, vector<128x1xf32>
    %24 = vector.broadcast %23 : vector<128x1xf32> to vector<128x256xf32>
    %25 = arith.addf %22, %24 : vector<128x256xf32>
    %26 = math.tanh %25 : vector<128x256xf32>
    %c0_19 = arith.constant 0 : index
    %c0_20 = arith.constant 0 : index
    %27 = vector.load %arg10[%c0_19, %c0_20] : memref<128x256xbf16, #tpu.memory_space<vmem>>, vector<128x256xbf16>
    %cst_21 = arith.constant dense<0.000000e+00> : vector<128x256xf32>
    %28 = tpu.matmul %27, %20, %cst_21 {dimension_numbers = #tpu.dot_dimension_numbers<[1], [0], [0], [1], [0, 0, 1, 1], [], []>} : vector<128x256xbf16>, vector<256x256xbf16>, vector<128x256xf32> -> vector<128x256xf32>
    %c0_22 = arith.constant 0 : index
    %c0_23 = arith.constant 0 : index
    %29 = vector.load %arg11[%c0_22, %c0_23] : memref<128x1xf32, #tpu.memory_space<vmem>>, vector<128x1xf32>
    %30 = vector.broadcast %29 : vector<128x1xf32> to vector<128x256xf32>
    %31 = arith.addf %28, %30 : vector<128x256xf32>
    %32 = math.exp %26 : vector<128x256xf32>
    %33 = arith.mulf %0, %32 : vector<128x256xf32>
    %34 = arith.addf %33, %31 : vector<128x256xf32>
    %35 = arith.subf %34, %0 : vector<128x256xf32>
    %36 = arith.mulf %3, %35 : vector<128x256xf32>
    %37 = arith.addf %0, %36 : vector<128x256xf32>
    %c0_24 = arith.constant 0 : index
    %c0_25 = arith.constant 0 : index
    %38 = vector.load %arg12[%c0_24, %c0_25] : memref<128x256xf32, #tpu.memory_space<vmem>>, vector<128x256xf32>
    tpu.vector_store %arg12[%c0_24, %c0_25], %37 {strides = array<i32>} : memref<128x256xf32, #tpu.memory_space<vmem>>, vector<128x256xf32>,
    %c0_26 = arith.constant 0 : index
    %c0_27 = arith.constant 0 : index
    %39 = vector.load %arg2[%c0_26, %c0_27] : memref<1x256xf32, #tpu.memory_space<vmem>>, vector<1x256xf32>
    %40 = arith.mulf %3, %26 : vector<128x256xf32>
    %cst_28 = arith.constant dense<0.000000e+00> : vector<256xf32>
    %41 = vector.multi_reduction <add>, %40, %cst_28 [0] : vector<128x256xf32> to vector<256xf32>
    %42 = vector.shape_cast %41 : vector<256xf32> to vector<1x256xf32>
    %43 = arith.addf %39, %42 : vector<1x256xf32>
    %c0_29 = arith.constant 0 : index
    %c0_30 = arith.constant 0 : index
    %44 = vector.load %arg13[%c0_29, %c0_30] : memref<1x256xf32, #tpu.memory_space<vmem>>, vector<1x256xf32>
    tpu.vector_store %arg13[%c0_29, %c0_30], %43 {strides = array<i32>} : memref<1x256xf32, #tpu.memory_space<vmem>>, vector<1x256xf32>,
    return
  }
  func.func @transform_0(%arg0: i32) -> (i32, i32) {
    %c0_i32 = arith.constant 0 : i32
    %c0_i32_0 = arith.constant 0 : i32
    return %c0_i32, %arg0 : i32, i32
  }
  func.func @transform_1(%arg0: i32) -> (i32, i32) {
    %c0_i32 = arith.constant 0 : i32
    %c0_i32_0 = arith.constant 0 : i32
    return %c0_i32, %arg0 : i32, i32
  }
  func.func @transform_2(%arg0: i32) -> (i32, i32) {
    %c0_i32 = arith.constant 0 : i32
    %c0_i32_0 = arith.constant 0 : i32
    %c0_i32_1 = arith.constant 0 : i32
    return %c0_i32, %c0_i32_0 : i32, i32
  }
  func.func @transform_3(%arg0: i32) -> (i32, i32) {
    %c0_i32 = arith.constant 0 : i32
    %c0_i32_0 = arith.constant 0 : i32
    %c0_i32_1 = arith.constant 0 : i32
    return %c0_i32, %c0_i32_0 : i32, i32
  }
  func.func @transform_4(%arg0: i32) -> (i32, i32) {
    %c0_i32 = arith.constant 0 : i32
    %c0_i32_0 = arith.constant 0 : i32
    %c0_i32_1 = arith.constant 0 : i32
    return %c0_i32, %c0_i32_0 : i32, i32
  }
  func.func @transform_5(%arg0: i32) -> (i32, i32) {
    %c0_i32 = arith.constant 0 : i32
    %c0_i32_0 = arith.constant 0 : i32
    %c0_i32_1 = arith.constant 0 : i32
    return %c0_i32, %c0_i32_0 : i32, i32
  }
  func.func @transform_6(%arg0: i32) -> (i32, i32) {
    %c0_i32 = arith.constant 0 : i32
    %c0_i32_0 = arith.constant 0 : i32
    %c0_i32_1 = arith.constant 0 : i32
    return %c0_i32, %c0_i32_0 : i32, i32
  }
  func.func @transform_7(%arg0: i32) -> (i32, i32) {
    %c0_i32 = arith.constant 0 : i32
    %c0_i32_0 = arith.constant 0 : i32
    %c0_i32_1 = arith.constant 0 : i32
    return %c0_i32, %c0_i32_0 : i32, i32
  }
  func.func @transform_8(%arg0: i32) -> (i32, i32) {
    %c0_i32 = arith.constant 0 : i32
    %c0_i32_0 = arith.constant 0 : i32
    %c0_i32_1 = arith.constant 0 : i32
    return %c0_i32, %c0_i32_0 : i32, i32
  }
  func.func @transform_9(%arg0: i32) -> (i32, i32) {
    %c0_i32 = arith.constant 0 : i32
    %c0_i32_0 = arith.constant 0 : i32
    %c0_i32_1 = arith.constant 0 : i32
    return %c0_i32, %c0_i32_0 : i32, i32
  }
  func.func @transform_10(%arg0: i32) -> (i32, i32) {
    %c0_i32 = arith.constant 0 : i32
    %c0_i32_0 = arith.constant 0 : i32
    %c0_i32_1 = arith.constant 0 : i32
    return %c0_i32, %c0_i32_0 : i32, i32
  }
  func.func @transform_11(%arg0: i32) -> (i32, i32) {
    %c0_i32 = arith.constant 0 : i32
    %c0_i32_0 = arith.constant 0 : i32
    return %c0_i32, %arg0 : i32, i32
  }
  func.func @transform_12(%arg0: i32) -> (i32, i32) {
    %c0_i32 = arith.constant 0 : i32
    %c0_i32_0 = arith.constant 0 : i32
    return %c0_i32, %arg0 : i32, i32
  }
}

</mosaic_0001>

<bundles_post_ra>
// kernel: tpu_custom_call.1
= control target key start
LH: loop header
LB: loop body
LE: loop exit
PB: predicated region body
PF: predicated region fallthrough
CT: control target
= control target key end

     0   :  { %s5361_s0 = inlined_call_operand.vmem [shape: f32[128,512], index: 0, kind: input, shape index: {}]   ;;  %s5362_s1 = inlined_call_operand.vmem [shape: f32[1,512], index: 1, kind: input, shape index: {}]   ;;  %s5363_s2 = inlined_call_operand.vmem [shape: f32[128,1], index: 2, kind: input, shape index: {}]   ;;  %s5364_s3 = inlined_call_operand.vmem [shape: bf16[256,128], index: 3, kind: input, shape index: {}]   ;;  %s5365_s4 = inlined_call_operand.vmem [shape: f32[256,1], index: 4, kind: input, shape index: {}]   ;;  %s5366_s5 = inlined_call_operand.vmem [shape: bf16[256,256], index: 5, kind: input, shape index: {}]   ;;  %s5367_s6 = inlined_call_operand.vmem [shape: f32[256,1], index: 6, kind: input, shape index: {}]   ;;  %s5368_s7 = inlined_call_operand.hbm [shape: bf16[128,256], index: 7, kind: input, shape index: {}]   ;;  %s5369_s8 = inlined_call_operand.vmem [shape: f32[128,1], index: 8, kind: input, shape index: {}]   ;;  %s5370_s9 = inlined_call_operand.hbm [shape: bf16[128,256], index: 9, kind: input, shape index: {}]   ;;  %s5371_s10 = inlined_call_operand.vmem [shape: f32[128,1], index: 10, kind: input, shape index: {}]   ;;  %s5372_s11 = inlined_call_operand.hbm [shape: f32[128,512], index: 11, kind: output, shape index: {0}]   ;;  %s5373_s12 = inlined_call_operand.hbm [shape: f32[1,512], index: 12, kind: output, shape index: {1}]  }
   0x1   :  { %5412 = sst [smem:[#allocation50_spill]] %s5372_s11 }
   0x2   :  { %5413 = sst [smem:[#allocation51_spill]] %s5373_s12 }
   0x3   :  { %18 = vsyncpa [#allocation4], 0 }
   0x4   :  { %19 = vsyncpa [#allocation7], 0 }
   0x5   :  { %20 = vsyncpa [#allocation5], 0 }
   0x6   :  { %22 = vsyncpa [#allocation5 + $0x1], 0 }
   0x7   :  { %23 = vsyncpa [#allocation10], 0 }
   0x8   :  { %25 = vsyncpa [#allocation10 + $0x1], 0  ;;  %s3865_s21 = smov 0   ;;  %s3867_s22 = smov 0  }
   0x9   :  { %s3869_s23 = smov 0   ;;  %s3871_s24 = smov 0  }
   0xa LB: > { %5414 = sst [smem:[#allocation15_spill]] %s3775_s21  ;;  %s3886_s25 = sadd.s32 4294967295, %s3787_s24   ;;  %s3787_s24 = sphi %s3871_s24, %s5500_s24   ;;  %s3783_s23 = sphi %s3869_s23, %s5504_s23   ;;  %s3779_s22 = sphi %s3867_s22, %s5503_s22   ;;  %s3775_s21 = sphi %s3865_s21, %s5502_s21  }
   0xb   : > { %s3145_s26 = sadd.s32 4294967294, %s3787_s24   ;;  %s3890_s27 = sadd.s32 1, %s3787_s24  }
   0xc   : > { %5415 = sst [smem:[#allocation16_spill]] %s3890_s27  ;;  %s38_s28 = sadd.s32 1, %s3783_s23 }
   0xd   : > { %s35_s29 = ssub.s32 %s3787_s24, %s3890_s27  ;;  %p45_p0 = scmp.ne.s32.totalorder %s3783_s23, %s3779_s22 }
   0xe   : > { %p36_p1 = scmp.eq.s32.totalorder %s35_s29, 0  ;;  %p46_p2 = scmp.eq.s32.totalorder %s3787_s24, 0 }
   0xf   : > { %p290_p3 = scmp.eq.s32.totalorder %s3886_s25, 1  ;;  %p295_p4 = scmp.ne.s32.totalorder %s3779_s22, %s3775_s21 }
  0x10   : > { %s3902_s30 = scalar_select %p36_p1, %s3783_s23, %s38_s28  }
  0x11   : > { %p3904_p5 = por %p46_p2, %p45_p0  ;;  %p3908_p6 = por %p290_p3, %p45_p0 }
  0x12   : > { %5416 = sst [smem:[#allocation17_spill]] %s3902_s30  ;;  %p296_p7 = scmp.eq.s32.totalorder %s3145_s26, 1 }
  0x13   : > { %s5417_s13 = scalar_select %p3904_p5, 1, 0 }
  0x14   : > { %s5418_s14 = scalar_select %p3908_p6, 1, 0 }
  0x15   : > { %p3146_p8 = scmp.ge.s32.totalorder %s3787_s24, 1  ;;  %p329_p9 = scmp.lt.s32.totalorder %s3787_s24, 3 }
  0x16   : > { %5419 = sst [smem:[#allocation18_spill]] %s5418_s14  ;;  %p3914_p10 = por %p296_p7, %p295_p4 }
  0x17   : > { %p5378_p11 = scmp.eq.s32.totalorder %s3886_s25, 0  ;;  %p3919_p12 = pnand %p3146_p8, %p329_p9 }
  0x18   : > { %s5420_s15 = scalar_select %p3914_p10, 1, 0 }
  0x19   : > { %s5422_s16 = scalar_select %p3919_p12, 1, 0 }
  0x1a   : > { %5421 = sst [smem:[#allocation19_spill]] %s5420_s15  ;;  %s3789_s17 = smov [#allocation3]  }
  0x1b   : > { %s356_s18 = sshll.u32 %s3789_s17, 4  ;;  %p3295_p13 = pneg %p3919_p12  ;;  %s357_s18 = int_to_ptr.vmem [resolvable:$true] %s356_s18 }
  0x1c   : > { %s3790_s20 = smov [#allocation6]   ;;  %s3629_s30 = scalar_lea.hbm %s5368_s7, 2048 }
  0x1d   : > { %p3927_p0 = pnand %p5378_p11, %p3295_p13  ;;  %s372_s26 = sshll.u32 %s3790_s20, 4  ;;  %s3931_s26 = int_to_ptr.vmem [resolvable:$true] %s372_s26 }
  0x1e   : > { %p3630_p1 = scmp.ne.s32.totalorder %s5368_s7, %s3629_s30  ;;  %p3636_p7 = scmp.lt.u32.totalorder %s3629_s30, %s5368_s7 }
  0x1f   : > { %p3631_p2 = pneg %p3927_p0 }
  0x21   : > { %p3632_p3 = pnand %p3631_p2, %p3630_p1 }
  0x23   : > { %p3633_p4 = pneg %p3632_p3 }
  0x25   : > { %p3638_p8 = pnand %p3636_p7, %p3633_p4 }
  0x27   : > { %3641 = shalt.err (!%p3638_p8)
}
  0x28   : > { %s3642_s20 = scalar_lea.vmem %s357_s18, 2048  ;;  %p3650_p10 = scmp.lt.s32.totalorder %s357_s18, %s357_s18 }
  0x29   : > { %p3643_p9 = scmp.ne.s32.totalorder %s357_s18, %s3642_s20  ;;  %p3651_p6 = scmp.lt.s32.totalorder %s3642_s20, %s3642_s20 }
  0x2b   : > { %p3645_p13 = pnand %p3643_p9, %p3631_p2  ;;  %p3652_p12 = por %p3651_p6, %p3650_p10 }
  0x2d   : > { %p3646_p11 = pneg %p3645_p13 }
  0x2f   : > { %p3653_p5 = pnand %p3652_p12, %p3646_p11 }
  0x31   : > { %3656 = shalt.err (!%p3653_p5)
}
  0x32   : > { %s3791_s27 = smov 128   ;;  %s3792_s28 = smov 8  }
  0x33   : > { %3298 = dma.hbm_to_vmem [thread:$0]  (!%p3927_p0), %s5368_s7, 2048, %s357_s18, [#allocation4], %s3791_s27, %s3791_s27, %s3792_s28  }
  0x34   : > { %s3657_s17 = scalar_lea.hbm %s5370_s9, 2048 }
  0x35   : > { %p3658_p1 = scmp.ne.s32.totalorder %s5370_s9, %s3657_s17  ;;  %p3664_p10 = scmp.lt.u32.totalorder %s3657_s17, %s5370_s9 }
  0x37   : > { %p3660_p5 = pnand %p3658_p1, %p3631_p2 }
  0x39   : > { %p3661_p6 = pneg %p3660_p5 }
  0x3b   : > { %p3666_p11 = pnand %p3664_p10, %p3661_p6 }
  0x3d   : > { %3669 = shalt.err (!%p3666_p11)
}
  0x3e   : > { %s3670_s18 = scalar_lea.vmem %s3931_s26, 2048  ;;  %p3678_p7 = scmp.lt.s32.totalorder %s3931_s26, %s3931_s26 }
  0x3f   : > { %p3671_p12 = scmp.ne.s32.totalorder %s3931_s26, %s3670_s18  ;;  %p3679_p8 = scmp.lt.s32.totalorder %s3670_s18, %s3670_s18 }
  0x41   : > { %p3673_p3 = pnand %p3671_p12, %p3631_p2  ;;  %p3680_p9 = por %p3679_p8, %p3678_p7 }
  0x43   : > { %p3674_p4 = pneg %p3673_p3 }
  0x45   : > { %p3681_p13 = pnand %p3680_p9, %p3674_p4 }
  0x47   : > { %3684 = shalt.err (!%p3681_p13)
}
  0x48   : > { %3301 = dma.hbm_to_vmem [thread:$0]  (!%p3927_p0), %s5370_s9, 2048, %s3931_s26, [#allocation7], %s3791_s27, %s3791_s27, %s3792_s28  }
  0x49   : > { %p3149_p1 = scmp.ge.s32.totalorder %s3787_s24, 2 }
  0x4a   : > { %p5424_p2 = scmp.ne.s32.totalorder (!%p3149_p1), %s5417_s13, 0 }
  0x4b   : > { %385 = sbr.rel (%p3149_p1) target bundleno = 102 (0x66), region = 52 }
  0x52   : > { %388 = sbr.rel (!%p5424_p2) target bundleno = 102 (0x66), region = 56  ;;  %s390_s14 = sand.u32 (%p5424_p2), 1, %s3783_s23  }
  0x53   : > { %s3248_s21 = sshll.u32 (%p5424_p2), %s3787_s24, 4  ;;  %s3150_s30 = sshll.u32 (%p5424_p2), %s390_s14, 8 }
  0x54   : > { %s3990_s29 = scalar_lea.vmem (%p5424_p2), %s5361_s0, %s3248_s21  ;;  %s3995_s13 = scalar_lea.vmem (%p5424_p2), [#allocation2], %s3150_s30 }
  0x55   : > { %v408_v0 = vld [vmem:[%s3990_s29] sm:$0xff] (%p5424_p2)  ;;  %v410_v1 = vld [vmem:[%s3990_s29 + $0x8] sm:$0xff] (%p5424_p2) }
  0x56   : > { %v412_v2 = vld [vmem:[%s3990_s29 + $0x20] sm:$0xff] (%p5424_p2)  ;;  %409 = vst [vmem:[%s3995_s13] sm:$0xff] (%p5424_p2), %v408_v0  ;;  %411 = vst [vmem:[%s3995_s13 + $0x8] sm:$0xff] (%p5424_p2), %v410_v1  ;;  %v414_v3 = vld [vmem:[%s3990_s29 + $0x28] sm:$0xff] (%p5424_p2) }
  0x57   : > { %413 = vst [vmem:[%s3995_s13 + $0x10] sm:$0xff] (%p5424_p2), %v412_v2  ;;  %v416_v4 = vld [vmem:[%s3990_s29 + $0x40] sm:$0xff] (%p5424_p2)  ;;  %v418_v5 = vld [vmem:[%s3990_s29 + $0x48] sm:$0xff] (%p5424_p2)  ;;  %415 = vst [vmem:[%s3995_s13 + $0x18] sm:$0xff] (%p5424_p2), %v414_v3 }
  0x58   : > { %417 = vst [vmem:[%s3995_s13 + $0x20] sm:$0xff] (%p5424_p2), %v416_v4  ;;  %419 = vst [vmem:[%s3995_s13 + $0x28] sm:$0xff] (%p5424_p2), %v418_v5  ;;  %v420_v6 = vld [vmem:[%s3990_s29 + $0x60] sm:$0xff] (%p5424_p2)  ;;  %v422_v7 = vld [vmem:[%s3990_s29 + $0x68] sm:$0xff] (%p5424_p2) }
  0x59   : > { %v424_v8 = vld [vmem:[%s3990_s29 + $0x80] sm:$0xff]  ;;  %421 = vst [vmem:[%s3995_s13 + $0x30] sm:$0xff] %v420_v6  ;;  %423 = vst [vmem:[%s3995_s13 + $0x38] sm:$0xff] %v422_v7  ;;  %v426_v9 = vld [vmem:[%s3990_s29 + $0x88] sm:$0xff] }
  0x5a   : > { %425 = vst [vmem:[%s3995_s13 + $0x40] sm:$0xff] %v424_v8  ;;  %v428_v10 = vld [vmem:[%s3990_s29 + $0xa0] sm:$0xff]  ;;  %v430_v11 = vld [vmem:[%s3990_s29 + $0xa8] sm:$0xff]  ;;  %427 = vst [vmem:[%s3995_s13 + $0x48] sm:$0xff] %v426_v9 }
  0x5b   : > { %429 = vst [vmem:[%s3995_s13 + $0x50] sm:$0xff] %v428_v10  ;;  %431 = vst [vmem:[%s3995_s13 + $0x58] sm:$0xff] %v430_v11  ;;  %v432_v12 = vld [vmem:[%s3990_s29 + $0xc0] sm:$0xff]  ;;  %v434_v13 = vld [vmem:[%s3990_s29 + $0xc8] sm:$0xff] }
  0x5c   : > { %v436_v14 = vld [vmem:[%s3990_s29 + $0xe0] sm:$0xff]  ;;  %433 = vst [vmem:[%s3995_s13 + $0x60] sm:$0xff] %v432_v12  ;;  %435 = vst [vmem:[%s3995_s13 + $0x68] sm:$0xff] %v434_v13  ;;  %v438_v15 = vld [vmem:[%s3990_s29 + $0xe8] sm:$0xff] }
  0x5d   : > { %437 = vst [vmem:[%s3995_s13 + $0x70] sm:$0xff] %v436_v14  ;;  %v440_v16 = vld [vmem:[%s3990_s29 + $0x100] sm:$0xff]  ;;  %v442_v17 = vld [vmem:[%s3990_s29 + $0x108] sm:$0xff]  ;;  %439 = vst [vmem:[%s3995_s13 + $0x78] sm:$0xff] %v438_v15 }
  0x5e   : > { %441 = vst [vmem:[%s3995_s13 + $0x80] sm:$0xff] %v440_v16  ;;  %443 = vst [vmem:[%s3995_s13 + $0x88] sm:$0xff] %v442_v17  ;;  %v444_v18 = vld [vmem:[%s3990_s29 + $0x120] sm:$0xff]  ;;  %v446_v19 = vld [vmem:[%s3990_s29 + $0x128] sm:$0xff] }
  0x5f   : > { %v448_v20 = vld [vmem:[%s3990_s29 + $0x140] sm:$0xff]  ;;  %445 = vst [vmem:[%s3995_s13 + $0x90] sm:$0xff] %v444_v18  ;;  %447 = vst [vmem:[%s3995_s13 + $0x98] sm:$0xff] %v446_v19  ;;  %v450_v21 = vld [vmem:[%s3990_s29 + $0x148] sm:$0xff] }
  0x60   : > { %449 = vst [vmem:[%s3995_s13 + $0xa0] sm:$0xff] %v448_v20  ;;  %v452_v22 = vld [vmem:[%s3990_s29 + $0x160] sm:$0xff]  ;;  %v454_v23 = vld [vmem:[%s3990_s29 + $0x168] sm:$0xff]  ;;  %451 = vst [vmem:[%s3995_s13 + $0xa8] sm:$0xff] %v450_v21 }
  0x61   : > { %453 = vst [vmem:[%s3995_s13 + $0xb0] sm:$0xff] %v452_v22  ;;  %455 = vst [vmem:[%s3995_s13 + $0xb8] sm:$0xff] %v454_v23  ;;  %v456_v24 = vld [vmem:[%s3990_s29 + $0x180] sm:$0xff]  ;;  %v458_v25 = vld [vmem:[%s3990_s29 + $0x188] sm:$0xff] }
  0x62   : > { %v460_v26 = vld [vmem:[%s3990_s29 + $0x1a0] sm:$0xff]  ;;  %457 = vst [vmem:[%s3995_s13 + $0xc0] sm:$0xff] %v456_v24  ;;  %459 = vst [vmem:[%s3995_s13 + $0xc8] sm:$0xff] %v458_v25  ;;  %v462_v27 = vld [vmem:[%s3990_s29 + $0x1a8] sm:$0xff] }
  0x63   : > { %461 = vst [vmem:[%s3995_s13 + $0xd0] sm:$0xff] %v460_v26  ;;  %v464_v28 = vld [vmem:[%s3990_s29 + $0x1c0] sm:$0xff]  ;;  %v466_v29 = vld [vmem:[%s3990_s29 + $0x1c8] sm:$0xff]  ;;  %463 = vst [vmem:[%s3995_s13 + $0xd8] sm:$0xff] %v462_v27 }
  0x64   : > { %465 = vst [vmem:[%s3995_s13 + $0xe0] sm:$0xff] %v464_v28  ;;  %467 = vst [vmem:[%s3995_s13 + $0xe8] sm:$0xff] %v466_v29  ;;  %v468_v30 = vld [vmem:[%s3990_s29 + $0x1e0] sm:$0xff]  ;;  %v470_v31 = vld [vmem:[%s3990_s29 + $0x1e8] sm:$0xff] }
  0x65   : > { %469 = vst [vmem:[%s3995_s13 + $0xf0] sm:$0xff] %v468_v30  ;;  %471 = vst [vmem:[%s3995_s13 + $0xf8] sm:$0xff] %v470_v31 }
  0x66 PF: > { %p5425_p0 = scmp.ne.s32.totalorder %s5422_s16, 0 }
  0x68   : > { %488 = sbr.rel (%p5425_p0) target bundleno = 1213 (0x4bd), region = 83 }
  0x6f   : > { %s4061_s26 = sand.u32 1, %s3779_s22   ;;  %p5426_p5 = scmp.eq.s32.totalorder %s3886_s25, 0 }
  0x70   : > { %s3154_s27 = sshll.u32 %s4061_s26, 8 }
  0x71   : > { %s4066_s28 = scalar_lea.vmem [#allocation2], %s3154_s27 }
  0x72   : > { %3758 = dma.done.wait (%p5426_p5), [#allocation4], 2048   ;;  %p5427_p6 = pmov %p5426_p5 }
  0x73   : > { %p5428_p10 = pmov %p5426_p5 }
  0x74   : > { %3760 = vsyncadd (%p5427_p6), [#allocation4], 4294965248 }
  0x75   : > { %3762 = dma.done.wait (%p5428_p10), [#allocation7], 2048   ;;  %p5429_p11 = pmov %p5426_p5 }
  0x76   : > { %v3793_v32 = vmov 0   ;;  %v736_v33 = vld [vmem:[%s5365_s4 + $0x10] sm:$0xff]  ;;  %v734_v34 = vld [vmem:[%s5365_s4] sm:$0xff]  ;;  %v559_v35 = vld [vmem:[%s4066_s28 + $0x8] sm:$0xff]  ;;  %s5061_s30 = scalar_lea.vmem [#allocation8], %s3154_s27  ;;  %s3159_s27 = sshll.u32 %s3886_s25, 1 }
  0x77   : > { %3764 = vsyncadd (%p5429_p11), [#allocation7], 4294965248  ;;  %3356 = vset.pattern.permute.xlu1 %v3793_v32  ;;  %3355 = vset.pattern.permute.xlu0 %v3793_v32  ;;  %v561_v36 = vld [vmem:[%s4066_s28 + $0x18] sm:$0xff]  ;;  %v558_v37 = vld [vmem:[%s4066_s28] sm:$0xff]  ;;  %p5219_p12 = scmp.lt.s32.totalorder %s3159_s27, 3  ;;  %s3249_s16 = sshll.u32 %s3886_s25, 8 }
  0x78   : > { %1054 = vmatprep.mubr.bf16.mxu0 %v3793_v32  ;;  %778 = vperm.xlu1 %3356, %v736_v33   ;;  %v560_v38 = vld [vmem:[%s4066_s28 + $0x10] sm:$0xff]  ;;  %v687_v39 = vpack.c.bf16 %v561_v36, %v559_v35  ;;  %v737_v41 = vld [vmem:[%s5365_s4 + $0x18] sm:$0xff]  ;;  %v735_v42 = vld [vmem:[%s5365_s4 + $0x8] sm:$0xff]  ;;  %s3000_s17 = sshll.u32 %s5061_s30, 4  ;;  %s3250_s20 = sshll.u32 %s3886_s25, 5  ;;  %s5280_s17 = int_to_ptr.vmem [resolvable:$true] %s3000_s17 }
  0x79   : > { %768 = vperm.xlu0 %3355, %v734_v34   ;;  %v686_v40 = vpack.c.bf16 %v560_v38, %v558_v37  ;;  %v563_v43 = vld [vmem:[%s4066_s28 + $0x28] sm:$0xff]  ;;  %v565_v44 = vld [vmem:[%s4066_s28 + $0x38] sm:$0xff]  ;;  %v562_v45 = vld [vmem:[%s4066_s28 + $0x20] sm:$0xff]  ;;  %s5506_s27 = smov (!%p5219_p12, %s3159_s27), 3  ;;  %s5491_s21 = sld [smem:[#allocation50_spill]] }
  0x7a   : > { %v564_v46 = vld [vmem:[%s4066_s28 + $0x30] sm:$0xff]  ;;  %1022 = vmatprep.subr.bf16.mxu0 %v687_v39  ;;  %v689_v47 = vpack.c.bf16 %v565_v44, %v563_v43  ;;  %v567_v48 = vld [vmem:[%s4066_s28 + $0x48] sm:$0xff]  ;;  %v569_v50 = vld [vmem:[%s4066_s28 + $0x58] sm:$0xff]  ;;  %s553_s13 = scalar_lea.vmem %s5362_s1, %s5506_s27  ;;  %s5493_s19 = sld [smem:[#allocation18_spill]] }
  0x7b   : > { %1023 = vmatpush1.bf16.msra.mxu0 %v686_v40  ;;  %v688_v49 = vpack.c.bf16 %v564_v46, %v562_v45  ;;  %v739_v51 = vld [vmem:[%s5365_s4 + $0x28] sm:$0xff]  ;;  %v691_v52 = vpack.c.bf16 %v569_v50, %v567_v48  ;;  %v566_v53 = vld [vmem:[%s4066_s28 + $0x40] sm:$0xff]  ;;  %v568_v54 = vld [vmem:[%s4066_s28 + $0x50] sm:$0xff]  ;;  %s5495_s29 = sld [smem:[#allocation51_spill]]  ;;  %s3795_s14 = smov [#allocation9]  }
  0x7c   : > { %783 = vperm.xlu1 %3356, %v737_v41   ;;  %1024 = vmatprep.subr.bf16.mxu0 %v689_v47  ;;  %v738_v55 = vld [vmem:[%s5365_s4 + $0x20] sm:$0xff]  ;;  %v571_v56 = vld [vmem:[%s4066_s28 + $0x68] sm:$0xff]  ;;  %v573_v57 = vld [vmem:[%s4066_s28 + $0x78] sm:$0xff]  ;;  %v690_v58 = vpack.c.bf16 %v568_v54, %v566_v53 }
  0x7d   : > { %773 = vperm.xlu0 %3355, %v735_v42   ;;  %v741_v59 = vld [vmem:[%s5365_s4 + $0x38] sm:$0xff]  ;;  %v693_v60 = vpack.c.bf16 %v573_v57, %v571_v56  ;;  %v570_v61 = vld [vmem:[%s4066_s28 + $0x60] sm:$0xff]  ;;  %v572_v62 = vld [vmem:[%s4066_s28 + $0x70] sm:$0xff] }
  0x7e   : > { %v740_v63 = vld [vmem:[%s5365_s4 + $0x30] sm:$0xff]  ;;  %v575_v0 = vld [vmem:[%s4066_s28 + $0x88] sm:$0xff]  ;;  %v577_v1 = vld [vmem:[%s4066_s28 + $0x98] sm:$0xff]  ;;  %v692_v2 = vpack.c.bf16 %v572_v62, %v570_v61 }
  0x7f   : > { %1025 = vmatpush1.bf16.msra.mxu0 %v688_v49  ;;  %v743_v3 = vld [vmem:[%s5365_s4 + $0x48] sm:$0xff]  ;;  %v695_v4 = vpack.c.bf16 %v577_v1, %v575_v0  ;;  %v574_v5 = vld [vmem:[%s4066_s28 + $0x80] sm:$0xff]  ;;  %v576_v6 = vld [vmem:[%s4066_s28 + $0x90] sm:$0xff]  ;;  %s5492_s27 = smov %s5491_s21  ;;  %s5278_s15 = scalar_lea.hbm %s5491_s21, %s3249_s16 }
  0x80   : > { %793 = vperm.xlu1 %3356, %v739_v51   ;;  %1026 = vmatprep.subr.bf16.mxu0 %v691_v52  ;;  %v742_v7 = vld [vmem:[%s5365_s4 + $0x40] sm:$0xff]  ;;  %v579_v8 = vld [vmem:[%s4066_s28 + $0xa8] sm:$0xff]  ;;  %v581_v9 = vld [vmem:[%s4066_s28 + $0xb8] sm:$0xff]  ;;  %v694_v10 = vpack.c.bf16 %v576_v6, %v574_v5  ;;  %s2987_s16 = scalar_lea.sflag [#allocation10], %s4061_s26  ;;  %p5496_p4 = scmp.ne.s32.totalorder %s5493_s19, 0 }
  0x81   : > { %788 = vperm.xlu0 %3355, %v738_v55   ;;  %v745_v11 = vld [vmem:[%s5365_s4 + $0x58] sm:$0xff]  ;;  %v744_v12 = vld [vmem:[%s5365_s4 + $0x50] sm:$0xff]  ;;  %v697_v13 = vpack.c.bf16 %v581_v9, %v579_v8  ;;  %v578_v14 = vld [vmem:[%s4066_s28 + $0xa0] sm:$0xff]  ;;  %s3689_s21 = sshll.u32 %s3795_s14, 4  ;;  %s3690_s21 = int_to_ptr.vmem [resolvable:$false] %s3689_s21 }
  0x82   : > { %v580_v15 = vld [vmem:[%s4066_s28 + $0xb0] sm:$0xff]  ;;  %v583_v16 = vld [vmem:[%s4066_s28 + $0xc8] sm:$0xff]  ;;  %v585_v17 = vld [vmem:[%s4066_s28 + $0xd8] sm:$0xff] }
  0x83   : > { %1027 = vmatpush1.bf16.msra.mxu0 %v690_v58  ;;  %v696_v18 = vpack.c.bf16 %v580_v15, %v578_v14  ;;  %v747_v19 = vld [vmem:[%s5365_s4 + $0x68] sm:$0xff]  ;;  %v746_v20 = vld [vmem:[%s5365_s4 + $0x60] sm:$0xff]  ;;  %v699_v21 = vpack.c.bf16 %v585_v17, %v583_v16  ;;  %v584_v23 = vld [vmem:[%s4066_s28 + $0xd0] sm:$0xff] }
  0x84   : > { %803 = vperm.xlu1 %3356, %v741_v59   ;;  %1028 = vmatprep.subr.bf16.mxu0 %v693_v60  ;;  %v582_v22 = vld [vmem:[%s4066_s28 + $0xc0] sm:$0xff]  ;;  %v587_v24 = vld [vmem:[%s4066_s28 + $0xe8] sm:$0xff]  ;;  %v589_v25 = vld [vmem:[%s4066_s28 + $0xf8] sm:$0xff] }
  0x85   : > { %798 = vperm.xlu0 %3355, %v740_v63   ;;  %v698_v26 = vpack.c.bf16 %v584_v23, %v582_v22  ;;  %v749_v27 = vld [vmem:[%s5365_s4 + $0x78] sm:$0xff]  ;;  %v586_v28 = vld [vmem:[%s4066_s28 + $0xe0] sm:$0xff]  ;;  %v701_v29 = vpack.c.bf16 %v589_v25, %v587_v24  ;;  %v588_v30 = vld [vmem:[%s4066_s28 + $0xf0] sm:$0xff] }
  0x86   : > { %v748_v31 = vld [vmem:[%s5365_s4 + $0x70] sm:$0xff]  ;;  %v700_v33 = vpack.c.bf16 %v588_v30, %v586_v28  ;;  %v751_v34 = vld [vmem:[%s5365_s4 + $0x88] sm:$0xff]  ;;  %v750_v35 = vld [vmem:[%s5365_s4 + $0x80] sm:$0xff] }
  0x87   : > { %1029 = vmatpush1.bf16.msra.mxu0 %v692_v2  ;;  %v3357_v36 = vld [vmem:[%s5364_s3] sm:$0xff]   ;;  %v753_v37 = vld [vmem:[%s5365_s4 + $0x98] sm:$0xff]  ;;  %v752_v38 = vld [vmem:[%s5365_s4 + $0x90] sm:$0xff] }
  0x88   : > { %813 = vperm.xlu1 %3356, %v743_v3   ;;  %1030 = vmatprep.subr.bf16.mxu0 %v695_v4  ;;  %v755_v39 = vld [vmem:[%s5365_s4 + $0xa8] sm:$0xff]  ;;  %v754_v40 = vld [vmem:[%s5365_s4 + $0xa0] sm:$0xff]  ;;  %v757_v42 = vld [vmem:[%s5365_s4 + $0xb8] sm:$0xff] }
  0x89   : > { %808 = vperm.xlu0 %3355, %v742_v7   ;;  %v3358_v41 = vld [vmem:[%s5364_s3 + $0x8] sm:$0xff]   ;;  %v756_v43 = vld [vmem:[%s5365_s4 + $0xb0] sm:$0xff]  ;;  %v758_v45 = vld [vmem:[%s5365_s4 + $0xc0] sm:$0xff] }
  0x8a   : > { %v759_v44 = vld [vmem:[%s5365_s4 + $0xc8] sm:$0xff]  ;;  %v3359_v46 = vld [vmem:[%s5364_s3 + $0x10] sm:$0xff]   ;;  %v761_v47 = vld [vmem:[%s5365_s4 + $0xd8] sm:$0xff] }
  0x8b   : > { %1031 = vmatpush1.bf16.msra.mxu0 %v694_v10  ;;  %v760_v48 = vld [vmem:[%s5365_s4 + $0xd0] sm:$0xff]  ;;  %v763_v49 = vld [vmem:[%s5365_s4 + $0xe8] sm:$0xff]  ;;  %v762_v50 = vld [vmem:[%s5365_s4 + $0xe0] sm:$0xff] }
  0x8c   : > { %823 = vperm.xlu1 %3356, %v745_v11   ;;  %1032 = vmatprep.subr.bf16.mxu0 %v697_v13  ;;  %v3360_v51 = vld [vmem:[%s5364_s3 + $0x18] sm:$0xff]   ;;  %v764_v53 = vld [vmem:[%s5365_s4 + $0xf0] sm:$0xff]  ;;  %v1344_v54 = vld [vmem:[%s5367_s6 + $0x8] sm:$0xff] }
  0x8d   : > { %818 = vperm.xlu0 %3355, %v744_v12   ;;  %v765_v52 = vld [vmem:[%s5365_s4 + $0xf8] sm:$0xff]  ;;  %v1343_v55 = vld [vmem:[%s5367_s6] sm:$0xff]  ;;  %v1345_v58 = vld [vmem:[%s5367_s6 + $0x10] sm:$0xff] }
  0x8e   : > { %v3361_v56 = vld [vmem:[%s5364_s3 + $0x20] sm:$0xff]   ;;  %v1346_v57 = vld [vmem:[%s5367_s6 + $0x18] sm:$0xff]  ;;  %v1348_v59 = vld [vmem:[%s5367_s6 + $0x28] sm:$0xff] }
  0x8f   : > { %1033 = vmatpush1.bf16.msra.mxu0 %v696_v18  ;;  %v1347_v60 = vld [vmem:[%s5367_s6 + $0x20] sm:$0xff]  ;;  %v3362_v61 = vld [vmem:[%s5364_s3 + $0x28] sm:$0xff]   ;;  %v1350_v62 = vld [vmem:[%s5367_s6 + $0x38] sm:$0xff] }
  0x90   : > { %833 = vperm.xlu1 %3356, %v747_v19   ;;  %1034 = vmatprep.subr.bf16.mxu0 %v699_v21  ;;  %v1349_v63 = vld [vmem:[%s5367_s6 + $0x30] sm:$0xff]  ;;  %v1352_v0 = vld [vmem:[%s5367_s6 + $0x48] sm:$0xff]  ;;  %v1351_v1 = vld [vmem:[%s5367_s6 + $0x40] sm:$0xff] }
  0x91   : > { %828 = vperm.xlu0 %3355, %v746_v20   ;;  %v3363_v2 = vld [vmem:[%s5364_s3 + $0x30] sm:$0xff]   ;;  %v1354_v3 = vld [vmem:[%s5367_s6 + $0x58] sm:$0xff]  ;;  %v1356_v5 = vld [vmem:[%s5367_s6 + $0x68] sm:$0xff] }
  0x92   : > { %v1353_v4 = vld [vmem:[%s5367_s6 + $0x50] sm:$0xff]  ;;  %v1355_v6 = vld [vmem:[%s5367_s6 + $0x60] sm:$0xff]  ;;  %v3364_v7 = vld [vmem:[%s5364_s3 + $0x38] sm:$0xff]  }
  0x93   : > { %1035 = vmatpush1.bf16.msra.mxu0 %v698_v26  ;;  %v1358_v8 = vld [vmem:[%s5367_s6 + $0x78] sm:$0xff]  ;;  %v1357_v9 = vld [vmem:[%s5367_s6 + $0x70] sm:$0xff]  ;;  %v1360_v10 = vld [vmem:[%s5367_s6 + $0x88] sm:$0xff] }
  0x94   : > { %843 = vperm.xlu1 %3356, %v749_v27   ;;  %1036 = vmatprep.subr.bf16.mxu0 %v701_v29  ;;  %v1359_v11 = vld [vmem:[%s5367_s6 + $0x80] sm:$0xff]  ;;  %v1362_v13 = vld [vmem:[%s5367_s6 + $0x98] sm:$0xff]  ;;  %v1361_v14 = vld [vmem:[%s5367_s6 + $0x90] sm:$0xff] }
  0x95   : > { %838 = vperm.xlu0 %3355, %v748_v31   ;;  %v3365_v12 = vld [vmem:[%s5364_s3 + $0x40] sm:$0xff]   ;;  %v1364_v15 = vld [vmem:[%s5367_s6 + $0xa8] sm:$0xff]  ;;  %v1366_v18 = vld [vmem:[%s5367_s6 + $0xb8] sm:$0xff] }
  0x96   : > { %v1363_v16 = vld [vmem:[%s5367_s6 + $0xa0] sm:$0xff]  ;;  %v3366_v17 = vld [vmem:[%s5364_s3 + $0x48] sm:$0xff]   ;;  %v1365_v19 = vld [vmem:[%s5367_s6 + $0xb0] sm:$0xff] }
  0x97   : > { %1037 = vmatpush1.bf16.msra.mxu0 %v700_v33  ;;  %v1368_v20 = vld [vmem:[%s5367_s6 + $0xc8] sm:$0xff]  ;;  %v1367_v21 = vld [vmem:[%s5367_s6 + $0xc0] sm:$0xff]  ;;  %v3367_v22 = vld [vmem:[%s5364_s3 + $0x50] sm:$0xff]  }
  0x98   : > { %853 = vperm.xlu1 %3356, %v751_v34   ;;  %v1370_v23 = vld [vmem:[%s5367_s6 + $0xd8] sm:$0xff]  ;;  %v1369_v24 = vld [vmem:[%s5367_s6 + $0xd0] sm:$0xff]  ;;  %v1372_v25 = vld [vmem:[%s5367_s6 + $0xe8] sm:$0xff] }
  0x99   : > { %848 = vperm.xlu0 %3355, %v750_v35   ;;  %v1371_v26 = vld [vmem:[%s5367_s6 + $0xe0] sm:$0xff]  ;;  %v3368_v27 = vld [vmem:[%s5364_s3 + $0x58] sm:$0xff]   ;;  %v1373_v29 = vld [vmem:[%s5367_s6 + $0xf0] sm:$0xff] }
  0x9a   : > { %1055 = vmatmul.mubr.bf16.vlgmr.msra.gmra.mrb[0].mxu0 %v3357_v36  ;;  %v1374_v28 = vld [vmem:[%s5367_s6 + $0xf8] sm:$0xff]  ;;  %v591_v30 = vld [vmem:[%s5363_s2 + $0x8] sm:$0xff]  ;;  %v590_v31 = vld [vmem:[%s5363_s2] sm:$0xff] }
  0x9b   : > { %1064 = vmatprep.mubr.bf16.mxu0 %v3793_v32  ;;  %v3369_v33 = vld [vmem:[%s5364_s3 + $0x60] sm:$0xff]   ;;  %v593_v34 = vld [vmem:[%s5363_s2 + $0x18] sm:$0xff]  ;;  %v592_v35 = vld [vmem:[%s5363_s2 + $0x10] sm:$0xff] }
  0x9c   : > { %863 = vperm.xlu1 %3356, %v753_v37   ;;  %v595_v36 = vld [vmem:[%s5363_s2 + $0x28] sm:$0xff]  ;;  %v594_v37 = vld [vmem:[%s5363_s2 + $0x20] sm:$0xff] }
  0x9d   : > { %858 = vperm.xlu0 %3355, %v752_v38   ;;  %v3370_v38 = vld [vmem:[%s5364_s3 + $0x68] sm:$0xff]  }
  0xa0   : > { %873 = vperm.xlu1 %3356, %v755_v39   ;;  %v597_v39 = vld [vmem:[%s5363_s2 + $0x38] sm:$0xff] }
  0xa1   : > { %868 = vperm.xlu0 %3355, %v754_v40   ;;  %v596_v40 = vld [vmem:[%s5363_s2 + $0x30] sm:$0xff] }
  0xa2   : > { %1065 = vmatmul.mubr.bf16.gmra.mrb[4].mxu0 %v3358_v41  ;;  %v599_v41 = vld [vmem:[%s5363_s2 + $0x48] sm:$0xff] }
  0xa3   : > { %1074 = vmatprep.mubr.bf16.mxu0 %v3793_v32 }
  0xa4   : > { %883 = vperm.xlu1 %3356, %v757_v42   ;;  %v598_v42 = vld [vmem:[%s5363_s2 + $0x40] sm:$0xff] }
  0xa5   : > { %878 = vperm.xlu0 %3355, %v756_v43   ;;  %v3371_v43 = vld [vmem:[%s5364_s3 + $0x70] sm:$0xff]  }
  0xa8   : > { %893 = vperm.xlu1 %3356, %v759_v44   ;;  %v601_v44 = vld [vmem:[%s5363_s2 + $0x58] sm:$0xff] }
  0xa9   : > { %888 = vperm.xlu0 %3355, %v758_v45   ;;  %v600_v45 = vld [vmem:[%s5363_s2 + $0x50] sm:$0xff] }
  0xaa   : > { %1075 = vmatmul.mubr.bf16.gmra.mrb[8].mxu0 %v3359_v46  ;;  %v603_v46 = vld [vmem:[%s5363_s2 + $0x68] sm:$0xff] }
  0xab   : > { %1084 = vmatprep.mubr.bf16.mxu0 %v3793_v32 }
  0xac   : > { %903 = vperm.xlu1 %3356, %v761_v47   ;;  %v602_v47 = vld [vmem:[%s5363_s2 + $0x60] sm:$0xff] }
  0xad   : > { %898 = vperm.xlu0 %3355, %v760_v48   ;;  %v3372_v48 = vld [vmem:[%s5364_s3 + $0x78] sm:$0xff]  }
  0xb0   : > { %913 = vperm.xlu1 %3356, %v763_v49   ;;  %v605_v49 = vld [vmem:[%s5363_s2 + $0x78] sm:$0xff] }
  0xb1   : > { %908 = vperm.xlu0 %3355, %v762_v50   ;;  %v2001_v50 = vld [vmem:[%s5369_s8 + $0x8] sm:$0xff] }
  0xb2   : > { %1085 = vmatmul.mubr.bf16.gmra.mrb[12].mxu0 %v3360_v51  ;;  %v2000_v51 = vld [vmem:[%s5369_s8] sm:$0xff] }
  0xb3   : > { %1094 = vmatprep.mubr.bf16.mxu0 %v3793_v32 }
  0xb4   : > { %923 = vperm.xlu1 %3356, %v765_v52   ;;  %v2003_v52 = vld [vmem:[%s5369_s8 + $0x18] sm:$0xff] }
  0xb5   : > { %918 = vperm.xlu0 %3355, %v764_v53   ;;  %v2002_v53 = vld [vmem:[%s5369_s8 + $0x10] sm:$0xff] }
  0xb8   : > { %1382 = vperm.xlu1 %3356, %v1344_v54   ;;  %v2005_v54 = vld [vmem:[%s5369_s8 + $0x28] sm:$0xff] }
  0xb9   : > { %1377 = vperm.xlu0 %3355, %v1343_v55   ;;  %v2004_v55 = vld [vmem:[%s5369_s8 + $0x20] sm:$0xff] }
  0xba   : > { %1095 = vmatmul.mubr.bf16.gmra.mrb[16].mxu0 %v3361_v56  ;;  %v2007_v56 = vld [vmem:[%s5369_s8 + $0x38] sm:$0xff] }
  0xbb   : > { %1104 = vmatprep.mubr.bf16.mxu0 %v3793_v32 }
  0xbc   : > { %1392 = vperm.xlu1 %3356, %v1346_v57   ;;  %v2006_v57 = vld [vmem:[%s5369_s8 + $0x30] sm:$0xff] }
  0xbd   : > { %1387 = vperm.xlu0 %3355, %v1345_v58   ;;  %v2009_v58 = vld [vmem:[%s5369_s8 + $0x48] sm:$0xff] }
  0xc0   : > { %1402 = vperm.xlu1 %3356, %v1348_v59   ;;  %v2008_v59 = vld [vmem:[%s5369_s8 + $0x40] sm:$0xff] }
  0xc1   : > { %1397 = vperm.xlu0 %3355, %v1347_v60   ;;  %v2011_v60 = vld [vmem:[%s5369_s8 + $0x58] sm:$0xff] }
  0xc2   : > { %1105 = vmatmul.mubr.bf16.gmra.mrb[20].mxu0 %v3362_v61  ;;  %v2010_v61 = vld [vmem:[%s5369_s8 + $0x50] sm:$0xff] }
  0xc3   : > { %1114 = vmatprep.mubr.bf16.mxu0 %v3793_v32 }
  0xc4   : > { %1412 = vperm.xlu1 %3356, %v1350_v62   ;;  %v2013_v62 = vld [vmem:[%s5369_s8 + $0x68] sm:$0xff] }
  0xc5   : > { %1407 = vperm.xlu0 %3355, %v1349_v63   ;;  %v2012_v63 = vld [vmem:[%s5369_s8 + $0x60] sm:$0xff] }
  0xc8   : > { %1422 = vperm.xlu1 %3356, %v1352_v0  }
  0xc9   : > { %1417 = vperm.xlu0 %3355, %v1351_v1  }
  0xca   : > { %1115 = vmatmul.mubr.bf16.gmra.mrb[24].mxu0 %v3363_v2  ;;  %v2015_v2 = vld [vmem:[%s5369_s8 + $0x78] sm:$0xff] }
  0xcb   : > { %1124 = vmatprep.mubr.bf16.mxu0 %v3793_v32 }
  0xcc   : > { %1432 = vperm.xlu1 %3356, %v1354_v3   ;;  %v2014_v3 = vld [vmem:[%s5369_s8 + $0x70] sm:$0xff] }
  0xcd   : > { %1427 = vperm.xlu0 %3355, %v1353_v4   ;;  %v2338_v4 = vld [vmem:[%s5371_s10 + $0x8] sm:$0xff] }
  0xd0   : > { %1442 = vperm.xlu1 %3356, %v1356_v5  }
  0xd1   : > { %1437 = vperm.xlu0 %3355, %v1355_v6   ;;  %v2337_v6 = vld [vmem:[%s5371_s10] sm:$0xff] }
  0xd2   : > { %1125 = vmatmul.mubr.bf16.gmra.mrb[28].mxu0 %v3364_v7 }
  0xd3   : > { %1134 = vmatprep.mubr.bf16.mxu0 %v3793_v32 }
  0xd4   : > { %1452 = vperm.xlu1 %3356, %v1358_v8   ;;  %v2340_v8 = vld [vmem:[%s5371_s10 + $0x18] sm:$0xff] }
  0xd5   : > { %1447 = vperm.xlu0 %3355, %v1357_v9   ;;  %v2339_v9 = vld [vmem:[%s5371_s10 + $0x10] sm:$0xff] }
  0xd8   : > { %1462 = vperm.xlu1 %3356, %v1360_v10  }
  0xd9   : > { %1457 = vperm.xlu0 %3355, %v1359_v11  }
  0xda   : > { %1135 = vmatmul.mubr.bf16.gmra.mrb[32].mxu0 %v3365_v12  ;;  %v2342_v12 = vld [vmem:[%s5371_s10 + $0x28] sm:$0xff] }
  0xdb   : > { %1144 = vmatprep.mubr.bf16.mxu0 %v3793_v32 }
  0xdc   : > { %1472 = vperm.xlu1 %3356, %v1362_v13   ;;  %v2341_v13 = vld [vmem:[%s5371_s10 + $0x20] sm:$0xff] }
  0xdd   : > { %1467 = vperm.xlu0 %3355, %v1361_v14   ;;  %v2344_v14 = vld [vmem:[%s5371_s10 + $0x38] sm:$0xff] }
  0xe0   : > { %1482 = vperm.xlu1 %3356, %v1364_v15  }
  0xe1   : > { %1477 = vperm.xlu0 %3355, %v1363_v16   ;;  %v2343_v16 = vld [vmem:[%s5371_s10 + $0x30] sm:$0xff] }
  0xe2   : > { %1145 = vmatmul.mubr.bf16.gmra.mrb[36].mxu0 %v3366_v17 }
  0xe3   : > { %1154 = vmatprep.mubr.bf16.mxu0 %v3793_v32 }
  0xe4   : > { %1492 = vperm.xlu1 %3356, %v1366_v18   ;;  %v2346_v18 = vld [vmem:[%s5371_s10 + $0x48] sm:$0xff] }
  0xe5   : > { %1487 = vperm.xlu0 %3355, %v1365_v19   ;;  %v2345_v19 = vld [vmem:[%s5371_s10 + $0x40] sm:$0xff] }
  0xe8   : > { %1502 = vperm.xlu1 %3356, %v1368_v20  }
  0xe9   : > { %1497 = vperm.xlu0 %3355, %v1367_v21  }
  0xea   : > { %1155 = vmatmul.mubr.bf16.gmra.mrb[40].mxu0 %v3367_v22  ;;  %v2348_v22 = vld [vmem:[%s5371_s10 + $0x58] sm:$0xff] }
  0xeb   : > { %1164 = vmatprep.mubr.bf16.mxu0 %v3793_v32 }
  0xec   : > { %1512 = vperm.xlu1 %3356, %v1370_v23   ;;  %v2347_v23 = vld [vmem:[%s5371_s10 + $0x50] sm:$0xff] }
  0xed   : > { %1507 = vperm.xlu0 %3355, %v1369_v24   ;;  %v2350_v24 = vld [vmem:[%s5371_s10 + $0x68] sm:$0xff] }
  0xf0   : > { %1522 = vperm.xlu1 %3356, %v1372_v25  }
  0xf1   : > { %1517 = vperm.xlu0 %3355, %v1371_v26   ;;  %v2349_v26 = vld [vmem:[%s5371_s10 + $0x60] sm:$0xff] }
  0xf2   : > { %1165 = vmatmul.mubr.bf16.gmra.mrb[44].mxu0 %v3368_v27 }
  0xf3   : > { %1174 = vmatprep.mubr.bf16.mxu0 %v3793_v32 }
  0xf4   : > { %1532 = vperm.xlu1 %3356, %v1374_v28   ;;  %v2352_v28 = vld [vmem:[%s5371_s10 + $0x78] sm:$0xff] }
  0xf5   : > { %1527 = vperm.xlu0 %3355, %v1373_v29   ;;  %v2351_v29 = vld [vmem:[%s5371_s10 + $0x70] sm:$0xff] }
  0xf7   : > { %v4456_v0 = vpop.permute.xlu1 %778 }
  0xf8   : > { %613 = vperm.xlu1 %3356, %v591_v30   ;;  %v769_v1 = vpop.permute.xlu0 %768 }
  0xf9   : > { %608 = vperm.xlu0 %3355, %v590_v31  }
  0xfa   : > { %1175 = vmatmul.mubr.bf16.gmra.mrb[48].mxu0 %v3369_v33 }
  0xfb   : > { %1184 = vmatprep.mubr.bf16.mxu0 %v3793_v32  ;;  %v4467_v5 = vpop.permute.xlu1 %783 }
  0xfc   : > { %623 = vperm.xlu1 %3356, %v593_v34   ;;  %v774_v7 = vpop.permute.xlu0 %773 }
  0xfd   : > { %618 = vperm.xlu0 %3355, %v592_v35  }
  0xff   : > { %v4478_v10 = vpop.permute.xlu1 %793 }
 0x100   : > { %633 = vperm.xlu1 %3356, %v595_v36   ;;  %v4480_v11 = vpop.permute.xlu0 %788 }
 0x101   : > { %628 = vperm.xlu0 %3355, %v594_v37  }
 0x102   : > { %1185 = vmatmul.mubr.bf16.gmra.mrb[52].mxu0 %v3370_v38 }
 0x103   : > { %1194 = vmatprep.mubr.bf16.mxu0 %v3793_v32  ;;  %v4491_v15 = vpop.permute.xlu1 %803 }
 0x104   : > { %643 = vperm.xlu1 %3356, %v597_v39   ;;  %v4496_v17 = vpop.permute.xlu0 %798 }
 0x105   : > { %638 = vperm.xlu0 %3355, %v596_v40   ;;  %v3375_v40 = vld [vmem:[%s5366_s5 + $0x4] ss:$8 sps:$4 sm:$0xff]  }
 0x106   : > { %1727 = vmatprep.mubr.bf16.mxu1 %v3375_v40 }
 0x107   : > { %v4504_v20 = vpop.permute.xlu1 %813 }
 0x108   : > { %653 = vperm.xlu1 %3356, %v599_v41   ;;  %v4506_v21 = vpop.permute.xlu0 %808 }
 0x109   : > { %648 = vperm.xlu0 %3355, %v598_v42  }
 0x10a   : > { %1195 = vmatmul.mubr.bf16.gmra.mrb[56].mxu0 %v3371_v43 }
 0x10b   : > { %1204 = vmatprep.mubr.bf16.mxu0 %v3793_v32  ;;  %v604_v32 = vld [vmem:[%s5363_s2 + $0x70] sm:$0xff]  ;;  %v4517_v25 = vpop.permute.xlu1 %823 }
 0x10c   : > { %663 = vperm.xlu1 %3356, %v601_v44   ;;  %v4522_v27 = vpop.permute.xlu0 %818 }
 0x10d   : > { %658 = vperm.xlu0 %3355, %v600_v45  }
 0x10f   : > { %v4530_v30 = vpop.permute.xlu1 %833 }
 0x110   : > { %673 = vperm.xlu1 %3356, %v603_v46   ;;  %v4532_v31 = vpop.permute.xlu0 %828 }
 0x111   : > { %668 = vperm.xlu0 %3355, %v602_v47  }
 0x112   : > { %1205 = vmatmul.mubr.bf16.gmra.mrb[60].mxu0 %v3372_v48 }
 0x114   : > { %683 = vperm.xlu1 %3356, %v605_v49  }
 0x115   : > { %678 = vperm.xlu0 %3355, %v604_v32  }
 0x118   : > { %2023 = vperm.xlu1 %3356, %v2001_v50  }
 0x119   : > { %2018 = vperm.xlu0 %3355, %v2000_v51  }
 0x11c   : > { %2033 = vperm.xlu1 %3356, %v2003_v52  }
 0x11d   : > { %2028 = vperm.xlu0 %3355, %v2002_v53  }
 0x120   : > { %2043 = vperm.xlu1 %3356, %v2005_v54  }
 0x121   : > { %2038 = vperm.xlu0 %3355, %v2004_v55  }
 0x124   : > { %2053 = vperm.xlu1 %3356, %v2007_v56  }
 0x125   : > { %2048 = vperm.xlu0 %3355, %v2006_v57  }
 0x128   : > { %2063 = vperm.xlu1 %3356, %v2009_v58  }
 0x129   : > { %2058 = vperm.xlu0 %3355, %v2008_v59  }
 0x12c   : > { %2073 = vperm.xlu1 %3356, %v2011_v60  }
 0x12d   : > { %2068 = vperm.xlu0 %3355, %v2010_v61  }
 0x130   : > { %2083 = vperm.xlu1 %3356, %v2013_v62  }
 0x131   : > { %2078 = vperm.xlu0 %3355, %v2012_v63  }
 0x134   : > { %2093 = vperm.xlu1 %3356, %v2015_v2  }
 0x135   : > { %2088 = vperm.xlu0 %3355, %v2014_v3  }
 0x138   : > { %2360 = vperm.xlu1 %3356, %v2338_v4  }
 0x139   : > { %2355 = vperm.xlu0 %3355, %v2337_v6  }
 0x13c   : > { %2370 = vperm.xlu1 %3356, %v2340_v8  }
 0x13d   : > { %2365 = vperm.xlu0 %3355, %v2339_v9  }
 0x140   : > { %2380 = vperm.xlu1 %3356, %v2342_v12  }
 0x141   : > { %2375 = vperm.xlu0 %3355, %v2341_v13  }
 0x144   : > { %2390 = vperm.xlu1 %3356, %v2344_v14  }
 0x145   : > { %2385 = vperm.xlu0 %3355, %v2343_v16  }
 0x148   : > { %2400 = vperm.xlu1 %3356, %v2346_v18  }
 0x149   : > { %2395 = vperm.xlu0 %3355, %v2345_v19  }
 0x14c   : > { %2410 = vperm.xlu1 %3356, %v2348_v22  }
 0x14d   : > { %2405 = vperm.xlu0 %3355, %v2347_v23  }
 0x150   : > { %2420 = vperm.xlu1 %3356, %v2350_v24  }
 0x151   : > { %2415 = vperm.xlu0 %3355, %v2349_v26  }
 0x154   : > { %2430 = vperm.xlu1 %3356, %v2352_v28  }
 0x155   : > { %2425 = vperm.xlu0 %3355, %v2351_v29  }
 0x16d   : > { %v1056_v33 = vpop.f32.mrb[0].mxu0 }
 0x16e   : > { %v1057_v34 = vadd.f32 %v1056_v33, %v769_v1  ;;  %v1058_v35 = vpop.f32.mrb[1].mxu0 }
 0x16f   : > { %v1059_v36 = vadd.f32 %v1058_v35, %v769_v1  ;;  %v1060_v37 = vpop.f32.mrb[2].mxu0 }
 0x170   : > { %v1061_v38 = vadd.f32 %v1060_v37, %v774_v7  ;;  %v1062_v39 = vpop.f32.mrb[3].mxu0  ;;  %v1215_v42 = vmax.f32 %v1057_v34, 0.0 }
 0x171   : > { %v1063_v41 = vadd.f32 %v1062_v39, %v774_v7  ;;  %v1216_v44 = vmax.f32 %v1059_v36, 0.0 }
 0x172   : > { %v1217_v43 = vmax.f32 %v1061_v38, 0.0 }
 0x173   : > { %v1218_v45 = vmax.f32 %v1063_v41, 0.0 }
 0x174   : > { %v1311_v46 = vpack.c.bf16 %v1217_v43, %v1215_v42 }
 0x175   : > { %v1066_v47 = vpop.f32.mrb[4].mxu0  ;;  %v1312_v48 = vpack.c.bf16 %v1218_v45, %v1216_v44 }
 0x176   : > { %v1067_v49 = vadd.f32 %v1066_v47, %v4456_v0  ;;  %v1068_v32 = vpop.f32.mrb[5].mxu0 }
 0x177   : > { %v1069_v50 = vadd.f32 %v1068_v32, %v4456_v0  ;;  %v1070_v51 = vpop.f32.mrb[6].mxu0  ;;  %1695 = vmatprep.subr.bf16.mxu1 %v1312_v48 }
 0x178   : > { %v1071_v52 = vadd.f32 %v1070_v51, %v4467_v5  ;;  %v1072_v53 = vpop.f32.mrb[7].mxu0  ;;  %1696 = vmatpush1.bf16.msra.mxu1 %v1311_v46  ;;  %v1219_v55 = vmax.f32 %v1067_v49, 0.0 }
 0x179   : > { %v1073_v54 = vadd.f32 %v1072_v53, %v4467_v5  ;;  %v1220_v57 = vmax.f32 %v1069_v50, 0.0 }
 0x17a   : > { %v1221_v56 = vmax.f32 %v1071_v52, 0.0 }
 0x17b   : > { %v1222_v58 = vmax.f32 %v1073_v54, 0.0 }
 0x17c   : > { %v1313_v59 = vpack.c.bf16 %v1221_v56, %v1219_v55 }
 0x17d   : > { %v1314_v60 = vpack.c.bf16 %v1222_v58, %v1220_v57  ;;  %v1076_v61 = vpop.f32.mrb[8].mxu0 }
 0x17e   : > { %v1077_v62 = vadd.f32 %v1076_v61, %v4480_v11  ;;  %v1078_v63 = vpop.f32.mrb[9].mxu0 }
 0x17f   : > { %v1079_v0 = vadd.f32 %v1078_v63, %v4480_v11  ;;  %v1080_v1 = vpop.f32.mrb[10].mxu0  ;;  %1697 = vmatprep.subr.bf16.mxu1 %v1314_v60 }
 0x180   : > { %v1081_v2 = vadd.f32 %v1080_v1, %v4478_v10  ;;  %v1082_v3 = vpop.f32.mrb[11].mxu0  ;;  %1698 = vmatpush1.bf16.msra.mxu1 %v1313_v59  ;;  %v1223_v5 = vmax.f32 %v1077_v62, 0.0 }
 0x181   : > { %v1083_v4 = vadd.f32 %v1082_v3, %v4478_v10  ;;  %v1224_v7 = vmax.f32 %v1079_v0, 0.0 }
 0x182   : > { %v1225_v6 = vmax.f32 %v1081_v2, 0.0 }
 0x183   : > { %v1226_v8 = vmax.f32 %v1083_v4, 0.0  ;;  %v839_v4 = vpop.permute.xlu0 %838 }
 0x184   : > { %v1315_v9 = vpack.c.bf16 %v1225_v6, %v1223_v5 }
 0x185   : > { %v1316_v12 = vpack.c.bf16 %v1226_v8, %v1224_v7  ;;  %v1086_v13 = vpop.f32.mrb[12].mxu0 }
 0x186   : > { %v1087_v14 = vadd.f32 %v1086_v13, %v4496_v17  ;;  %v1088_v16 = vpop.f32.mrb[13].mxu0 }
 0x187   : > { %v1089_v11 = vadd.f32 %v1088_v16, %v4496_v17  ;;  %v1090_v18 = vpop.f32.mrb[14].mxu0  ;;  %1699 = vmatprep.subr.bf16.mxu1 %v1316_v12 }
 0x188   : > { %v1091_v19 = vadd.f32 %v1090_v18, %v4491_v15  ;;  %v1092_v22 = vpop.f32.mrb[15].mxu0  ;;  %1700 = vmatpush1.bf16.msra.mxu1 %v1315_v9  ;;  %v1227_v23 = vmax.f32 %v1087_v14, 0.0  ;;  %v844_v9 = vpop.permute.xlu1 %843 }
 0x189   : > { %v1093_v10 = vadd.f32 %v1092_v22, %v4491_v15  ;;  %v1228_v26 = vmax.f32 %v1089_v11, 0.0 }
 0x18a   : > { %v1229_v24 = vmax.f32 %v1091_v19, 0.0 }
 0x18b   : > { %v1230_v28 = vmax.f32 %v1093_v10, 0.0  ;;  %v849_v10 = vpop.permute.xlu0 %848 }
 0x18c   : > { %v1317_v29 = vpack.c.bf16 %v1229_v24, %v1227_v23 }
 0x18d   : > { %v1318_v33 = vpack.c.bf16 %v1230_v28, %v1228_v26  ;;  %v1096_v34 = vpop.f32.mrb[16].mxu0 }
 0x18e   : > { %v1097_v35 = vadd.f32 %v1096_v34, %v4506_v21  ;;  %v1098_v36 = vpop.f32.mrb[17].mxu0 }
 0x18f   : > { %v1099_v17 = vadd.f32 %v1098_v36, %v4506_v21  ;;  %v1100_v37 = vpop.f32.mrb[18].mxu0  ;;  %1701 = vmatprep.subr.bf16.mxu1 %v1318_v33 }
 0x190   : > { %v1101_v38 = vadd.f32 %v1100_v37, %v4504_v20  ;;  %v1102_v39 = vpop.f32.mrb[19].mxu0  ;;  %1702 = vmatpush1.bf16.msra.mxu1 %v1317_v29  ;;  %v1231_v40 = vmax.f32 %v1097_v35, 0.0  ;;  %v854_v29 = vpop.permute.xlu1 %853 }
 0x191   : > { %v1103_v15 = vadd.f32 %v1102_v39, %v4504_v20  ;;  %v1232_v42 = vmax.f32 %v1099_v17, 0.0 }
 0x192   : > { %v1233_v41 = vmax.f32 %v1101_v38, 0.0 }
 0x193   : > { %v1234_v43 = vmax.f32 %v1103_v15, 0.0 }
 0x194   : > { %v1319_v44 = vpack.c.bf16 %v1233_v41, %v1231_v40  ;;  %v859_v41 = vpop.permute.xlu0 %858 }
 0x195   : > { %v1320_v45 = vpack.c.bf16 %v1234_v43, %v1232_v42  ;;  %v1106_v46 = vpop.f32.mrb[20].mxu0 }
 0x196   : > { %v1107_v47 = vadd.f32 %v1106_v46, %v4522_v27  ;;  %v1108_v48 = vpop.f32.mrb[21].mxu0  ;;  %v864_v46 = vpop.permute.xlu1 %863 }
 0x197   : > { %v1109_v21 = vadd.f32 %v1108_v48, %v4522_v27  ;;  %v1110_v49 = vpop.f32.mrb[22].mxu0  ;;  %1703 = vmatprep.subr.bf16.mxu1 %v1320_v45 }
 0x198   : > { %v1111_v32 = vadd.f32 %v1110_v49, %v4517_v25  ;;  %v1112_v50 = vpop.f32.mrb[23].mxu0  ;;  %1704 = vmatpush1.bf16.msra.mxu1 %v1319_v44  ;;  %v1235_v51 = vmax.f32 %v1107_v47, 0.0 }
 0x199   : > { %v1113_v20 = vadd.f32 %v1112_v50, %v4517_v25  ;;  %v1236_v53 = vmax.f32 %v1109_v21, 0.0 }
 0x19a   : > { %v1237_v52 = vmax.f32 %v1111_v32, 0.0 }
 0x19b   : > { %v1238_v54 = vmax.f32 %v1113_v20, 0.0 }
 0x19c   : > { %v1321_v55 = vpack.c.bf16 %v1237_v52, %v1235_v51 }
 0x19d   : > { %v1322_v56 = vpack.c.bf16 %v1238_v54, %v1236_v53  ;;  %v1116_v57 = vpop.f32.mrb[24].mxu0  ;;  %v869_v54 = vpop.permute.xlu0 %868 }
 0x19e   : > { %v1117_v58 = vadd.f32 %v1116_v57, %v4532_v31  ;;  %v1118_v59 = vpop.f32.mrb[25].mxu0 }
 0x19f   : > { %v1119_v27 = vadd.f32 %v1118_v59, %v4532_v31  ;;  %v1120_v60 = vpop.f32.mrb[26].mxu0  ;;  %1705 = vmatprep.subr.bf16.mxu1 %v1322_v56  ;;  %v874_v59 = vpop.permute.xlu1 %873 }
 0x1a0   : > { %v1121_v61 = vadd.f32 %v1120_v60, %v4530_v30  ;;  %v1122_v62 = vpop.f32.mrb[27].mxu0  ;;  %1706 = vmatpush1.bf16.msra.mxu1 %v1321_v55  ;;  %v1239_v63 = vmax.f32 %v1117_v58, 0.0 }
 0x1a1   : > { %v1123_v25 = vadd.f32 %v1122_v62, %v4530_v30  ;;  %v1240_v1 = vmax.f32 %v1119_v27, 0.0 }
 0x1a2   : > { %v1241_v0 = vmax.f32 %v1121_v61, 0.0 }
 0x1a3   : > { %v1242_v2 = vmax.f32 %v1123_v25, 0.0 }
 0x1a4   : > { %v1323_v3 = vpack.c.bf16 %v1241_v0, %v1239_v63 }
 0x1a5   : > { %v1324_v5 = vpack.c.bf16 %v1242_v2, %v1240_v1  ;;  %v1126_v6 = vpop.f32.mrb[28].mxu0 }
 0x1a6   : > { %v1127_v7 = vadd.f32 %v1126_v6, %v839_v4  ;;  %v1128_v8 = vpop.f32.mrb[29].mxu0 }
 0x1a7   : > { %v1129_v31 = vadd.f32 %v1128_v8, %v839_v4  ;;  %v1130_v12 = vpop.f32.mrb[30].mxu0  ;;  %1707 = vmatprep.subr.bf16.mxu1 %v1324_v5  ;;  %v879_v4 = vpop.permute.xlu0 %878 }
 0x1a8   : > { %v1131_v13 = vadd.f32 %v1130_v12, %v844_v9  ;;  %v1132_v14 = vpop.f32.mrb[31].mxu0  ;;  %1708 = vmatpush1.bf16.msra.mxu1 %v1323_v3  ;;  %v1243_v11 = vmax.f32 %v1127_v7, 0.0 }
 0x1a9   : > { %v1133_v16 = vadd.f32 %v1132_v14, %v844_v9  ;;  %v1244_v18 = vmax.f32 %v1129_v31, 0.0  ;;  %v884_v9 = vpop.permute.xlu1 %883 }
 0x1aa   : > { %v1245_v30 = vmax.f32 %v1131_v13, 0.0 }
 0x1ab   : > { %v1246_v19 = vmax.f32 %v1133_v16, 0.0 }
 0x1ac   : > { %v1325_v22 = vpack.c.bf16 %v1245_v30, %v1243_v11 }
 0x1ad   : > { %v1326_v23 = vpack.c.bf16 %v1246_v19, %v1244_v18  ;;  %v1136_v24 = vpop.f32.mrb[32].mxu0 }
 0x1ae   : > { %v1137_v26 = vadd.f32 %v1136_v24, %v849_v10  ;;  %v1138_v28 = vpop.f32.mrb[33].mxu0 }
 0x1af   : > { %v1139_v33 = vadd.f32 %v1138_v28, %v849_v10  ;;  %v1140_v34 = vpop.f32.mrb[34].mxu0  ;;  %1709 = vmatprep.subr.bf16.mxu1 %v1326_v23  ;;  %v889_v10 = vpop.permute.xlu0 %888 }
 0x1b0   : > { %v1141_v35 = vadd.f32 %v1140_v34, %v854_v29  ;;  %v1142_v36 = vpop.f32.mrb[35].mxu0  ;;  %1710 = vmatpush1.bf16.msra.mxu1 %v1325_v22  ;;  %v1247_v37 = vmax.f32 %v1137_v26, 0.0 }
 0x1b1   : > { %v1143_v17 = vadd.f32 %v1142_v36, %v854_v29  ;;  %v1248_v39 = vmax.f32 %v1139_v33, 0.0  ;;  %v894_v29 = vpop.permute.xlu1 %893 }
 0x1b2   : > { %v1249_v38 = vmax.f32 %v1141_v35, 0.0 }
 0x1b3   : > { %v1250_v15 = vmax.f32 %v1143_v17, 0.0 }
 0x1b4   : > { %v1327_v40 = vpack.c.bf16 %v1249_v38, %v1247_v37 }
 0x1b5   : > { %v1328_v42 = vpack.c.bf16 %v1250_v15, %v1248_v39  ;;  %v1146_v43 = vpop.f32.mrb[36].mxu0 }
 0x1b6   : > { %v1147_v44 = vadd.f32 %v1146_v43, %v859_v41  ;;  %v1148_v45 = vpop.f32.mrb[37].mxu0 }
 0x1b7   : > { %v1149_v47 = vadd.f32 %v1148_v45, %v859_v41  ;;  %v1150_v48 = vpop.f32.mrb[38].mxu0  ;;  %1711 = vmatprep.subr.bf16.mxu1 %v1328_v42  ;;  %v899_v41 = vpop.permute.xlu0 %898 }
 0x1b8   : > { %v1151_v21 = vadd.f32 %v1150_v48, %v864_v46  ;;  %v1152_v49 = vpop.f32.mrb[39].mxu0  ;;  %1712 = vmatpush1.bf16.msra.mxu1 %v1327_v40  ;;  %v1251_v50 = vmax.f32 %v1147_v44, 0.0 }
 0x1b9   : > { %v1153_v32 = vadd.f32 %v1152_v49, %v864_v46  ;;  %v1252_v51 = vmax.f32 %v1149_v47, 0.0  ;;  %v904_v46 = vpop.permute.xlu1 %903 }
 0x1ba   : > { %v1253_v20 = vmax.f32 %v1151_v21, 0.0 }
 0x1bb   : > { %v1254_v52 = vmax.f32 %v1153_v32, 0.0 }
 0x1bc   : > { %v1329_v53 = vpack.c.bf16 %v1253_v20, %v1251_v50 }
 0x1bd   : > { %v1330_v55 = vpack.c.bf16 %v1254_v52, %v1252_v51  ;;  %v1156_v56 = vpop.f32.mrb[40].mxu0 }
 0x1be   : > { %v1157_v57 = vadd.f32 %v1156_v56, %v869_v54  ;;  %v1158_v58 = vpop.f32.mrb[41].mxu0 }
 0x1bf   : > { %v1159_v27 = vadd.f32 %v1158_v58, %v869_v54  ;;  %v1160_v60 = vpop.f32.mrb[42].mxu0  ;;  %1713 = vmatprep.subr.bf16.mxu1 %v1330_v55  ;;  %v909_v54 = vpop.permute.xlu0 %908 }
 0x1c0   : > { %v1161_v61 = vadd.f32 %v1160_v60, %v874_v59  ;;  %v1162_v62 = vpop.f32.mrb[43].mxu0  ;;  %1714 = vmatpush1.bf16.msra.mxu1 %v1329_v53  ;;  %v1255_v63 = vmax.f32 %v1157_v57, 0.0 }
 0x1c1   : > { %v1163_v25 = vadd.f32 %v1162_v62, %v874_v59  ;;  %v1256_v1 = vmax.f32 %v1159_v27, 0.0  ;;  %v914_v59 = vpop.permute.xlu1 %913 }
 0x1c2   : > { %v1257_v0 = vmax.f32 %v1161_v61, 0.0 }
 0x1c3   : > { %v1258_v2 = vmax.f32 %v1163_v25, 0.0 }
 0x1c4   : > { %v1331_v3 = vpack.c.bf16 %v1257_v0, %v1255_v63 }
 0x1c5   : > { %v1332_v5 = vpack.c.bf16 %v1258_v2, %v1256_v1  ;;  %v1166_v6 = vpop.f32.mrb[44].mxu0 }
 0x1c6   : > { %v1167_v7 = vadd.f32 %v1166_v6, %v879_v4  ;;  %v1168_v8 = vpop.f32.mrb[45].mxu0 }
 0x1c7   : > { %v1169_v31 = vadd.f32 %v1168_v8, %v879_v4  ;;  %v1170_v12 = vpop.f32.mrb[46].mxu0  ;;  %1715 = vmatprep.subr.bf16.mxu1 %v1332_v5  ;;  %v919_v4 = vpop.permute.xlu0 %918 }
 0x1c8   : > { %v1171_v13 = vadd.f32 %v1170_v12, %v884_v9  ;;  %v1172_v14 = vpop.f32.mrb[47].mxu0  ;;  %1716 = vmatpush1.bf16.msra.mxu1 %v1331_v3  ;;  %v1259_v11 = vmax.f32 %v1167_v7, 0.0 }
 0x1c9   : > { %v1173_v16 = vadd.f32 %v1172_v14, %v884_v9  ;;  %v1260_v18 = vmax.f32 %v1169_v31, 0.0  ;;  %v924_v9 = vpop.permute.xlu1 %923 }
 0x1ca   : > { %v1261_v30 = vmax.f32 %v1171_v13, 0.0 }
 0x1cb   : > { %v1262_v19 = vmax.f32 %v1173_v16, 0.0 }
 0x1cc   : > { %v1333_v22 = vpack.c.bf16 %v1261_v30, %v1259_v11 }
 0x1cd   : > { %v1334_v23 = vpack.c.bf16 %v1262_v19, %v1260_v18  ;;  %v1176_v24 = vpop.f32.mrb[48].mxu0 }
 0x1ce   : > { %v1177_v26 = vadd.f32 %v1176_v24, %v889_v10  ;;  %v1178_v28 = vpop.f32.mrb[49].mxu0  ;;  %v3376_v24 = vld [vmem:[%s5366_s5 + $0x14] ss:$8 sps:$4 sm:$0xff]  }
 0x1cf   : > { %v1179_v33 = vadd.f32 %v1178_v28, %v889_v10  ;;  %v1180_v34 = vpop.f32.mrb[50].mxu0  ;;  %1717 = vmatprep.subr.bf16.mxu1 %v1334_v23  ;;  %v3373_v23 = vld [vmem:[%s5366_s5] ss:$8 sps:$4 sm:$0xff]   ;;  %v3379_v28 = vld [vmem:[%s5366_s5 + $0x24] ss:$8 sps:$4 sm:$0xff]  }
 0x1d0   : > { %v1181_v35 = vadd.f32 %v1180_v34, %v894_v29  ;;  %v1182_v36 = vpop.f32.mrb[51].mxu0  ;;  %1718 = vmatpush1.bf16.msra.mxu1 %v1333_v22  ;;  %v1263_v37 = vmax.f32 %v1177_v26, 0.0  ;;  %v3378_v26 = vld [vmem:[%s5366_s5 + $0x10] ss:$8 sps:$4 sm:$0xff]  }
 0x1d1   : > { %v1183_v17 = vadd.f32 %v1182_v36, %v894_v29  ;;  %v1264_v39 = vmax.f32 %v1179_v33, 0.0  ;;  %v3381_v29 = vld [vmem:[%s5366_s5 + $0x20] ss:$8 sps:$4 sm:$0xff]   ;;  %v3382_v33 = vld [vmem:[%s5366_s5 + $0x34] ss:$8 sps:$4 sm:$0xff]  }
 0x1d2   : > { %v1265_v38 = vmax.f32 %v1181_v35, 0.0  ;;  %v3384_v34 = vld [vmem:[%s5366_s5 + $0x30] ss:$8 sps:$4 sm:$0xff]   ;;  %v3385_v35 = vld [vmem:[%s5366_s5 + $0x44] ss:$8 sps:$4 sm:$0xff]  }
 0x1d3   : > { %v1266_v15 = vmax.f32 %v1183_v17, 0.0  ;;  %v3387_v36 = vld [vmem:[%s5366_s5 + $0x40] ss:$8 sps:$4 sm:$0xff]   ;;  %v3388_v17 = vld [vmem:[%s5366_s5 + $0x54] ss:$8 sps:$4 sm:$0xff]  }
 0x1d4   : > { %v1335_v40 = vpack.c.bf16 %v1265_v38, %v1263_v37  ;;  %v3390_v37 = vld [vmem:[%s5366_s5 + $0x50] ss:$8 sps:$4 sm:$0xff]   ;;  %v3391_v38 = vld [vmem:[%s5366_s5 + $0x64] ss:$8 sps:$4 sm:$0xff]  }
 0x1d5   : > { %v1336_v42 = vpack.c.bf16 %v1266_v15, %v1264_v39  ;;  %v1186_v43 = vpop.f32.mrb[52].mxu0  ;;  %v3393_v39 = vld [vmem:[%s5366_s5 + $0x60] ss:$8 sps:$4 sm:$0xff]   ;;  %v3394_v15 = vld [vmem:[%s5366_s5 + $0x74] ss:$8 sps:$4 sm:$0xff]  }
 0x1d6   : > { %v1187_v44 = vadd.f32 %v1186_v43, %v899_v41  ;;  %v1188_v45 = vpop.f32.mrb[53].mxu0  ;;  %v3400_v43 = vld [vmem:[%s5366_s5 + $0x94] ss:$8 sps:$4 sm:$0xff]  }
 0x1d7   : > { %v1189_v47 = vadd.f32 %v1188_v45, %v899_v41  ;;  %v1190_v48 = vpop.f32.mrb[54].mxu0  ;;  %1719 = vmatprep.subr.bf16.mxu1 %v1336_v42  ;;  %v3397_v41 = vld [vmem:[%s5366_s5 + $0x84] ss:$8 sps:$4 sm:$0xff]   ;;  %v3399_v42 = vld [vmem:[%s5366_s5 + $0x80] ss:$8 sps:$4 sm:$0xff]  }
 0x1d8   : > { %v1191_v21 = vadd.f32 %v1190_v48, %v904_v46  ;;  %v1192_v49 = vpop.f32.mrb[55].mxu0  ;;  %1720 = vmatpush1.bf16.msra.mxu1 %v1335_v40  ;;  %v1267_v50 = vmax.f32 %v1187_v44, 0.0  ;;  %v3396_v40 = vld [vmem:[%s5366_s5 + $0x70] ss:$8 sps:$4 sm:$0xff]   ;;  %v3403_v45 = vld [vmem:[%s5366_s5 + $0xa4] ss:$8 sps:$4 sm:$0xff]  }
 0x1d9   : > { %v1193_v32 = vadd.f32 %v1192_v49, %v904_v46  ;;  %v1268_v51 = vmax.f32 %v1189_v47, 0.0  ;;  %v3402_v44 = vld [vmem:[%s5366_s5 + $0x90] ss:$8 sps:$4 sm:$0xff]   ;;  %v3405_v46 = vld [vmem:[%s5366_s5 + $0xa0] ss:$8 sps:$4 sm:$0xff]  }
 0x1da   : > { %v1269_v20 = vmax.f32 %v1191_v21, 0.0  ;;  %v3406_v47 = vld [vmem:[%s5366_s5 + $0xb4] ss:$8 sps:$4 sm:$0xff]   ;;  %v3408_v48 = vld [vmem:[%s5366_s5 + $0xb0] ss:$8 sps:$4 sm:$0xff]  }
 0x1db   : > { %v1270_v52 = vmax.f32 %v1193_v32, 0.0  ;;  %v3409_v21 = vld [vmem:[%s5366_s5 + $0xc4] ss:$8 sps:$4 sm:$0xff]   ;;  %v3411_v49 = vld [vmem:[%s5366_s5 + $0xc0] ss:$8 sps:$4 sm:$0xff]  }
 0x1dc   : > { %v1337_v53 = vpack.c.bf16 %v1269_v20, %v1267_v50  ;;  %v3412_v32 = vld [vmem:[%s5366_s5 + $0xd4] ss:$8 sps:$4 sm:$0xff]   ;;  %v3414_v50 = vld [vmem:[%s5366_s5 + $0xd0] ss:$8 sps:$4 sm:$0xff]   ;;  %v3415_v20 = vld [vmem:[%s5366_s5 + $0xe4] ss:$8 sps:$4 sm:$0xff]  }
 0x1dd   : > { %v1338_v55 = vpack.c.bf16 %v1270_v52, %v1268_v51  ;;  %v1196_v56 = vpop.f32.mrb[56].mxu0  ;;  %v3417_v51 = vld [vmem:[%s5366_s5 + $0xe0] ss:$8 sps:$4 sm:$0xff]   ;;  %v3418_v52 = vld [vmem:[%s5366_s5 + $0xf4] ss:$8 sps:$4 sm:$0xff]  }
 0x1de   : > { %v1197_v57 = vadd.f32 %v1196_v56, %v909_v54  ;;  %v1198_v58 = vpop.f32.mrb[57].mxu0 }
 0x1df   : > { %v1199_v27 = vadd.f32 %v1198_v58, %v909_v54  ;;  %v1200_v60 = vpop.f32.mrb[58].mxu0  ;;  %1721 = vmatprep.subr.bf16.mxu1 %v1338_v55  ;;  %v1378_v54 = vpop.permute.xlu0 %1377 }
 0x1e0   : > { %v1201_v61 = vadd.f32 %v1200_v60, %v914_v59  ;;  %v1202_v62 = vpop.f32.mrb[59].mxu0  ;;  %1722 = vmatpush1.bf16.msra.mxu1 %v1337_v53  ;;  %v1271_v63 = vmax.f32 %v1197_v57, 0.0  ;;  %v3420_v53 = vld [vmem:[%s5366_s5 + $0xf0] ss:$8 sps:$4 sm:$0xff]   ;;  %v1383_v58 = vpop.permute.xlu1 %1382 }
 0x1e1   : > { %v1203_v25 = vadd.f32 %v1202_v62, %v914_v59  ;;  %v1272_v1 = vmax.f32 %v1199_v27, 0.0  ;;  %v3423_v62 = vld [vmem:[#allocation3 + $0x4] ss:$8 sps:$4 sm:$0xff]  }
 0x1e2   : > { %v1273_v0 = vmax.f32 %v1201_v61, 0.0  ;;  %2208 = vmatprep.mubr.bf16.mxu0 %v3423_v62 }
 0x1e3   : > { %v1274_v2 = vmax.f32 %v1203_v25, 0.0  ;;  %v3426_v25 = vld [vmem:[#allocation6 + $0x24] ss:$8 sps:$4 sm:$0xff]  }
 0x1e4   : > { %v1339_v3 = vpack.c.bf16 %v1273_v0, %v1271_v63 }
 0x1e5   : > { %v1340_v5 = vpack.c.bf16 %v1274_v2, %v1272_v1  ;;  %v1206_v6 = vpop.f32.mrb[60].mxu0 }
 0x1e6   : > { %v1207_v7 = vadd.f32 %v1206_v6, %v919_v4  ;;  %v1208_v8 = vpop.f32.mrb[61].mxu0 }
 0x1e7   : > { %v1209_v31 = vadd.f32 %v1208_v8, %v919_v4  ;;  %v1210_v12 = vpop.f32.mrb[62].mxu0  ;;  %1723 = vmatprep.subr.bf16.mxu1 %v1340_v5  ;;  %v1388_v5 = vpop.permute.xlu0 %1387 }
 0x1e8   : > { %v1211_v13 = vadd.f32 %v1210_v12, %v924_v9  ;;  %v1212_v14 = vpop.f32.mrb[63].mxu0  ;;  %1724 = vmatpush1.bf16.msra.mxu1 %v1339_v3  ;;  %v1275_v11 = vmax.f32 %v1207_v7, 0.0 }
 0x1e9   : > { %v1213_v16 = vadd.f32 %v1212_v14, %v924_v9  ;;  %v1276_v18 = vmax.f32 %v1209_v31, 0.0  ;;  %v1393_v31 = vpop.permute.xlu1 %1392 }
 0x1ea   : > { %v1277_v30 = vmax.f32 %v1211_v13, 0.0 }
 0x1eb   : > { %v1278_v19 = vmax.f32 %v1213_v16, 0.0 }
 0x1ec   : > { %v1341_v22 = vpack.c.bf16 %v1277_v30, %v1275_v11 }
 0x1ed   : > { %v1342_v10 = vpack.c.bf16 %v1278_v19, %v1276_v18 }
 0x1ef   : > { %1725 = vmatprep.subr.bf16.mxu1 %v1342_v10 }
 0x1f0   : > { %1726 = vmatpush1.bf16.msra.mxu1 %v1341_v22 }
 0x1f3   : > { %1728 = vmatmul.mubr.bf16.vlgmr.msra.gmra.mrb[0].mxu1 %v3373_v23  ;;  %v1398_v23 = vpop.permute.xlu0 %1397 }
 0x1f4   : > { %1737 = vmatprep.mubr.bf16.mxu1 %v3376_v24 }
 0x1fb   : > { %1738 = vmatmul.mubr.bf16.gmra.mrb[4].mxu1 %v3378_v26 }
 0x1fc   : > { %1747 = vmatprep.mubr.bf16.mxu1 %v3379_v28 }
 0x203   : > { %1748 = vmatmul.mubr.bf16.gmra.mrb[8].mxu1 %v3381_v29 }
 0x204   : > { %1757 = vmatprep.mubr.bf16.mxu1 %v3382_v33  ;;  %v1403_v33 = vpop.permute.xlu1 %1402 }
 0x20b   : > { %1758 = vmatmul.mubr.bf16.gmra.mrb[12].mxu1 %v3384_v34 }
 0x20c   : > { %1767 = vmatprep.mubr.bf16.mxu1 %v3385_v35 }
 0x213   : > { %1768 = vmatmul.mubr.bf16.gmra.mrb[16].mxu1 %v3387_v36 }
 0x214   : > { %1777 = vmatprep.mubr.bf16.mxu1 %v3388_v17 }
 0x21b   : > { %1778 = vmatmul.mubr.bf16.gmra.mrb[20].mxu1 %v3390_v37 }
 0x21c   : > { %1787 = vmatprep.mubr.bf16.mxu1 %v3391_v38 }
 0x223   : > { %1788 = vmatmul.mubr.bf16.gmra.mrb[24].mxu1 %v3393_v39 }
 0x224   : > { %1797 = vmatprep.mubr.bf16.mxu1 %v3394_v15 }
 0x22b   : > { %1798 = vmatmul.mubr.bf16.gmra.mrb[28].mxu1 %v3396_v40 }
 0x22c   : > { %1807 = vmatprep.mubr.bf16.mxu1 %v3397_v41 }
 0x233   : > { %1808 = vmatmul.mubr.bf16.gmra.mrb[32].mxu1 %v3399_v42  ;;  %v1408_v42 = vpop.permute.xlu0 %1407 }
 0x234   : > { %1817 = vmatprep.mubr.bf16.mxu1 %v3400_v43 }
 0x23b   : > { %1818 = vmatmul.mubr.bf16.gmra.mrb[36].mxu1 %v3402_v44 }
 0x23c   : > { %1827 = vmatprep.mubr.bf16.mxu1 %v3403_v45 }
 0x243   : > { %1828 = vmatmul.mubr.bf16.gmra.mrb[40].mxu1 %v3405_v46 }
 0x244   : > { %1837 = vmatprep.mubr.bf16.mxu1 %v3406_v47  ;;  %v1413_v47 = vpop.permute.xlu1 %1412 }
 0x24b   : > { %1838 = vmatmul.mubr.bf16.gmra.mrb[44].mxu1 %v3408_v48 }
 0x24c   : > { %1847 = vmatprep.mubr.bf16.mxu1 %v3409_v21 }
 0x253   : > { %1848 = vmatmul.mubr.bf16.gmra.mrb[48].mxu1 %v3411_v49 }
 0x254   : > { %1857 = vmatprep.mubr.bf16.mxu1 %v3412_v32 }
 0x25b   : > { %1858 = vmatmul.mubr.bf16.gmra.mrb[52].mxu1 %v3414_v50 }
 0x25c   : > { %1867 = vmatprep.mubr.bf16.mxu1 %v3415_v20 }
 0x263   : > { %1868 = vmatmul.mubr.bf16.gmra.mrb[56].mxu1 %v3417_v51 }
 0x264   : > { %1877 = vmatprep.mubr.bf16.mxu1 %v3418_v52 }
 0x26b   : > { %1878 = vmatmul.mubr.bf16.gmra.mrb[60].mxu1 %v3420_v53 }
 0x26c   : > { %2565 = vmatprep.mubr.bf16.mxu1 %v3426_v25 }
 0x2c6   : > { %v1729_v55 = vpop.f32.mrb[0].mxu1 }
 0x2c7   : > { %v1730_v56 = vadd.f32 %v1729_v55, %v1378_v54  ;;  %v1731_v57 = vpop.f32.mrb[1].mxu1  ;;  %v1418_v55 = vpop.permute.xlu0 %1417 }
 0x2c8   : > { %v1732_v59 = vadd.f32 %v1731_v57, %v1378_v54  ;;  %v1733_v27 = vpop.f32.mrb[2].mxu1 }
 0x2c9   : > { %v1734_v60 = vadd.f32 %v1733_v27, %v1383_v58  ;;  %v1735_v61 = vpop.f32.mrb[3].mxu1  ;;  %v1888_v0 = vmax.f32 %v1730_v56, 0.0  ;;  %v1423_v27 = vpop.permute.xlu1 %1422 }
 0x2ca   : > { %v1736_v63 = vadd.f32 %v1735_v61, %v1383_v58  ;;  %v1889_v2 = vmax.f32 %v1732_v59, 0.0 }
 0x2cb   : > { %v1890_v1 = vmax.f32 %v1734_v60, 0.0 }
 0x2cc   : > { %v1891_v3 = vmax.f32 %v1736_v63, 0.0 }
 0x2cd   : > { %v4654_v4 = vpack.c.bf16 %v1890_v1, %v1888_v0 }
 0x2ce   : > { %v4656_v6 = vpack.c.bf16 %v1891_v3, %v1889_v2  ;;  %v1739_v7 = vpop.f32.mrb[4].mxu1 }
 0x2cf   : > { %v1740_v8 = vadd.f32 %v1739_v7, %v1388_v5  ;;  %v1741_v9 = vpop.f32.mrb[5].mxu1  ;;  %v1428_v7 = vpop.permute.xlu0 %1427 }
 0x2d0   : > { %v1742_v12 = vadd.f32 %v1741_v9, %v1388_v5  ;;  %v1743_v13 = vpop.f32.mrb[6].mxu1  ;;  %2176 = vmatprep.subr.bf16.mxu0 %v4656_v6  ;;  %3251 = vmatprep.subr.bf16.mxu1 %v4656_v6 }
 0x2d1   : > { %v1744_v14 = vadd.f32 %v1743_v13, %v1393_v31  ;;  %v1745_v16 = vpop.f32.mrb[7].mxu1  ;;  %2177 = vmatpush1.bf16.msra.mxu0 %v4654_v4  ;;  %3267 = vmatpush1.bf16.msra.mxu1 %v4654_v4  ;;  %v1892_v30 = vmax.f32 %v1740_v8, 0.0  ;;  %v1433_v13 = vpop.permute.xlu1 %1432 }
 0x2d2   : > { %v1746_v11 = vadd.f32 %v1745_v16, %v1393_v31  ;;  %v1893_v19 = vmax.f32 %v1742_v12, 0.0 }
 0x2d3   : > { %v1894_v18 = vmax.f32 %v1744_v14, 0.0 }
 0x2d4   : > { %v1895_v22 = vmax.f32 %v1746_v11, 0.0 }
 0x2d5   : > { %v4662_v10 = vpack.c.bf16 %v1894_v18, %v1892_v30 }
 0x2d6   : > { %v4664_v24 = vpack.c.bf16 %v1895_v22, %v1893_v19  ;;  %v1749_v26 = vpop.f32.mrb[8].mxu1 }
 0x2d7   : > { %v1750_v28 = vadd.f32 %v1749_v26, %v1398_v23  ;;  %v1751_v29 = vpop.f32.mrb[9].mxu1 }
 0x2d8   : > { %v1752_v34 = vadd.f32 %v1751_v29, %v1398_v23  ;;  %v1753_v35 = vpop.f32.mrb[10].mxu1  ;;  %2178 = vmatprep.subr.bf16.mxu0 %v4664_v24  ;;  %3252 = vmatprep.subr.bf16.mxu1 %v4664_v24  ;;  %v1438_v29 = vpop.permute.xlu0 %1437 }
 0x2d9   : > { %v1754_v36 = vadd.f32 %v1753_v35, %v1403_v33  ;;  %v1755_v17 = vpop.f32.mrb[11].mxu1  ;;  %2179 = vmatpush1.bf16.msra.mxu0 %v4662_v10  ;;  %3268 = vmatpush1.bf16.msra.mxu1 %v4662_v10  ;;  %v1896_v38 = vmax.f32 %v1750_v28, 0.0 }
 0x2da   : > { %v1756_v37 = vadd.f32 %v1755_v17, %v1403_v33  ;;  %v1897_v15 = vmax.f32 %v1752_v34, 0.0  ;;  %v1443_v17 = vpop.permute.xlu1 %1442 }
 0x2db   : > { %v1898_v39 = vmax.f32 %v1754_v36, 0.0 }
 0x2dc   : > { %v1899_v40 = vmax.f32 %v1756_v37, 0.0 }
 0x2dd   : > { %v4670_v41 = vpack.c.bf16 %v1898_v39, %v1896_v38 }
 0x2de   : > { %v4672_v43 = vpack.c.bf16 %v1899_v40, %v1897_v15  ;;  %v1759_v44 = vpop.f32.mrb[12].mxu1 }
 0x2df   : > { %v1760_v45 = vadd.f32 %v1759_v44, %v1408_v42  ;;  %v1761_v46 = vpop.f32.mrb[13].mxu1 }
 0x2e0   : > { %v1762_v48 = vadd.f32 %v1761_v46, %v1408_v42  ;;  %v1763_v21 = vpop.f32.mrb[14].mxu1  ;;  %2180 = vmatprep.subr.bf16.mxu0 %v4672_v43  ;;  %3253 = vmatprep.subr.bf16.mxu1 %v4672_v43 }
 0x2e1   : > { %v1764_v49 = vadd.f32 %v1763_v21, %v1413_v47  ;;  %v1765_v32 = vpop.f32.mrb[15].mxu1  ;;  %2181 = vmatpush1.bf16.msra.mxu0 %v4670_v41  ;;  %3269 = vmatpush1.bf16.msra.mxu1 %v4670_v41  ;;  %v1900_v20 = vmax.f32 %v1760_v45, 0.0 }
 0x2e2   : > { %v1766_v50 = vadd.f32 %v1765_v32, %v1413_v47  ;;  %v1901_v52 = vmax.f32 %v1762_v48, 0.0  ;;  %v1448_v48 = vpop.permute.xlu0 %1447 }
 0x2e3   : > { %v1902_v51 = vmax.f32 %v1764_v49, 0.0 }
 0x2e4   : > { %v1903_v53 = vmax.f32 %v1766_v50, 0.0 }
 0x2e5   : > { %v4678_v54 = vpack.c.bf16 %v1902_v51, %v1900_v20  ;;  %v1453_v20 = vpop.permute.xlu1 %1452 }
 0x2e6   : > { %v4680_v56 = vpack.c.bf16 %v1903_v53, %v1901_v52  ;;  %v1769_v57 = vpop.f32.mrb[16].mxu1 }
 0x2e7   : > { %v1770_v58 = vadd.f32 %v1769_v57, %v1418_v55  ;;  %v1771_v59 = vpop.f32.mrb[17].mxu1 }
 0x2e8   : > { %v1772_v60 = vadd.f32 %v1771_v59, %v1418_v55  ;;  %v1773_v61 = vpop.f32.mrb[18].mxu1  ;;  %2182 = vmatprep.subr.bf16.mxu0 %v4680_v56  ;;  %3254 = vmatprep.subr.bf16.mxu1 %v4680_v56 }
 0x2e9   : > { %v1774_v62 = vadd.f32 %v1773_v61, %v1423_v27  ;;  %v1775_v25 = vpop.f32.mrb[19].mxu1  ;;  %2183 = vmatpush1.bf16.msra.mxu0 %v4678_v54  ;;  %3270 = vmatpush1.bf16.msra.mxu1 %v4678_v54  ;;  %v1904_v0 = vmax.f32 %v1770_v58, 0.0 }
 0x2ea   : > { %v1776_v63 = vadd.f32 %v1775_v25, %v1423_v27  ;;  %v1905_v2 = vmax.f32 %v1772_v60, 0.0 }
 0x2eb   : > { %v1906_v1 = vmax.f32 %v1774_v62, 0.0  ;;  %v1458_v62 = vpop.permute.xlu0 %1457 }
 0x2ec   : > { %v1907_v3 = vmax.f32 %v1776_v63, 0.0 }
 0x2ed   : > { %v4686_v5 = vpack.c.bf16 %v1906_v1, %v1904_v0 }
 0x2ee   : > { %v4688_v8 = vpack.c.bf16 %v1907_v3, %v1905_v2  ;;  %v1779_v9 = vpop.f32.mrb[20].mxu1  ;;  %v1463_v2 = vpop.permute.xlu1 %1462 }
 0x2ef   : > { %v1780_v31 = vadd.f32 %v1779_v9, %v1428_v7  ;;  %v1781_v12 = vpop.f32.mrb[21].mxu1 }
 0x2f0   : > { %v1782_v14 = vadd.f32 %v1781_v12, %v1428_v7  ;;  %v1783_v16 = vpop.f32.mrb[22].mxu1  ;;  %2184 = vmatprep.subr.bf16.mxu0 %v4688_v8  ;;  %3255 = vmatprep.subr.bf16.mxu1 %v4688_v8 }
 0x2f1   : > { %v1784_v11 = vadd.f32 %v1783_v16, %v1433_v13  ;;  %v1785_v30 = vpop.f32.mrb[23].mxu1  ;;  %2185 = vmatpush1.bf16.msra.mxu0 %v4686_v5  ;;  %3271 = vmatpush1.bf16.msra.mxu1 %v4686_v5  ;;  %v1908_v19 = vmax.f32 %v1780_v31, 0.0 }
 0x2f2   : > { %v1786_v18 = vadd.f32 %v1785_v30, %v1433_v13  ;;  %v1909_v23 = vmax.f32 %v1782_v14, 0.0 }
 0x2f3   : > { %v1910_v22 = vmax.f32 %v1784_v11, 0.0 }
 0x2f4   : > { %v1911_v26 = vmax.f32 %v1786_v18, 0.0  ;;  %v1468_v18 = vpop.permute.xlu0 %1467 }
 0x2f5   : > { %v4694_v28 = vpack.c.bf16 %v1910_v22, %v1908_v19 }
 0x2f6   : > { %v4696_v33 = vpack.c.bf16 %v1911_v26, %v1909_v23  ;;  %v1789_v34 = vpop.f32.mrb[24].mxu1 }
 0x2f7   : > { %v1790_v35 = vadd.f32 %v1789_v34, %v1438_v29  ;;  %v1791_v36 = vpop.f32.mrb[25].mxu1 }
 0x2f8   : > { %v1792_v37 = vadd.f32 %v1791_v36, %v1438_v29  ;;  %v1793_v38 = vpop.f32.mrb[26].mxu1  ;;  %2186 = vmatprep.subr.bf16.mxu0 %v4696_v33  ;;  %3256 = vmatprep.subr.bf16.mxu1 %v4696_v33  ;;  %v1473_v29 = vpop.permute.xlu1 %1472 }
 0x2f9   : > { %v1794_v39 = vadd.f32 %v1793_v38, %v1443_v17  ;;  %v1795_v15 = vpop.f32.mrb[27].mxu1  ;;  %2187 = vmatpush1.bf16.msra.mxu0 %v4694_v28  ;;  %3272 = vmatpush1.bf16.msra.mxu1 %v4694_v28  ;;  %v1912_v42 = vmax.f32 %v1790_v35, 0.0 }
 0x2fa   : > { %v1796_v40 = vadd.f32 %v1795_v15, %v1443_v17  ;;  %v1913_v45 = vmax.f32 %v1792_v37, 0.0 }
 0x2fb   : > { %v1914_v44 = vmax.f32 %v1794_v39, 0.0 }
 0x2fc   : > { %v1915_v46 = vmax.f32 %v1796_v40, 0.0 }
 0x2fd   : > { %v4702_v47 = vpack.c.bf16 %v1914_v44, %v1912_v42  ;;  %v1478_v44 = vpop.permute.xlu0 %1477 }
 0x2fe   : > { %v4704_v21 = vpack.c.bf16 %v1915_v46, %v1913_v45  ;;  %v1799_v49 = vpop.f32.mrb[28].mxu1 }
 0x2ff   : > { %v1800_v32 = vadd.f32 %v1799_v49, %v1448_v48  ;;  %v1801_v50 = vpop.f32.mrb[29].mxu1 }
 0x300   : > { %v1802_v51 = vadd.f32 %v1801_v50, %v1448_v48  ;;  %v1803_v52 = vpop.f32.mrb[30].mxu1  ;;  %2188 = vmatprep.subr.bf16.mxu0 %v4704_v21  ;;  %3257 = vmatprep.subr.bf16.mxu1 %v4704_v21 }
 0x301   : > { %v1804_v53 = vadd.f32 %v1803_v52, %v1453_v20  ;;  %v1805_v55 = vpop.f32.mrb[31].mxu1  ;;  %2189 = vmatpush1.bf16.msra.mxu0 %v4702_v47  ;;  %3273 = vmatpush1.bf16.msra.mxu1 %v4702_v47  ;;  %v1916_v58 = vmax.f32 %v1800_v32, 0.0  ;;  %v1483_v32 = vpop.permute.xlu1 %1482 }
 0x302   : > { %v1806_v57 = vadd.f32 %v1805_v55, %v1453_v20  ;;  %v1917_v27 = vmax.f32 %v1802_v51, 0.0 }
 0x303   : > { %v1918_v59 = vmax.f32 %v1804_v53, 0.0 }
 0x304   : > { %v1919_v60 = vmax.f32 %v1806_v57, 0.0 }
 0x305   : > { %v4710_v61 = vpack.c.bf16 %v1918_v59, %v1916_v58 }
 0x306   : > { %v4712_v25 = vpack.c.bf16 %v1919_v60, %v1917_v27  ;;  %v1809_v63 = vpop.f32.mrb[32].mxu1  ;;  %v1488_v60 = vpop.permute.xlu0 %1487 }
 0x307   : > { %v1810_v0 = vadd.f32 %v1809_v63, %v1458_v62  ;;  %v1811_v1 = vpop.f32.mrb[33].mxu1 }
 0x308   : > { %v1812_v3 = vadd.f32 %v1811_v1, %v1458_v62  ;;  %v1813_v7 = vpop.f32.mrb[34].mxu1  ;;  %2190 = vmatprep.subr.bf16.mxu0 %v4712_v25  ;;  %3258 = vmatprep.subr.bf16.mxu1 %v4712_v25 }
 0x309   : > { %v1814_v9 = vadd.f32 %v1813_v7, %v1463_v2  ;;  %v1815_v31 = vpop.f32.mrb[35].mxu1  ;;  %2191 = vmatpush1.bf16.msra.mxu0 %v4710_v61  ;;  %3274 = vmatpush1.bf16.msra.mxu1 %v4710_v61  ;;  %v1920_v13 = vmax.f32 %v1810_v0, 0.0 }
 0x30a   : > { %v1816_v12 = vadd.f32 %v1815_v31, %v1463_v2  ;;  %v1921_v16 = vmax.f32 %v1812_v3, 0.0  ;;  %v1493_v2 = vpop.permute.xlu1 %1492 }
 0x30b   : > { %v1922_v14 = vmax.f32 %v1814_v9, 0.0 }
 0x30c   : > { %v1923_v11 = vmax.f32 %v1816_v12, 0.0 }
 0x30d   : > { %v4718_v30 = vpack.c.bf16 %v1922_v14, %v1920_v13 }
 0x30e   : > { %v4720_v19 = vpack.c.bf16 %v1923_v11, %v1921_v16  ;;  %v1819_v22 = vpop.f32.mrb[36].mxu1 }
 0x30f   : > { %v1820_v23 = vadd.f32 %v1819_v22, %v1468_v18  ;;  %v1821_v26 = vpop.f32.mrb[37].mxu1  ;;  %v1498_v22 = vpop.permute.xlu0 %1497 }
 0x310   : > { %v1822_v34 = vadd.f32 %v1821_v26, %v1468_v18  ;;  %v1823_v35 = vpop.f32.mrb[38].mxu1  ;;  %2192 = vmatprep.subr.bf16.mxu0 %v4720_v19  ;;  %3259 = vmatprep.subr.bf16.mxu1 %v4720_v19 }
 0x311   : > { %v1824_v36 = vadd.f32 %v1823_v35, %v1473_v29  ;;  %v1825_v17 = vpop.f32.mrb[39].mxu1  ;;  %2193 = vmatpush1.bf16.msra.mxu0 %v4718_v30  ;;  %3275 = vmatpush1.bf16.msra.mxu1 %v4718_v30  ;;  %v1924_v38 = vmax.f32 %v1820_v23, 0.0  ;;  %v1503_v35 = vpop.permute.xlu1 %1502 }
 0x312   : > { %v1826_v37 = vadd.f32 %v1825_v17, %v1473_v29  ;;  %v1925_v15 = vmax.f32 %v1822_v34, 0.0 }
 0x313   : > { %v1926_v39 = vmax.f32 %v1824_v36, 0.0 }
 0x314   : > { %v1927_v40 = vmax.f32 %v1826_v37, 0.0 }
 0x315   : > { %v4726_v42 = vpack.c.bf16 %v1926_v39, %v1924_v38 }
 0x316   : > { %v4728_v45 = vpack.c.bf16 %v1927_v40, %v1925_v15  ;;  %v1829_v46 = vpop.f32.mrb[40].mxu1 }
 0x317   : > { %v1830_v48 = vadd.f32 %v1829_v46, %v1478_v44  ;;  %v1831_v49 = vpop.f32.mrb[41].mxu1 }
 0x318   : > { %v1832_v50 = vadd.f32 %v1831_v49, %v1478_v44  ;;  %v1833_v20 = vpop.f32.mrb[42].mxu1  ;;  %2194 = vmatprep.subr.bf16.mxu0 %v4728_v45  ;;  %3260 = vmatprep.subr.bf16.mxu1 %v4728_v45  ;;  %v1508_v49 = vpop.permute.xlu0 %1507 }
 0x319   : > { %v1834_v51 = vadd.f32 %v1833_v20, %v1483_v32  ;;  %v1835_v52 = vpop.f32.mrb[43].mxu1  ;;  %2195 = vmatpush1.bf16.msra.mxu0 %v4726_v42  ;;  %3276 = vmatpush1.bf16.msra.mxu1 %v4726_v42  ;;  %v1928_v55 = vmax.f32 %v1830_v48, 0.0 }
 0x31a   : > { %v1836_v53 = vadd.f32 %v1835_v52, %v1483_v32  ;;  %v1929_v58 = vmax.f32 %v1832_v50, 0.0  ;;  %v1513_v52 = vpop.permute.xlu1 %1512 }
 0x31b   : > { %v1930_v57 = vmax.f32 %v1834_v51, 0.0 }
 0x31c   : > { %v1931_v59 = vmax.f32 %v1836_v53, 0.0 }
 0x31d   : > { %v4734_v27 = vpack.c.bf16 %v1930_v57, %v1928_v55 }
 0x31e   : > { %v4736_v62 = vpack.c.bf16 %v1931_v59, %v1929_v58  ;;  %v1839_v63 = vpop.f32.mrb[44].mxu1 }
 0x31f   : > { %v1840_v0 = vadd.f32 %v1839_v63, %v1488_v60  ;;  %v1841_v1 = vpop.f32.mrb[45].mxu1 }
 0x320   : > { %v1842_v3 = vadd.f32 %v1841_v1, %v1488_v60  ;;  %v1843_v7 = vpop.f32.mrb[46].mxu1  ;;  %2196 = vmatprep.subr.bf16.mxu0 %v4736_v62  ;;  %3261 = vmatprep.subr.bf16.mxu1 %v4736_v62 }
 0x321   : > { %v1844_v9 = vadd.f32 %v1843_v7, %v1493_v2  ;;  %v1845_v31 = vpop.f32.mrb[47].mxu1  ;;  %2197 = vmatpush1.bf16.msra.mxu0 %v4734_v27  ;;  %3277 = vmatpush1.bf16.msra.mxu1 %v4734_v27  ;;  %v1932_v13 = vmax.f32 %v1840_v0, 0.0 }
 0x322   : > { %v1846_v12 = vadd.f32 %v1845_v31, %v1493_v2  ;;  %v1933_v16 = vmax.f32 %v1842_v3, 0.0  ;;  %v1518_v3 = vpop.permute.xlu0 %1517 }
 0x323   : > { %v1934_v14 = vmax.f32 %v1844_v9, 0.0 }
 0x324   : > { %v1935_v11 = vmax.f32 %v1846_v12, 0.0 }
 0x325   : > { %v4742_v18 = vpack.c.bf16 %v1934_v14, %v1932_v13  ;;  %v1523_v13 = vpop.permute.xlu1 %1522 }
 0x326   : > { %v4744_v23 = vpack.c.bf16 %v1935_v11, %v1933_v16  ;;  %v1849_v26 = vpop.f32.mrb[48].mxu1 }
 0x327   : > { %v1850_v29 = vadd.f32 %v1849_v26, %v1498_v22  ;;  %v1851_v34 = vpop.f32.mrb[49].mxu1 }
 0x328   : > { %v1852_v36 = vadd.f32 %v1851_v34, %v1498_v22  ;;  %v1853_v17 = vpop.f32.mrb[50].mxu1  ;;  %2198 = vmatprep.subr.bf16.mxu0 %v4744_v23  ;;  %3262 = vmatprep.subr.bf16.mxu1 %v4744_v23 }
 0x329   : > { %v1854_v37 = vadd.f32 %v1853_v17, %v1503_v35  ;;  %v1855_v38 = vpop.f32.mrb[51].mxu1  ;;  %2199 = vmatpush1.bf16.msra.mxu0 %v4742_v18  ;;  %3278 = vmatpush1.bf16.msra.mxu1 %v4742_v18  ;;  %v1936_v15 = vmax.f32 %v1850_v29, 0.0 }
 0x32a   : > { %v1856_v39 = vadd.f32 %v1855_v38, %v1503_v35  ;;  %v1937_v44 = vmax.f32 %v1852_v36, 0.0 }
 0x32b   : > { %v1938_v40 = vmax.f32 %v1854_v37, 0.0  ;;  %v1528_v37 = vpop.permute.xlu0 %1527 }
 0x32c   : > { %v1939_v46 = vmax.f32 %v1856_v39, 0.0 }
 0x32d   : > { %v4750_v48 = vpack.c.bf16 %v1938_v40, %v1936_v15 }
 0x32e   : > { %v4752_v32 = vpack.c.bf16 %v1939_v46, %v1937_v44  ;;  %v1859_v50 = vpop.f32.mrb[52].mxu1  ;;  %v1533_v44 = vpop.permute.xlu1 %1532 }
 0x32f   : > { %v1860_v20 = vadd.f32 %v1859_v50, %v1508_v49  ;;  %v1861_v51 = vpop.f32.mrb[53].mxu1 }
 0x330   : > { %v1862_v53 = vadd.f32 %v1861_v51, %v1508_v49  ;;  %v1863_v55 = vpop.f32.mrb[54].mxu1  ;;  %2200 = vmatprep.subr.bf16.mxu0 %v4752_v32  ;;  %3263 = vmatprep.subr.bf16.mxu1 %v4752_v32 }
 0x331   : > { %v1864_v57 = vadd.f32 %v1863_v55, %v1513_v52  ;;  %v1865_v58 = vpop.f32.mrb[55].mxu1  ;;  %2201 = vmatpush1.bf16.msra.mxu0 %v4750_v48  ;;  %3279 = vmatpush1.bf16.msra.mxu1 %v4750_v48  ;;  %v1940_v60 = vmax.f32 %v1860_v20, 0.0 }
 0x332   : > { %v1866_v59 = vadd.f32 %v1865_v58, %v1513_v52  ;;  %v1941_v0 = vmax.f32 %v1862_v53, 0.0 }
 0x333   : > { %v1942_v63 = vmax.f32 %v1864_v57, 0.0 }
 0x334   : > { %v1943_v1 = vmax.f32 %v1866_v59, 0.0 }
 0x335   : > { %v4758_v2 = vpack.c.bf16 %v1942_v63, %v1940_v60  ;;  %v3421_v60 = vld [vmem:[#allocation3] ss:$8 sps:$4 sm:$0xff]  }
 0x336   : > { %v4760_v7 = vpack.c.bf16 %v1943_v1, %v1941_v0  ;;  %v1869_v9 = vpop.f32.mrb[56].mxu1  ;;  %v3424_v63 = vld [vmem:[#allocation6 + $0x20] ss:$8 sps:$4 sm:$0xff]   ;;  %v3427_v0 = vld [vmem:[#allocation3 + $0x14] ss:$8 sps:$4 sm:$0xff]  }
 0x337   : > { %v1870_v31 = vadd.f32 %v1869_v9, %v1518_v3  ;;  %v1871_v12 = vpop.f32.mrb[57].mxu1  ;;  %v3429_v1 = vld [vmem:[#allocation6 + $0x34] ss:$8 sps:$4 sm:$0xff]   ;;  %v3432_v9 = vld [vmem:[#allocation6 + $0x30] ss:$8 sps:$4 sm:$0xff]  }
 0x338   : > { %v1872_v14 = vadd.f32 %v1871_v12, %v1518_v3  ;;  %v1873_v16 = vpop.f32.mrb[58].mxu1  ;;  %2202 = vmatprep.subr.bf16.mxu0 %v4760_v7  ;;  %3264 = vmatprep.subr.bf16.mxu1 %v4760_v7  ;;  %v3431_v3 = vld [vmem:[#allocation3 + $0x10] ss:$8 sps:$4 sm:$0xff]   ;;  %v3435_v12 = vld [vmem:[#allocation6 + $0x44] ss:$8 sps:$4 sm:$0xff]  }
 0x339   : > { %v1874_v11 = vadd.f32 %v1873_v16, %v1523_v13  ;;  %v1875_v22 = vpop.f32.mrb[59].mxu1  ;;  %2203 = vmatpush1.bf16.msra.mxu0 %v4758_v2  ;;  %3280 = vmatpush1.bf16.msra.mxu1 %v4758_v2  ;;  %v1944_v29 = vmax.f32 %v1870_v31, 0.0  ;;  %v3433_v31 = vld [vmem:[#allocation3 + $0x24] ss:$8 sps:$4 sm:$0xff]  }
 0x33a   : > { %v1876_v26 = vadd.f32 %v1875_v22, %v1523_v13  ;;  %v1945_v35 = vmax.f32 %v1872_v14, 0.0 }
 0x33b   : > { %v1946_v34 = vmax.f32 %v1874_v11, 0.0 }
 0x33c   : > { %v1947_v36 = vmax.f32 %v1876_v26, 0.0 }
 0x33d   : > { %v4766_v17 = vpack.c.bf16 %v1946_v34, %v1944_v29 }
 0x33e   : > { %v4768_v38 = vpack.c.bf16 %v1947_v36, %v1945_v35  ;;  %v1879_v39 = vpop.f32.mrb[60].mxu1 }
 0x33f   : > { %v1880_v15 = vadd.f32 %v1879_v39, %v1528_v37  ;;  %v1881_v40 = vpop.f32.mrb[61].mxu1 }
 0x340   : > { %v1882_v46 = vadd.f32 %v1881_v40, %v1528_v37  ;;  %v1883_v49 = vpop.f32.mrb[62].mxu1  ;;  %2204 = vmatprep.subr.bf16.mxu0 %v4768_v38  ;;  %3265 = vmatprep.subr.bf16.mxu1 %v4768_v38 }
 0x341   : > { %v1884_v50 = vadd.f32 %v1883_v49, %v1533_v44  ;;  %v1885_v20 = vpop.f32.mrb[63].mxu1  ;;  %2205 = vmatpush1.bf16.msra.mxu0 %v4766_v17  ;;  %3281 = vmatpush1.bf16.msra.mxu1 %v4766_v17  ;;  %v1948_v52 = vmax.f32 %v1880_v15, 0.0 }
 0x342   : > { %v1886_v51 = vadd.f32 %v1885_v20, %v1533_v44  ;;  %v1949_v55 = vmax.f32 %v1882_v46, 0.0 }
 0x343   : > { %v1950_v53 = vmax.f32 %v1884_v50, 0.0 }
 0x344   : > { %v1951_v57 = vmax.f32 %v1886_v51, 0.0 }
 0x345   : > { %v4774_v58 = vpack.c.bf16 %v1950_v53, %v1948_v52 }
 0x346   : > { %v4776_v59 = vpack.c.bf16 %v1951_v57, %v1949_v55 }
 0x348   : > { %2206 = vmatprep.subr.bf16.mxu0 %v4776_v59  ;;  %3266 = vmatprep.subr.bf16.mxu1 %v4776_v59 }
 0x349   : > { %2207 = vmatpush1.bf16.msra.mxu0 %v4774_v58  ;;  %3282 = vmatpush1.bf16.msra.mxu1 %v4774_v58 }
 0x34a   : > { %2513 = vmatprep.subr.bf16.mxu0 %v4656_v6  ;;  %v3438_v6 = vld [vmem:[#allocation6 + $0x40] ss:$8 sps:$4 sm:$0xff]  }
 0x34c   : > { %2209 = vmatmul.mubr.bf16.vlgmr.msra.gmra.mrb[64].mxu0 %v3421_v60  ;;  %2566 = vmatmul.mubr.bf16.vlgmr.msra.gmra.mrb[64].mxu1 %v3424_v63 }
 0x34d   : > { %2514 = vmatpush1.bf16.msra.mxu0 %v4654_v4  ;;  %2218 = vmatprep.mubr.bf16.mxu0 %v3427_v0  ;;  %v3437_v4 = vld [vmem:[#allocation3 + $0x20] ss:$8 sps:$4 sm:$0xff]  }
 0x34e   : > { %2515 = vmatprep.subr.bf16.mxu0 %v4664_v24  ;;  %2575 = vmatprep.mubr.bf16.mxu1 %v3429_v1  ;;  %v3439_v24 = vld [vmem:[#allocation3 + $0x34] ss:$8 sps:$4 sm:$0xff]  }
 0x351   : > { %2516 = vmatpush1.bf16.msra.mxu0 %v4662_v10  ;;  %v3441_v10 = vld [vmem:[#allocation6 + $0x54] ss:$8 sps:$4 sm:$0xff]  }
 0x352   : > { %2517 = vmatprep.subr.bf16.mxu0 %v4672_v43  ;;  %v3444_v43 = vld [vmem:[#allocation6 + $0x50] ss:$8 sps:$4 sm:$0xff]  }
 0x354   : > { %2219 = vmatmul.mubr.bf16.gmra.mrb[68].mxu0 %v3431_v3  ;;  %2576 = vmatmul.mubr.bf16.gmra.mrb[68].mxu1 %v3432_v9 }
 0x355   : > { %2518 = vmatpush1.bf16.msra.mxu0 %v4670_v41  ;;  %2228 = vmatprep.mubr.bf16.mxu0 %v3433_v31  ;;  %v3443_v41 = vld [vmem:[#allocation3 + $0x30] ss:$8 sps:$4 sm:$0xff]  }
 0x356   : > { %2519 = vmatprep.subr.bf16.mxu0 %v4680_v56  ;;  %2585 = vmatprep.mubr.bf16.mxu1 %v3435_v12  ;;  %v3445_v56 = vld [vmem:[#allocation3 + $0x44] ss:$8 sps:$4 sm:$0xff]  }
 0x359   : > { %2520 = vmatpush1.bf16.msra.mxu0 %v4678_v54  ;;  %v3447_v54 = vld [vmem:[#allocation6 + $0x64] ss:$8 sps:$4 sm:$0xff]  }
 0x35a   : > { %2521 = vmatprep.subr.bf16.mxu0 %v4688_v8  ;;  %v3450_v8 = vld [vmem:[#allocation6 + $0x60] ss:$8 sps:$4 sm:$0xff]  }
 0x35c   : > { %2229 = vmatmul.mubr.bf16.gmra.mrb[72].mxu0 %v3437_v4  ;;  %2586 = vmatmul.mubr.bf16.gmra.mrb[72].mxu1 %v3438_v6 }
 0x35d   : > { %2522 = vmatpush1.bf16.msra.mxu0 %v4686_v5  ;;  %2238 = vmatprep.mubr.bf16.mxu0 %v3439_v24  ;;  %v3449_v5 = vld [vmem:[#allocation3 + $0x40] ss:$8 sps:$4 sm:$0xff]  }
 0x35e   : > { %2523 = vmatprep.subr.bf16.mxu0 %v4696_v33  ;;  %2595 = vmatprep.mubr.bf16.mxu1 %v3441_v10  ;;  %v3451_v33 = vld [vmem:[#allocation3 + $0x54] ss:$8 sps:$4 sm:$0xff]  }
 0x361   : > { %2524 = vmatpush1.bf16.msra.mxu0 %v4694_v28  ;;  %v3453_v28 = vld [vmem:[#allocation6 + $0x74] ss:$8 sps:$4 sm:$0xff]  }
 0x362   : > { %2525 = vmatprep.subr.bf16.mxu0 %v4704_v21  ;;  %v3456_v21 = vld [vmem:[#allocation6 + $0x70] ss:$8 sps:$4 sm:$0xff]  }
 0x364   : > { %2239 = vmatmul.mubr.bf16.gmra.mrb[76].mxu0 %v3443_v41  ;;  %2596 = vmatmul.mubr.bf16.gmra.mrb[76].mxu1 %v3444_v43 }
 0x365   : > { %2526 = vmatpush1.bf16.msra.mxu0 %v4702_v47  ;;  %2248 = vmatprep.mubr.bf16.mxu0 %v3445_v56  ;;  %v3455_v47 = vld [vmem:[#allocation3 + $0x50] ss:$8 sps:$4 sm:$0xff]  }
 0x366   : > { %2527 = vmatprep.subr.bf16.mxu0 %v4712_v25  ;;  %2605 = vmatprep.mubr.bf16.mxu1 %v3447_v54  ;;  %v3457_v25 = vld [vmem:[#allocation3 + $0x64] ss:$8 sps:$4 sm:$0xff]  }
 0x369   : > { %2528 = vmatpush1.bf16.msra.mxu0 %v4710_v61  ;;  %v3459_v61 = vld [vmem:[#allocation3 + $0x60] ss:$8 sps:$4 sm:$0xff]  }
 0x36a   : > { %2529 = vmatprep.subr.bf16.mxu0 %v4720_v19  ;;  %v3462_v19 = vld [vmem:[#allocation3 + $0x70] ss:$8 sps:$4 sm:$0xff]  }
 0x36c   : > { %2249 = vmatmul.mubr.bf16.gmra.mrb[80].mxu0 %v3449_v5  ;;  %2606 = vmatmul.mubr.bf16.gmra.mrb[80].mxu1 %v3450_v8 }
 0x36d   : > { %2530 = vmatpush1.bf16.msra.mxu0 %v4718_v30  ;;  %2258 = vmatprep.mubr.bf16.mxu0 %v3451_v33  ;;  %v3460_v30 = vld [vmem:[#allocation3 + $0x74] ss:$8 sps:$4 sm:$0xff]  }
 0x36e   : > { %2531 = vmatprep.subr.bf16.mxu0 %v4728_v45  ;;  %2615 = vmatprep.mubr.bf16.mxu1 %v3453_v28  ;;  %v3463_v45 = vld [vmem:[#allocation6] ss:$8 sps:$4 sm:$0xff]  }
 0x371   : > { %2532 = vmatpush1.bf16.msra.mxu0 %v4726_v42  ;;  %v3465_v42 = vld [vmem:[#allocation6 + $0x4] ss:$8 sps:$4 sm:$0xff]  }
 0x372   : > { %2533 = vmatprep.subr.bf16.mxu0 %v4736_v62  ;;  %v3468_v62 = vld [vmem:[#allocation6 + $0x10] ss:$8 sps:$4 sm:$0xff]  }
 0x374   : > { %2259 = vmatmul.mubr.bf16.gmra.mrb[84].mxu0 %v3455_v47  ;;  %2616 = vmatmul.mubr.bf16.gmra.mrb[84].mxu1 %v3456_v21 }
 0x375   : > { %2534 = vmatpush1.bf16.msra.mxu0 %v4734_v27  ;;  %2268 = vmatprep.mubr.bf16.mxu0 %v3457_v25  ;;  %v3466_v27 = vld [vmem:[#allocation6 + $0x14] ss:$8 sps:$4 sm:$0xff]  }
 0x376   : > { %2535 = vmatprep.subr.bf16.mxu0 %v4744_v23  ;;  %v4816_v23 = vpop.permute.xlu1 %613 }
 0x377   : > { %5431 = vst [vmem:[#allocation21_spill] sm:$0xff] %v4816_v23 }
 0x379   : > { %2536 = vmatpush1.bf16.msra.mxu0 %v4742_v18  ;;  %v4814_v18 = vpop.permute.xlu0 %608 }
 0x37a   : > { %2537 = vmatprep.subr.bf16.mxu0 %v4752_v32  ;;  %5430 = vst [vmem:[#allocation20_spill] sm:$0xff] %v4814_v18  ;;  %v4820_v32 = vpop.permute.xlu1 %623 }
 0x37b   : > { %5433 = vst [vmem:[#allocation23_spill] sm:$0xff] %v4820_v32 }
 0x37c   : > { %2269 = vmatmul.mubr.bf16.gmra.mrb[88].mxu0 %v3459_v61 }
 0x37d   : > { %2538 = vmatpush1.bf16.msra.mxu0 %v4750_v48  ;;  %2278 = vmatprep.mubr.bf16.mxu0 %v3460_v30  ;;  %v4818_v48 = vpop.permute.xlu0 %618 }
 0x37e   : > { %2539 = vmatprep.subr.bf16.mxu0 %v4760_v7  ;;  %5432 = vst [vmem:[#allocation22_spill] sm:$0xff] %v4818_v48  ;;  %v4824_v7 = vpop.permute.xlu1 %633 }
 0x381   : > { %2540 = vmatpush1.bf16.msra.mxu0 %v4758_v2  ;;  %v4822_v2 = vpop.permute.xlu0 %628 }
 0x382   : > { %2541 = vmatprep.subr.bf16.mxu0 %v4768_v38  ;;  %v4828_v14 = vpop.permute.xlu1 %643 }
 0x384   : > { %2279 = vmatmul.mubr.bf16.gmra.mrb[92].mxu0 %v3462_v19  ;;  %v3794_v19 = vmov 1966171168  }
 0x385   : > { %2542 = vmatpush1.bf16.msra.mxu0 %v4766_v17  ;;  %2545 = vmatprep.mubr.bf16.mxu0 %v3465_v42  ;;  %v4826_v13 = vpop.permute.xlu0 %638  ;;  %v2961_v42 = vunpack.c.l.s4 %v3794_v19 }
 0x386   : > { %2543 = vmatprep.subr.bf16.mxu0 %v4776_v59  ;;  %v4832_v11 = vpop.permute.xlu1 %653 }
 0x389   : > { %2544 = vmatpush1.bf16.msra.mxu0 %v4774_v58  ;;  %v4830_v16 = vpop.permute.xlu0 %648 }
 0x38a   : > { %v4836_v26 = vpop.permute.xlu1 %663 }
 0x38c   : > { %2546 = vmatmul.mubr.bf16.vlgmr.msra.gmra.mrb[96].mxu0 %v3463_v45  ;;  %v5385_v45 = vlaneseq }
 0x38d   : > { %2555 = vmatprep.mubr.bf16.mxu0 %v3466_v27  ;;  %v4834_v22 = vpop.permute.xlu0 %658 }
 0x38e   : > { %v4840_v34 = vpop.permute.xlu1 %673 }
 0x38f   : > { %5434 = vst [vmem:[#allocation24_spill] sm:$0xff] %v4840_v34 }
 0x391   : > { %v4838_v29 = vpop.permute.xlu0 %668 }
 0x392   : > { %v4844_v36 = vpop.permute.xlu1 %683 }
 0x393   : > { %5436 = vst [vmem:[#allocation26_spill] sm:$0xff] %v4844_v36 }
 0x394   : > { %2556 = vmatmul.mubr.bf16.gmra.mrb[100].mxu0 %v3468_v62 }
 0x395   : > { %v4842_v35 = vpop.permute.xlu0 %678 }
 0x396   : > { %5435 = vst [vmem:[#allocation25_spill] sm:$0xff] %v4842_v35  ;;  %v2024_v37 = vpop.permute.xlu1 %2023 }
 0x399   : > { %v2019_v17 = vpop.permute.xlu0 %2018 }
 0x39a   : > { %v2034_v39 = vpop.permute.xlu1 %2033 }
 0x39d   : > { %v2029_v38 = vpop.permute.xlu0 %2028 }
 0x39e   : > { %v4848_v40 = vpop.permute.xlu1 %2043 }
 0x3a1   : > { %v4846_v15 = vpop.permute.xlu0 %2038 }
 0x3a2   : > { %v4852_v46 = vpop.permute.xlu1 %2053 }
 0x3a5   : > { %v4850_v44 = vpop.permute.xlu0 %2048 }
 0x3a6   : > { %v4856_v50 = vpop.permute.xlu1 %2063 }
 0x3a9   : > { %v4854_v49 = vpop.permute.xlu0 %2058 }
 0x3aa   : > { %v4860_v51 = vpop.permute.xlu1 %2073 }
 0x3ad   : > { %v4858_v20 = vpop.permute.xlu0 %2068 }
 0x3ae   : > { %v4864_v53 = vpop.permute.xlu1 %2083 }
 0x3b1   : > { %v4862_v52 = vpop.permute.xlu0 %2078 }
 0x3b2   : > { %v4868_v57 = vpop.permute.xlu1 %2093 }
 0x3b5   : > { %v4866_v55 = vpop.permute.xlu0 %2088 }
 0x3b6   : > { %v4872_v59 = vpop.permute.xlu1 %2360 }
 0x3b9   : > { %v4870_v58 = vpop.permute.xlu0 %2355 }
 0x3ba   : > { %v4876_v63 = vpop.permute.xlu1 %2370 }
 0x3bb   : > { %5438 = vst [vmem:[#allocation28_spill] sm:$0xff] %v4876_v63 }
 0x3bd   : > { %v4874_v60 = vpop.permute.xlu0 %2365 }
 0x3be   : > { %5437 = vst [vmem:[#allocation27_spill] sm:$0xff] %v4874_v60  ;;  %v2381_v54 = vpop.permute.xlu1 %2380 }
 0x3c1   : > { %v4878_v0 = vpop.permute.xlu0 %2375 }
 0x3c5   : > { %v2386_v5 = vpop.permute.xlu0 %2385 }
 0x41f   : > { %v2210_v1 = vpop.f32.mrb[64].mxu0  ;;  %v4880_v3 = vpop.f32.mrb[64].mxu1 }
 0x420   : > { %v2211_v9 = vadd.f32 %v2210_v1, %v2019_v17  ;;  %v2212_v31 = vpop.f32.mrb[65].mxu0  ;;  %v4882_v12 = vpop.f32.mrb[65].mxu1 }
 0x421   : > { %v2213_v4 = vadd.f32 %v2212_v31, %v2019_v17  ;;  %v2214_v6 = vpop.f32.mrb[66].mxu0  ;;  %v4884_v24 = vpop.f32.mrb[66].mxu1 }
 0x422   : > { %3469 = vtanh.f32 %v2211_v9  ;;  %v2215_v10 = vadd.f32 %v2214_v6, %v2024_v37  ;;  %v2216_v41 = vpop.f32.mrb[67].mxu0  ;;  %v4886_v43 = vpop.f32.mrb[67].mxu1  ;;  %v2964_v6 = vshrl.u32 %v5385_v45, 7 }
 0x423   : > { %3471 = vtanh.f32 %v2213_v4  ;;  %v2217_v56 = vadd.f32 %v2216_v41, %v2024_v37  ;;  %v2962_v4 = vunpack.c.0.s8 %v2961_v42  ;;  %v4889_v41 = vpop.permute.xlu0 %2395 }
 0x424   : > { %3473 = vtanh.f32 %v2215_v10  ;;  %v2391_v10 = vpop.permute.xlu1 %2390 }
 0x425   : > { %3475 = vtanh.f32 %v2217_v56 }
 0x427   : > { %v2220_v8 = vpop.f32.mrb[68].mxu0  ;;  %v2577_v33 = vpop.f32.mrb[68].mxu1 }
 0x428   : > { %v2221_v28 = vadd.f32 %v2220_v8, %v2029_v38  ;;  %v2222_v47 = vpop.f32.mrb[69].mxu0  ;;  %v2579_v21 = vpop.f32.mrb[69].mxu1 }
 0x429   : > { %v2223_v25 = vadd.f32 %v2222_v47, %v2029_v38  ;;  %v2224_v61 = vpop.f32.mrb[70].mxu0  ;;  %v2581_v30 = vpop.f32.mrb[70].mxu1 }
 0x42a   : > { %3477 = vtanh.f32 %v2221_v28  ;;  %v2225_v27 = vadd.f32 %v2224_v61, %v2034_v39  ;;  %v2226_v62 = vpop.f32.mrb[71].mxu0  ;;  %v2583_v17 = vpop.f32.mrb[71].mxu1 }
 0x42b   : > { %3479 = vtanh.f32 %v2223_v25  ;;  %v2227_v37 = vadd.f32 %v2226_v62, %v2034_v39 }
 0x42c   : > { %v3470_v1 = vpop.eup %3469  ;;  %3481 = vtanh.f32 %v2225_v27 }
 0x42d   : > { %v3472_v9 = vpop.eup %3471  ;;  %v2626_v31 = vmul.f32 1.442695, %v3470_v1  ;;  %3483 = vtanh.f32 %v2227_v37  ;;  %v2883_v56 = vmul.f32 %v3470_v1, %v4814_v18 }
 0x42e   : > { %v3474_v38 = vpop.eup %3473  ;;  %v2628_v8 = vmul.f32 1.442695, %v3472_v9  ;;  %v2884_v47 = vmul.f32 %v3472_v9, %v4814_v18  ;;  %v4897_v9 = vsub.s32 %v2962_v4, %v2964_v6 }
 0x42f   : > { %v3476_v28 = vpop.eup %3475  ;;  %3485 = vpow2.f32 %v2626_v31  ;;  %v2630_v39 = vmul.f32 1.442695, %v3474_v38  ;;  %v2885_v25 = vmul.f32 %v3474_v38, %v4816_v23  ;;  %v2230_v61 = vpop.f32.mrb[72].mxu0  ;;  %v4901_v38 = vadd.f32 %v4880_v3, %v4878_v0 }
 0x430   : > { %v2587_v19 = vpop.f32.mrb[72].mxu1  ;;  %3487 = vpow2.f32 %v2628_v8  ;;  %v2632_v42 = vmul.f32 1.442695, %v3476_v28  ;;  %v2886_v27 = vmul.f32 %v3476_v28, %v4816_v23  ;;  %v2231_v62 = vadd.f32 %v2230_v61, %v4846_v15  ;;  %v2232_v37 = vpop.f32.mrb[73].mxu0  ;;  %5439 = vst [vmem:[#allocation29_spill] sm:$0xff] %v4897_v9 }
 0x431   : > { %v2589_v45 = vpop.f32.mrb[73].mxu1  ;;  %3489 = vpow2.f32 %v2630_v39  ;;  %v2915_v1 = vadd.f32 %v2885_v25, %v2883_v56  ;;  %v2233_v63 = vadd.f32 %v2232_v37, %v4846_v15  ;;  %v2234_v31 = vpop.f32.mrb[74].mxu0  ;;  %v4906_v39 = vadd.f32 %v4882_v12, %v4878_v0 }
 0x432   : > { %v2591_v60 = vpop.f32.mrb[74].mxu1  ;;  %3491 = vpow2.f32 %v2632_v42  ;;  %v2936_v8 = vadd.f32 %v2886_v27, %v2884_v47  ;;  %v2235_v28 = vadd.f32 %v2234_v31, %v4848_v40  ;;  %v2236_v23 = vpop.f32.mrb[75].mxu0  ;;  %v4909_v15 = vadd.f32 %v4884_v24, %v2381_v54 }
 0x433   : > { %v2593_v61 = vpop.f32.mrb[75].mxu1  ;;  %3493 = vtanh.f32 %v2231_v62  ;;  %v2237_v4 = vadd.f32 %v2236_v23, %v4848_v40  ;;  %v4913_v3 = vadd.f32 %v4886_v43, %v2381_v54  ;;  %v4915_v56 = vadd.f32 %v2577_v33, %v2386_v5  ;;  %v2401_v27 = vpop.permute.xlu1 %2400 }
 0x434   : > { %v3478_v6 = vpop.eup %3477  ;;  %v4917_v47 = vadd.f32 %v2579_v21, %v2386_v5  ;;  %3495 = vtanh.f32 %v2233_v63  ;;  %v4920_v12 = vadd.f32 %v2581_v30, %v2391_v10  ;;  %v2406_v62 = vpop.permute.xlu0 %2405  ;;  %v4923_v43 = vadd.f32 %v2583_v17, %v2391_v10 }
 0x435   : > { %v3480_v25 = vpop.eup %3479  ;;  %v2634_v42 = vmul.f32 1.442695, %v3478_v6  ;;  %v2887_v0 = vmul.f32 %v3478_v6, %v4818_v48  ;;  %3497 = vtanh.f32 %v2235_v28  ;;  %v4928_v10 = vadd.f32 %v2587_v19, %v4889_v41 }
 0x436   : > { %v3482_v24 = vpop.eup %3481  ;;  %v2636_v23 = vmul.f32 1.442695, %v3480_v25  ;;  %v2888_v40 = vmul.f32 %v3480_v25, %v4818_v48  ;;  %3499 = vtanh.f32 %v2237_v4 }
 0x437   : > { %v3484_v54 = vpop.eup %3483  ;;  %3501 = vpow2.f32 %v2634_v42  ;;  %v2916_v5 = vadd.f32 %v2915_v1, %v2887_v0  ;;  %v2638_v63 = vmul.f32 1.442695, %v3482_v24  ;;  %v2889_v33 = vmul.f32 %v3482_v24, %v4820_v32  ;;  %v2240_v21 = vpop.f32.mrb[76].mxu0 }
 0x438   : > { %v2597_v37 = vpop.f32.mrb[76].mxu1  ;;  %3503 = vpow2.f32 %v2636_v23  ;;  %v2937_v30 = vadd.f32 %v2936_v8, %v2888_v40  ;;  %v2640_v31 = vmul.f32 1.442695, %v3484_v54  ;;  %v2890_v28 = vmul.f32 %v3484_v54, %v4820_v32  ;;  %v2242_v6 = vpop.f32.mrb[77].mxu0 }
 0x439   : > { %v2599_v9 = vpop.f32.mrb[77].mxu1  ;;  %v3486_v18 = vpop.eup %3485  ;;  %3505 = vpow2.f32 %v2638_v63  ;;  %v2917_v17 = vadd.f32 %v2916_v5, %v2889_v33  ;;  %v2241_v1 = vadd.f32 %v2240_v21, %v4850_v44  ;;  %v4932_v8 = vadd.f32 %v2589_v45, %v4889_v41 }
 0x43a   : > { %v2244_v4 = vpop.f32.mrb[78].mxu0  ;;  %v2601_v25 = vpop.f32.mrb[78].mxu1  ;;  %3507 = vpow2.f32 %v2640_v31  ;;  %v2938_v0 = vadd.f32 %v2937_v30, %v2890_v28  ;;  %v2243_v24 = vadd.f32 %v2242_v6, %v4850_v44  ;;  %v4935_v5 = vadd.f32 %v2591_v60, %v2401_v27  ;;  %v4950_v28 = vld [vmem:[%s4066_s28] sm:$0xff] }
 0x43b   : > { %v3488_v42 = vpop.eup %3487  ;;  %v2246_v23 = vpop.f32.mrb[79].mxu0  ;;  %3509 = vtanh.f32 %v2241_v1  ;;  %v2245_v19 = vadd.f32 %v2244_v4, %v4852_v46  ;;  %v4939_v30 = vadd.f32 %v2593_v61, %v2401_v27  ;;  %v4941_v45 = vadd.f32 %v2597_v37, %v2406_v62 }
 0x43c   : > { %v2603_v40 = vpop.f32.mrb[79].mxu1  ;;  %v3490_v54 = vpop.eup %3489  ;;  %v2247_v63 = vadd.f32 %v2246_v23, %v4852_v46  ;;  %3511 = vtanh.f32 %v2243_v24  ;;  %v4943_v44 = vadd.f32 %v2599_v9, %v2406_v62  ;;  %v4953_v46 = vmul.f32 %v4950_v28, %v3486_v18  ;;  %v4957_v9 = vld [vmem:[%s4066_s28 + $0x8] sm:$0xff] }
 0x43d   : > { %v3492_v33 = vpop.eup %3491  ;;  %v2411_v21 = vpop.permute.xlu1 %2410  ;;  %3513 = vtanh.f32 %v2245_v19  ;;  %v4960_v62 = vmul.f32 %v4957_v9, %v3488_v42  ;;  %v4970_v19 = vld [vmem:[%s4066_s28 + $0x18] sm:$0xff] }
 0x43e   : > { %v3494_v41 = vpop.eup %3493  ;;  %v4945_v31 = vadd.f32 %v2601_v25, %v2411_v21  ;;  %v4947_v60 = vadd.f32 %v2603_v40, %v2411_v21  ;;  %v2416_v27 = vpop.permute.xlu0 %2415  ;;  %3515 = vtanh.f32 %v2247_v63  ;;  %v4964_v40 = vld [vmem:[%s4066_s28 + $0x10] sm:$0xff]  ;;  %5443 = vst [vmem:[#allocation33_spill] sm:$0xff] %v4970_v19  ;;  %v4973_v63 = vmul.f32 %v4970_v19, %v3492_v33 }
 0x43f   : > { %v3496_v61 = vpop.eup %3495  ;;  %v2642_v37 = vmul.f32 1.442695, %v3494_v41  ;;  %v2891_v6 = vmul.f32 %v3494_v41, %v4822_v2  ;;  %v2250_v24 = vpop.f32.mrb[80].mxu0  ;;  %5441 = vst [vmem:[#allocation31_spill] sm:$0xff] %v4964_v40  ;;  %v4967_v18 = vmul.f32 %v4964_v40, %v3490_v54 }
 0x440   : > { %5440 = vst [vmem:[#allocation30_spill] sm:$0xff] %v4947_v60  ;;  %v3498_v1 = vpop.eup %3497  ;;  %v2644_v4 = vmul.f32 1.442695, %v3496_v61  ;;  %v2892_v25 = vmul.f32 %v3496_v61, %v4822_v2  ;;  %v2607_v23 = vpop.f32.mrb[80].mxu1  ;;  %5444 = vst [vmem:[#allocation34_spill] sm:$0xff] %v4973_v63  ;;  %v2251_v19 = vadd.f32 %v2250_v24, %v4854_v49 }
 0x441   : > { %5442 = vst [vmem:[#allocation32_spill] sm:$0xff] %v4967_v18  ;;  %v3500_v21 = vpop.eup %3499  ;;  %3517 = vpow2.f32 %v2642_v37  ;;  %v2918_v42 = vadd.f32 %v2917_v17, %v2891_v6  ;;  %v2646_v41 = vmul.f32 1.442695, %v3498_v1  ;;  %v2893_v32 = vmul.f32 %v3498_v1, %v4824_v7  ;;  %v2252_v48 = vpop.f32.mrb[81].mxu0 }
 0x442   : > { %v2609_v61 = vpop.f32.mrb[81].mxu1  ;;  %v3502_v60 = vpop.eup %3501  ;;  %3519 = vpow2.f32 %v2644_v4  ;;  %v2939_v36 = vadd.f32 %v2938_v0, %v2892_v25  ;;  %v2648_v35 = vmul.f32 1.442695, %v3500_v21  ;;  %v2894_v54 = vmul.f32 %v3500_v21, %v4824_v7 }
 0x443   : > { %v2254_v40 = vpop.f32.mrb[82].mxu0  ;;  %v2611_v18 = vpop.f32.mrb[82].mxu1  ;;  %3521 = vpow2.f32 %v2646_v41  ;;  %v2919_v33 = vadd.f32 %v2918_v42, %v2893_v32  ;;  %v4978_v37 = vadd.f32 %v2607_v23, %v2416_v27  ;;  %v2253_v4 = vadd.f32 %v2252_v48, %v4854_v49  ;;  %v4996_v48 = vld [vmem:[%s4066_s28 + $0x28] sm:$0xff] }
 0x444   : > { %v3504_v34 = vpop.eup %3503  ;;  %v2256_v17 = vpop.f32.mrb[83].mxu0  ;;  %3523 = vpow2.f32 %v2648_v35  ;;  %v2940_v0 = vadd.f32 %v2939_v36, %v2894_v54  ;;  %v4981_v25 = vadd.f32 %v2609_v61, %v2416_v27  ;;  %v2255_v32 = vadd.f32 %v2254_v40, %v4856_v50  ;;  %5451 = vst [vmem:[#allocation41_spill] sm:$0xff] %v4996_v48 }
 0x445   : > { %5445 = vst [vmem:[#allocation35_spill] sm:$0xff] %v4978_v37  ;;  %v2613_v6 = vpop.f32.mrb[83].mxu1  ;;  %v3506_v1 = vpop.eup %3505  ;;  %3525 = vtanh.f32 %v2251_v19  ;;  %v2257_v23 = vadd.f32 %v2256_v17, %v4856_v50  ;;  %v4990_v37 = vld [vmem:[%s4066_s28 + $0x20] sm:$0xff]  ;;  %v4999_v36 = vmul.f32 %v4996_v48, %v3504_v34  ;;  %v5010_v34 = vld [vmem:[%s4066_s28 + $0x38] sm:$0xff] }
 0x446   : > { %v2421_v63 = vpop.permute.xlu1 %2420  ;;  %5446 = vst [vmem:[#allocation36_spill] sm:$0xff] %v4981_v25  ;;  %v3508_v21 = vpop.eup %3507  ;;  %3527 = vtanh.f32 %v2253_v4  ;;  %5449 = vst [vmem:[#allocation39_spill] sm:$0xff] %v4990_v37  ;;  %v4993_v35 = vmul.f32 %v4990_v37, %v3502_v60  ;;  %v3607_v25 = vld [vmem:[%s4066_s28 + $0x50] sm:$0xff] }
 0x447   : > { %v4984_v24 = vadd.f32 %v2611_v18, %v2421_v63  ;;  %v3510_v42 = vpop.eup %3509  ;;  %v4987_v41 = vadd.f32 %v2613_v6, %v2421_v63  ;;  %5452 = vst [vmem:[#allocation42_spill] sm:$0xff] %v4999_v36  ;;  %v2426_v27 = vpop.permute.xlu0 %2425  ;;  %3529 = vtanh.f32 %v2255_v32  ;;  %v5003_v18 = vld [vmem:[%s4066_s28 + $0x30] sm:$0xff]  ;;  %5455 = vst [vmem:[#allocation45_spill] sm:$0xff] %v5010_v34  ;;  %v5013_v6 = vmul.f32 %v5010_v34, %v3508_v21 }
 0x448   : > { %5450 = vst [vmem:[#allocation40_spill] sm:$0xff] %v4993_v35  ;;  %v3512_v49 = vpop.eup %3511  ;;  %v2650_v40 = vmul.f32 1.442695, %v3510_v42  ;;  %v2895_v50 = vmul.f32 %v3510_v42, %v4826_v13  ;;  %5453 = vst [vmem:[#allocation43_spill] sm:$0xff] %v5003_v18  ;;  %v5006_v19 = vmul.f32 %v5003_v18, %v3506_v1  ;;  %3531 = vtanh.f32 %v2257_v23  ;;  %v2260_v54 = vpop.f32.mrb[84].mxu0 }
 0x449   : > { %5447 = vst [vmem:[#allocation37_spill] sm:$0xff] %v4984_v24  ;;  %5448 = vst [vmem:[#allocation38_spill] sm:$0xff] %v4987_v41  ;;  %v3514_v63 = vpop.eup %3513  ;;  %v2652_v60 = vmul.f32 1.442695, %v3512_v49  ;;  %v2896_v61 = vmul.f32 %v3512_v49, %v4826_v13  ;;  %v2617_v17 = vpop.f32.mrb[84].mxu1 }
 0x44a   : > { %5454 = vst [vmem:[#allocation44_spill] sm:$0xff] %v5006_v19  ;;  %5456 = vst [vmem:[#allocation46_spill] sm:$0xff] %v5013_v6  ;;  %v3516_v4 = vpop.eup %3515  ;;  %3533 = vpow2.f32 %v2650_v40  ;;  %v2920_v32 = vadd.f32 %v2919_v33, %v2895_v50  ;;  %v2654_v42 = vmul.f32 1.442695, %v3514_v63  ;;  %v2897_v48 = vmul.f32 %v3514_v63, %v4828_v14  ;;  %v2262_v1 = vpop.f32.mrb[85].mxu0 }
 0x44b   : > { %v2619_v18 = vpop.f32.mrb[85].mxu1  ;;  %3535 = vpow2.f32 %v2652_v60  ;;  %v2941_v19 = vadd.f32 %v2940_v0, %v2896_v61  ;;  %v2656_v49 = vmul.f32 1.442695, %v3516_v4  ;;  %v2898_v23 = vmul.f32 %v3516_v4, %v4828_v14  ;;  %v2264_v36 = vpop.f32.mrb[86].mxu0  ;;  %v3605_v60 = vld [vmem:[%s4066_s28 + $0x40] sm:$0xff] }
 0x44c   : > { %v2621_v37 = vpop.f32.mrb[86].mxu1  ;;  %v3518_v41 = vpop.eup %3517  ;;  %3537 = vpow2.f32 %v2654_v42  ;;  %v2921_v21 = vadd.f32 %v2920_v32, %v2897_v48  ;;  %v2261_v40 = vadd.f32 %v2260_v54, %v4858_v20  ;;  %v5018_v33 = vadd.f32 %v2617_v17, %v2426_v27  ;;  %v3606_v48 = vld [vmem:[%s4066_s28 + $0x48] sm:$0xff] }
 0x44d   : > { %v2266_v50 = vpop.f32.mrb[87].mxu0  ;;  %v5020_v63 = vpop.f32.mrb[87].mxu1  ;;  %v2698_v0 = vmul.f32 %v3605_v60, %v3518_v41  ;;  %3539 = vpow2.f32 %v2656_v49  ;;  %v2942_v61 = vadd.f32 %v2941_v19, %v2898_v23  ;;  %v2263_v4 = vadd.f32 %v2262_v1, %v4858_v20  ;;  %v3608_v49 = vld [vmem:[%s4066_s28 + $0x58] sm:$0xff] }
 0x44e   : > { %5457 = vst [vmem:[#allocation47_spill] sm:$0xff] %v5018_v33  ;;  %v3520_v34 = vpop.eup %3519  ;;  %v5024_v24 = vpop.permute.xlu1 %2430  ;;  %3541 = vtanh.f32 %v2261_v40  ;;  %v5027_v54 = vadd.f32 %v2619_v18, %v2426_v27  ;;  %v2265_v17 = vadd.f32 %v2264_v36, %v4860_v51  ;;  %v5038_v27 = vadd.f32 %v2266_v50, %v4860_v51 }
 0x44f   : > { %v3522_v6 = vpop.eup %3521  ;;  %v2699_v32 = vmul.f32 %v3606_v48, %v3520_v34  ;;  %v2730_v33 = vadd.f32 %v2698_v0, %v4901_v38  ;;  %3543 = vtanh.f32 %v2263_v4  ;;  %v5033_v19 = vadd.f32 %v2621_v37, %v5024_v24  ;;  %v5042_v40 = vpop.f32.mrb[88].mxu0 }
 0x450   : > { %5458 = vst [vmem:[#allocation48_spill] sm:$0xff] %v5027_v54  ;;  %v3524_v42 = vpop.eup %3523  ;;  %v2700_v41 = vmul.f32 %v3607_v25, %v3522_v6  ;;  %3545 = vtanh.f32 %v2265_v17  ;;  %v5046_v17 = vpop.f32.mrb[89].mxu0 }
 0x451   : > { %5459 = vst [vmem:[#allocation49_spill] sm:$0xff] %v5033_v19  ;;  %v3526_v20 = vpop.eup %3525  ;;  %v2731_v1 = vadd.f32 %v2699_v32, %v4906_v39  ;;  %v2701_v23 = vmul.f32 %v3608_v49, %v3524_v42  ;;  %v2762_v36 = vsub.f32 %v2730_v33, %v3605_v60  ;;  %v5049_v42 = vpop.f32.mrb[90].mxu0 }
 0x452   : > { %v3528_v18 = vpop.eup %3527  ;;  %v2732_v34 = vadd.f32 %v2700_v41, %v4909_v15  ;;  %v2658_v38 = vmul.f32 1.442695, %v3526_v20  ;;  %v2899_v6 = vmul.f32 %v3526_v20, %v4830_v16 }
 0x453   : > { %v3530_v37 = vpop.eup %3529  ;;  %v2763_v0 = vsub.f32 %v2731_v1, %v3606_v48  ;;  %v2733_v4 = vadd.f32 %v2701_v23, %v4913_v3  ;;  %v2660_v39 = vmul.f32 1.442695, %v3528_v18  ;;  %v2900_v32 = vmul.f32 %v3528_v18, %v4830_v16  ;;  %v5052_v23 = vpop.f32.mrb[91].mxu0 }
 0x454   : > { %v3532_v51 = vpop.eup %3531  ;;  %v2794_v33 = vmul.f32 %v2762_v36, %v4822_v2  ;;  %v2764_v50 = vsub.f32 %v2732_v34, %v3607_v25  ;;  %3547 = vpow2.f32 %v2658_v38  ;;  %v2922_v15 = vadd.f32 %v2921_v21, %v2899_v6  ;;  %v3609_v34 = vld [vmem:[%s4066_s28 + $0x60] sm:$0xff] }
 0x455   : > { %v3534_v41 = vpop.eup %3533  ;;  %v2795_v20 = vmul.f32 %v2763_v0, %v4822_v2  ;;  %v2765_v1 = vsub.f32 %v2733_v4, %v3608_v49  ;;  %3549 = vpow2.f32 %v2660_v39  ;;  %v2943_v3 = vadd.f32 %v2942_v61, %v2900_v32  ;;  %v3610_v2 = vld [vmem:[%s4066_s28 + $0x68] sm:$0xff]  ;;  %v3611_v32 = vld [vmem:[%s4066_s28 + $0x70] sm:$0xff] }
 0x456   : > { %v3536_v18 = vpop.eup %3535  ;;  %v2826_v19 = vadd.f32 %v3605_v60, %v2794_v33  ;;  %v2796_v36 = vmul.f32 %v2764_v50, %v4824_v7  ;;  %v2702_v38 = vmul.f32 %v3609_v34, %v3534_v41  ;;  %v2662_v21 = vmul.f32 1.442695, %v3530_v37  ;;  %v3612_v50 = vld [vmem:[%s4066_s28 + $0x78] sm:$0xff] }
 0x457   : > { %v3538_v6 = vpop.eup %3537  ;;  %v2827_v54 = vadd.f32 %v3606_v48, %v2795_v20  ;;  %v2797_v35 = vmul.f32 %v2765_v1, %v4824_v7  ;;  %v2703_v0 = vmul.f32 %v3610_v2, %v3536_v18  ;;  %v2901_v4 = vmul.f32 %v3530_v37, %v4832_v11 }
 0x458   : > { %v3540_v61 = vpop.eup %3539  ;;  %2858 = vst [vmem:[%s5061_s30 + $0x40] sm:$0xff] %v2826_v19  ;;  %v2828_v60 = vadd.f32 %v3607_v25, %v2796_v36  ;;  %v2734_v39 = vadd.f32 %v2702_v38, %v4915_v56  ;;  %v2704_v48 = vmul.f32 %v3611_v32, %v3538_v6  ;;  %3551 = vpow2.f32 %v2662_v21  ;;  %v2280_v36 = vpop.f32.mrb[92].mxu0 }
 0x459   : > { %v3542_v7 = vpop.eup %3541  ;;  %2859 = vst [vmem:[%s5061_s30 + $0x48] sm:$0xff] %v2827_v54  ;;  %v2829_v33 = vadd.f32 %v3608_v49, %v2797_v35  ;;  %v2735_v37 = vadd.f32 %v2703_v0, %v4917_v47  ;;  %v2705_v41 = vmul.f32 %v3612_v50, %v3540_v61  ;;  %v2923_v20 = vadd.f32 %v2922_v15, %v2901_v4  ;;  %v2282_v49 = vpop.f32.mrb[93].mxu0 }
 0x45a   : > { %v3544_v1 = vpop.eup %3543  ;;  %2860 = vst [vmem:[%s5061_s30 + $0x50] sm:$0xff] %v2828_v60  ;;  %v2766_v18 = vsub.f32 %v2734_v39, %v3609_v34  ;;  %v2736_v19 = vadd.f32 %v2704_v48, %v4920_v12  ;;  %v2664_v25 = vmul.f32 1.442695, %v3532_v51  ;;  %v2902_v56 = vmul.f32 %v3532_v51, %v4832_v11  ;;  %v2284_v12 = vpop.f32.mrb[94].mxu0 }
 0x45b   : > { %v3546_v38 = vpop.eup %3545  ;;  %2861 = vst [vmem:[%s5061_s30 + $0x58] sm:$0xff] %v2829_v33  ;;  %v2767_v21 = vsub.f32 %v2735_v37, %v3610_v2  ;;  %v2737_v54 = vadd.f32 %v2705_v41, %v4923_v43  ;;  %v2666_v35 = vmul.f32 1.442695, %v3542_v7  ;;  %v2903_v47 = vmul.f32 %v3542_v7, %v4834_v22  ;;  %v2286_v60 = vpop.f32.mrb[95].mxu0 }
 0x45c   : > { %v2798_v15 = vmul.f32 %v2766_v18, %v4826_v13  ;;  %v2768_v6 = vsub.f32 %v2736_v19, %v3611_v32  ;;  %3553 = vpow2.f32 %v2664_v25  ;;  %v2944_v0 = vadd.f32 %v2943_v3, %v2902_v56 }
 0x45d   : > { %v2799_v4 = vmul.f32 %v2767_v21, %v4826_v13  ;;  %v2769_v51 = vsub.f32 %v2737_v54, %v3612_v50  ;;  %3555 = vpow2.f32 %v2666_v35  ;;  %v2924_v61 = vadd.f32 %v2923_v20, %v2903_v47  ;;  %v3613_v13 = vld [vmem:[%s4066_s28 + $0x80] sm:$0xff]  ;;  %v3614_v20 = vld [vmem:[%s4066_s28 + $0x88] sm:$0xff] }
 0x45e   : > { %v3548_v43 = vpop.eup %3547  ;;  %v2830_v39 = vadd.f32 %v3609_v34, %v2798_v15  ;;  %v2800_v48 = vmul.f32 %v2768_v6, %v4828_v14  ;;  %v2668_v7 = vmul.f32 1.442695, %v3544_v1  ;;  %v2904_v33 = vmul.f32 %v3544_v1, %v4834_v22 }
 0x45f   : > { %v3550_v37 = vpop.eup %3549  ;;  %v2831_v41 = vadd.f32 %v3610_v2, %v2799_v4  ;;  %v2801_v3 = vmul.f32 %v2769_v51, %v4828_v14  ;;  %v2706_v18 = vmul.f32 %v3613_v13, %v3548_v43  ;;  %v2670_v19 = vmul.f32 1.442695, %v3546_v38  ;;  %v2547_v47 = vpop.f32.mrb[96].mxu0 }
 0x460   : > { %2862 = vst [vmem:[%s5061_s30 + $0x60] sm:$0xff] %v2830_v39  ;;  %v2832_v25 = vadd.f32 %v3611_v32, %v2800_v48  ;;  %v2707_v56 = vmul.f32 %v3614_v20, %v3550_v37  ;;  %3557 = vpow2.f32 %v2668_v7  ;;  %v5083_v34 = vadd.f32 %v2944_v0, %v2904_v33 }
 0x461   : > { %2863 = vst [vmem:[%s5061_s30 + $0x68] sm:$0xff] %v2831_v41  ;;  %v2833_v21 = vadd.f32 %v3612_v50, %v2801_v3  ;;  %v2738_v1 = vadd.f32 %v2706_v18, %v4928_v10  ;;  %3559 = vpow2.f32 %v2670_v19  ;;  %v2905_v14 = vmul.f32 %v3546_v38, %v4836_v26  ;;  %v3615_v10 = vld [vmem:[%s4066_s28 + $0x90] sm:$0xff]  ;;  %v3618_v19 = vld [vmem:[%s4066_s28 + $0xa8] sm:$0xff] }
 0x462   : > { %v3552_v2 = vpop.eup %3551  ;;  %2864 = vst [vmem:[%s5061_s30 + $0x70] sm:$0xff] %v2832_v25  ;;  %v2739_v54 = vadd.f32 %v2707_v56, %v4932_v8  ;;  %3561 = vtanh.f32 %v5038_v27  ;;  %v5093_v32 = vadd.f32 %v5020_v63, %v5024_v24  ;;  %v2271_v35 = vadd.f32 %v5042_v40, %v4862_v52  ;;  %v2549_v8 = vpop.f32.mrb[97].mxu0 }
 0x463   : > { %2865 = vst [vmem:[%s5061_s30 + $0x78] sm:$0xff] %v2833_v21  ;;  %v2770_v50 = vsub.f32 %v2738_v1, %v3613_v13  ;;  %v2708_v15 = vmul.f32 %v3615_v10, %v3552_v2  ;;  %v5099_v6 = vadd.f32 %v2924_v61, %v2905_v14  ;;  %v2273_v38 = vadd.f32 %v5046_v17, %v4862_v52  ;;  %v2551_v27 = vpop.f32.mrb[98].mxu0 }
 0x464   : > { %v2771_v0 = vsub.f32 %v2739_v54, %v3614_v20  ;;  %3563 = vtanh.f32 %v2271_v35  ;;  %v2275_v24 = vadd.f32 %v5049_v42, %v4864_v53  ;;  %v2277_v63 = vadd.f32 %v5052_v23, %v4864_v53  ;;  %v5110_v52 = vpop.f32.mrb[99].mxu0 }
 0x465   : > { %v2802_v40 = vmul.f32 %v2770_v50, %v4830_v16  ;;  %v2740_v4 = vadd.f32 %v2708_v15, %v4935_v5  ;;  %3565 = vtanh.f32 %v2273_v38  ;;  %v2281_v51 = vadd.f32 %v2280_v36, %v4866_v55  ;;  %v3616_v5 = vld [vmem:[%s4066_s28 + $0x98] sm:$0xff]  ;;  %v3617_v36 = vld [vmem:[%s4066_s28 + $0xa0] sm:$0xff] }
 0x466   : > { %v3554_v17 = vpop.eup %3553  ;;  %v2803_v61 = vmul.f32 %v2771_v0, %v4830_v16  ;;  %3567 = vtanh.f32 %v2275_v24  ;;  %v2283_v42 = vadd.f32 %v2282_v49, %v4866_v55  ;;  %v2285_v53 = vadd.f32 %v2284_v12, %v4868_v57 }
 0x467   : > { %v3556_v23 = vpop.eup %3555  ;;  %v2834_v43 = vadd.f32 %v3613_v13, %v2802_v40  ;;  %v2772_v39 = vsub.f32 %v2740_v4, %v3615_v10  ;;  %v2709_v48 = vmul.f32 %v3616_v5, %v3554_v17  ;;  %3569 = vtanh.f32 %v2277_v63 }
 0x468   : > { %v2835_v7 = vadd.f32 %v3614_v20, %v2803_v61  ;;  %v2710_v33 = vmul.f32 %v3617_v36, %v3556_v23  ;;  %3571 = vtanh.f32 %v2281_v51  ;;  %v2287_v37 = vadd.f32 %v2286_v60, %v4868_v57  ;;  %v5128_v57 = vpop.f32.mrb[100].mxu0 }
 0x469   : > { %2866 = vst [vmem:[%s5061_s30 + $0x80] sm:$0xff] %v2834_v43  ;;  %v2804_v16 = vmul.f32 %v2772_v39, %v4832_v11  ;;  %v2741_v55 = vadd.f32 %v2709_v48, %v4939_v30  ;;  %3573 = vtanh.f32 %v2283_v42  ;;  %v2548_v49 = vadd.f32 %v2547_v47, %v4870_v58  ;;  %v5131_v20 = vpop.f32.mrb[101].mxu0  ;;  %v5460_v39 = vld [vmem:[#allocation24_spill] sm:$0xff] }
 0x46a   : > { %v3558_v12 = vpop.eup %3557  ;;  %2867 = vst [vmem:[%s5061_s30 + $0x88] sm:$0xff] %v2835_v7  ;;  %v2742_v41 = vadd.f32 %v2710_v33, %v4941_v45  ;;  %3575 = vtanh.f32 %v2285_v53  ;;  %v2550_v3 = vadd.f32 %v2549_v8, %v4870_v58  ;;  %v5126_v13 = vadd.f32 %v2551_v27, %v4872_v59  ;;  %v3619_v45 = vld [vmem:[%s4066_s28 + $0xb0] sm:$0xff]  ;;  %v5140_v2 = vpop.f32.mrb[102].mxu0 }
 0x46b   : > { %v3560_v60 = vpop.eup %3559  ;;  %v2836_v18 = vadd.f32 %v3615_v10, %v2804_v16  ;;  %v2773_v30 = vsub.f32 %v2741_v55, %v3616_v5  ;;  %v2711_v25 = vmul.f32 %v3618_v19, %v3558_v12  ;;  %3577 = vtanh.f32 %v2287_v37  ;;  %v5146_v10 = vpop.f32.mrb[103].mxu0 }
 0x46c   : > { %v3562_v56 = vpop.eup %3561  ;;  %v2774_v21 = vsub.f32 %v2742_v41, %v3617_v36  ;;  %v2712_v1 = vmul.f32 %v3619_v45, %v3560_v60  ;;  %v5135_v58 = vadd.f32 %v4953_v46, %v2548_v49  ;;  %v5138_v14 = vadd.f32 %v4960_v62, %v2550_v3  ;;  %v5461_v41 = vld [vmem:[#allocation25_spill] sm:$0xff] }
 0x46d   : > { %2868 = vst [vmem:[%s5061_s30 + $0x90] sm:$0xff] %v2836_v18  ;;  %v2805_v54 = vmul.f32 %v2773_v30, %v4832_v11  ;;  %v2743_v35 = vadd.f32 %v2711_v25, %v4943_v44  ;;  %v2672_v47 = vmul.f32 1.442695, %v3562_v56  ;;  %v2906_v50 = vmul.f32 %v3562_v56, %v4836_v26 }
 0x46e   : > { %v3564_v15 = vpop.eup %3563  ;;  %v2806_v46 = vmul.f32 %v2774_v21, %v4834_v22  ;;  %v2744_v38 = vadd.f32 %v2712_v1, %v4945_v31  ;;  %v2754_v62 = vsub.f32 %v5135_v58, %v4950_v28  ;;  %v2755_v8 = vsub.f32 %v5138_v14, %v4957_v9  ;;  %v5463_v58 = vld [vmem:[#allocation20_spill] sm:$0xff] }
 0x46f   : > { %v3566_v11 = vpop.eup %3565  ;;  %v2837_v0 = vadd.f32 %v3616_v5, %v2805_v54  ;;  %v2775_v44 = vsub.f32 %v2743_v35, %v3618_v19  ;;  %3579 = vpow2.f32 %v2672_v47  ;;  %v2946_v24 = vadd.f32 %v5083_v34, %v2906_v50  ;;  %v5464_v50 = vld [vmem:[#allocation32_spill] sm:$0xff] }
 0x470   : > { %v3568_v63 = vpop.eup %3567  ;;  %v2838_v27 = vadd.f32 %v3617_v36, %v2806_v46  ;;  %v2776_v40 = vsub.f32 %v2744_v38, %v3619_v45  ;;  %v2674_v4 = vmul.f32 1.442695, %v3564_v15  ;;  %v2907_v51 = vmul.f32 %v3564_v15, %v4838_v29  ;;  %v3620_v38 = vld [vmem:[%s4066_s28 + $0xb8] sm:$0xff] }
 0x471   : > { %v3570_v31 = vpop.eup %3569  ;;  %2869 = vst [vmem:[%s5061_s30 + $0x98] sm:$0xff] %v2837_v0  ;;  %v2807_v17 = vmul.f32 %v2775_v44, %v4834_v22  ;;  %v2676_v61 = vmul.f32 1.442695, %v3566_v11  ;;  %v2908_v42 = vmul.f32 %v3566_v11, %v4838_v29  ;;  %v2678_v53 = vmul.f32 1.442695, %v3568_v63 }
 0x472   : > { %v3572_v23 = vpop.eup %3571  ;;  %2870 = vst [vmem:[%s5061_s30 + $0xa0] sm:$0xff] %v2838_v27  ;;  %v2808_v43 = vmul.f32 %v2776_v40, %v4836_v26  ;;  %3581 = vpow2.f32 %v2674_v4  ;;  %v2926_v34 = vadd.f32 %v5099_v6, %v2907_v51  ;;  %v2909_v5 = vmul.f32 %v3568_v63, %v5460_v39  ;;  %v5466_v27 = vld [vmem:[#allocation34_spill] sm:$0xff] }
 0x473   : > { %v3574_v48 = vpop.eup %3573  ;;  %v2839_v7 = vadd.f32 %v3618_v19, %v2807_v17  ;;  %3583 = vpow2.f32 %v2676_v61  ;;  %v2947_v36 = vadd.f32 %v2946_v24, %v2908_v42  ;;  %v2680_v22 = vmul.f32 1.442695, %v3570_v31  ;;  %v5462_v19 = vld [vmem:[#allocation26_spill] sm:$0xff]  ;;  %v5465_v24 = vld [vmem:[#allocation31_spill] sm:$0xff] }
 0x474   : > { %v3576_v33 = vpop.eup %3575  ;;  %v2840_v37 = vadd.f32 %v3619_v45, %v2808_v43  ;;  %3585 = vpow2.f32 %v2678_v53  ;;  %v2927_v16 = vadd.f32 %v2926_v34, %v2909_v5  ;;  %v2910_v55 = vmul.f32 %v3570_v31, %v5460_v39  ;;  %v5467_v4 = vld [vmem:[#allocation30_spill] sm:$0xff]  ;;  %v5469_v53 = vld [vmem:[#allocation21_spill] sm:$0xff] }
 0x475   : > { %v3578_v49 = vpop.eup %3577  ;;  %2871 = vst [vmem:[%s5061_s30 + $0xa8] sm:$0xff] %v2839_v7  ;;  %3587 = vpow2.f32 %v2680_v22  ;;  %v2682_v12 = vmul.f32 1.442695, %v3572_v23  ;;  %v2911_v6 = vmul.f32 %v3572_v23, %v5461_v41  ;;  %v2684_v3 = vmul.f32 1.442695, %v3574_v48  ;;  %v5470_v43 = vld [vmem:[#allocation33_spill] sm:$0xff] }
 0x476   : > { %2872 = vst [vmem:[%s5061_s30 + $0xb0] sm:$0xff] %v2840_v37  ;;  %v2948_v60 = vadd.f32 %v2947_v36, %v2910_v55  ;;  %v2912_v18 = vmul.f32 %v3574_v48, %v5461_v41  ;;  %v2686_v30 = vmul.f32 1.442695, %v3576_v33  ;;  %v2913_v25 = vmul.f32 %v3576_v33, %v5462_v19  ;;  %v3622_v7 = vld [vmem:[%s4066_s28 + $0xc8] sm:$0xff]  ;;  %v5472_v37 = vld [vmem:[#allocation35_spill] sm:$0xff]  ;;  %v3623_v55 = vld [vmem:[%s4066_s28 + $0xd0] sm:$0xff] }
 0x477   : > { %3589 = vpow2.f32 %v2682_v12  ;;  %v2928_v56 = vadd.f32 %v2927_v16, %v2911_v6  ;;  %v2688_v21 = vmul.f32 1.442695, %v3578_v49  ;;  %v2914_v45 = vmul.f32 %v3578_v49, %v5462_v19  ;;  %v5471_v22 = vld [vmem:[#allocation40_spill] sm:$0xff] }
 0x478   : > { %3591 = vpow2.f32 %v2684_v3  ;;  %v2949_v1 = vadd.f32 %v2948_v60, %v2912_v18  ;;  %v2786_v14 = vmul.f32 %v2754_v62, %v5463_v58  ;;  %v2787_v54 = vmul.f32 %v2755_v8, %v5463_v58  ;;  %v5473_v60 = vld [vmem:[#allocation36_spill] sm:$0xff] }
 0x479   : > { %v3580_v35 = vpop.eup %3579  ;;  %3593 = vpow2.f32 %v2686_v30  ;;  %v2929_v47 = vadd.f32 %v2928_v56, %v2913_v25  ;;  %v2724_v15 = vadd.f32 %v5464_v50, %v5126_v13  ;;  %v2554_v46 = vadd.f32 %v5110_v52, %v4872_v59  ;;  %v5468_v52 = vld [vmem:[#allocation27_spill] sm:$0xff] }
 0x47a   : > { %v2713_v11 = vmul.f32 %v3620_v38, %v3580_v35  ;;  %3595 = vpow2.f32 %v2688_v21  ;;  %v2950_v0 = vadd.f32 %v2949_v1, %v2914_v45  ;;  %v2818_v62 = vadd.f32 %v4950_v28, %v2786_v14  ;;  %v3624_v30 = vld [vmem:[%s4066_s28 + $0xd8] sm:$0xff]  ;;  %v5474_v1 = vld [vmem:[#allocation37_spill] sm:$0xff] }
 0x47b   : > { %v2930_v44 = vrot.slane %v2929_v47, 4  ;;  %v2819_v8 = vadd.f32 %v4957_v9, %v2787_v54  ;;  %v2756_v63 = vsub.f32 %v2724_v15, %v5465_v24  ;;  %v2725_v40 = vadd.f32 %v5466_v27, %v2554_v46  ;;  %v3621_v9 = vld [vmem:[%s4066_s28 + $0xc0] sm:$0xff] }
 0x47c   : > { %v3582_v13 = vpop.eup %3581  ;;  %v2745_v51 = vadd.f32 %v2713_v11, %v5467_v4  ;;  %v2951_v59 = vrot.slane %v2950_v0, 4  ;;  %2850 = vst [vmem:[%s5061_s30] sm:$0xff] %v2818_v62  ;;  %v2558_v31 = vadd.f32 %v5128_v57, %v5468_v52  ;;  %v5187_v17 = vadd.f32 %v5131_v20, %v5468_v52  ;;  %v3625_v46 = vld [vmem:[%s4066_s28 + $0xe0] sm:$0xff] }
 0x47d   : > { %v3584_v28 = vpop.eup %3583  ;;  %v2714_v61 = vmul.f32 %v3621_v9, %v3582_v13  ;;  %v2931_v42 = vadd.f32 %v2930_v44, %v2929_v47  ;;  %2851 = vst [vmem:[%s5061_s30 + $0x8] sm:$0xff] %v2819_v8  ;;  %v2788_v23 = vmul.f32 %v2756_v63, %v5469_v53  ;;  %v2757_v34 = vsub.f32 %v2725_v40, %v5470_v43  ;;  %v3626_v8 = vld [vmem:[%s4066_s28 + $0xe8] sm:$0xff]  ;;  %v5476_v13 = vld [vmem:[#allocation47_spill] sm:$0xff] }
 0x47e   : > { %v3586_v5 = vpop.eup %3585  ;;  %v2777_v48 = vsub.f32 %v2745_v51, %v3620_v38  ;;  %v2715_v36 = vmul.f32 %v3622_v7, %v3584_v28  ;;  %v2952_v57 = vadd.f32 %v2951_v59, %v2950_v0  ;;  %v5195_v33 = vadd.f32 %v5471_v22, %v2558_v31  ;;  %v3627_v51 = vld [vmem:[%s4066_s28 + $0xf0] sm:$0xff]  ;;  %v5477_v28 = vld [vmem:[#allocation48_spill] sm:$0xff] }
 0x47f   : > { %v3588_v20 = vpop.eup %3587  ;;  %v2746_v16 = vadd.f32 %v2714_v61, %v5472_v37  ;;  %v2716_v49 = vmul.f32 %v3623_v55, %v3586_v5  ;;  %v2932_v12 = vrot.slane %v2931_v42, 2  ;;  %v2820_v6 = vadd.f32 %v5465_v24, %v2788_v23 }
 0x480   : > { %v2809_v3 = vmul.f32 %v2777_v48, %v4836_v26  ;;  %v2747_v18 = vadd.f32 %v2715_v36, %v5473_v60  ;;  %v2717_v25 = vmul.f32 %v3624_v30, %v3588_v20  ;;  %v2953_v56 = vrot.slane %v2952_v57, 2  ;;  %v5475_v26 = vld [vmem:[#allocation38_spill] sm:$0xff] }
 0x481   : > { %v3590_v21 = vpop.eup %3589  ;;  %v2778_v45 = vsub.f32 %v2746_v16, %v3621_v9  ;;  %v2748_v58 = vadd.f32 %v2716_v49, %v5474_v1  ;;  %v2933_v14 = vadd.f32 %v2932_v12, %v2931_v42  ;;  %2852 = vst [vmem:[%s5061_s30 + $0x10] sm:$0xff] %v2820_v6  ;;  %v2789_v54 = vmul.f32 %v2757_v34, %v5469_v53  ;;  %v5479_v34 = vld [vmem:[#allocation49_spill] sm:$0xff]  ;;  %v3628_v36 = vld [vmem:[%s4066_s28 + $0xf8] sm:$0xff]  ;;  %s3158_s28 = sshll.u32 %s4061_s26, 1 }
 0x482   : > { %v3592_v35 = vpop.eup %3591  ;;  %v2841_v47 = vadd.f32 %v3620_v38, %v2809_v3  ;;  %v2779_v50 = vsub.f32 %v2747_v18, %v3622_v7  ;;  %v2749_v15 = vadd.f32 %v2717_v25, %v5475_v26  ;;  %v2718_v11 = vmul.f32 %v3625_v46, %v3590_v21  ;;  %v5480_v6 = vld [vmem:[#allocation39_spill] sm:$0xff]  ;;  %v5482_v18 = vld [vmem:[#allocation28_spill] sm:$0xff]  ;;  %v5484_v1 = vld [vmem:[#allocation41_spill] sm:$0xff]  ;;  %s548_s18 = scalar_lea.vmem [#allocation9], %s3158_s28 }
 0x483   : > { %v3594_v0 = vpop.eup %3593  ;;  %v2810_v62 = vmul.f32 %v2778_v45, %v4838_v29  ;;  %v2780_v44 = vsub.f32 %v2748_v58, %v3623_v55  ;;  %v2719_v24 = vmul.f32 %v3626_v8, %v3592_v35  ;;  %v2934_v63 = vrot.slane %v2933_v14, 1  ;;  %v5486_v26 = vld [vmem:[#allocation43_spill] sm:$0xff]  ;;  %s3017_s11 = sshll.u32 %s548_s18, 4  ;;  %s5292_s11 = int_to_ptr.vmem [resolvable:$true] %s3017_s11 }
 0x484   : > { %v3596_v27 = vpop.eup %3595  ;;  %2873 = vst [vmem:[%s5061_s30 + $0xb8] sm:$0xff] %v2841_v47  ;;  %v2811_v38 = vmul.f32 %v2779_v50, %v4838_v29  ;;  %v2781_v40 = vsub.f32 %v2749_v15, %v3624_v30  ;;  %v2750_v4 = vadd.f32 %v2718_v11, %v5476_v13  ;;  %v2720_v59 = vmul.f32 %v3627_v51, %v3594_v0  ;;  %s3685_s12 = scalar_lea.vmem %s5292_s11, 32  ;;  %p3692_p9 = scmp.lt.s32.totalorder %s5292_s11, %s3690_s21 }
 0x485   : > { %v2842_v52 = vadd.f32 %v3621_v9, %v2810_v62  ;;  %v2812_v31 = vmul.f32 %v2780_v44, %v5460_v39  ;;  %v2751_v61 = vadd.f32 %v2719_v24, %v5477_v28  ;;  %v2935_v42 = vadd.f32 %v2934_v63, %v2933_v14  ;;  %v5485_v14 = vld [vmem:[#allocation44_spill] sm:$0xff]  ;;  %v5489_v44 = vld [vmem:[#allocation23_spill] sm:$0xff]  ;;  %v5490_v24 = vld [vmem:[#allocation45_spill] sm:$0xff]  ;;  %p3686_p3 = scmp.ne.s32.totalorder %s5292_s11, %s3685_s12 }
 0x486   : > { %v2843_v29 = vadd.f32 %v3622_v7, %v2811_v38  ;;  %v2813_v53 = vmul.f32 %v2781_v40, %v5460_v39  ;;  %v2782_v23 = vsub.f32 %v2750_v4, %v3625_v46  ;;  %v2752_v5 = vadd.f32 %v2720_v59, %v5479_v34 }
 0x487   : > { %2874 = vst [vmem:[%s5061_s30 + $0xc0] sm:$0xff] %v2842_v52  ;;  %v2844_v9 = vadd.f32 %v3623_v55, %v2812_v31  ;;  %v2783_v48 = vsub.f32 %v2751_v61, %v3626_v8  ;;  %v2721_v22 = vmul.f32 %v3628_v36, %v3596_v27  ;;  %v2954_v20 = vadd.f32 %v2953_v56, %v2952_v57  ;;  %v5483_v56 = vld [vmem:[#allocation22_spill] sm:$0xff]  ;;  %v2882_v27 = vld [vmem:[%s553_s13] sm:$0x3]  ;;  %s5290_s13 = scalar_lea.hbm %s5495_s29, %s3250_s20  ;;  %p3687_p7 = pnand %p3686_p3, %p5496_p4 }
 0x488   : > { %2875 = vst [vmem:[%s5061_s30 + $0xc8] sm:$0xff] %v2843_v29  ;;  %v2845_v37 = vadd.f32 %v3624_v30, %v2813_v53  ;;  %v2814_v7 = vmul.f32 %v2782_v23, %v5461_v41  ;;  %v2784_v16 = vsub.f32 %v2752_v5, %v3627_v51  ;;  %v2821_v39 = vadd.f32 %v5470_v43, %v2789_v54  ;;  %v5481_v43 = vld [vmem:[#allocation42_spill] sm:$0xff]  ;;  %s3691_s20 = scalar_lea.vmem %s3690_s21, 64 }
 0x489   : > { %2876 = vst [vmem:[%s5061_s30 + $0xd0] sm:$0xff] %v2844_v9  ;;  %v2815_v49 = vmul.f32 %v2783_v48, %v5461_v41  ;;  %v2753_v55 = vadd.f32 %v2721_v22, %v5093_v32  ;;  %v2955_v12 = vrot.slane %v2954_v20, 1  ;;  %v2758_v3 = vsub.f32 %v5195_v33, %v5480_v6  ;;  %p3688_p8 = pneg %p3687_p7  ;;  %p3693_p13 = scmp.lt.s32.totalorder %s3691_s20, %s3685_s12 }
 0x48a   : > { %2877 = vst [vmem:[%s5061_s30 + $0xd8] sm:$0xff] %v2845_v37  ;;  %v2846_v57 = vadd.f32 %v3625_v46, %v2814_v7  ;;  %v2816_v60 = vmul.f32 %v2784_v16, %v5462_v19  ;;  %2853 = vst [vmem:[%s5061_s30 + $0x18] sm:$0xff] %v2821_v39  ;;  %v2727_v41 = vadd.f32 %v5481_v43, %v5187_v17  ;;  %v5487_v46 = vld [vmem:[#allocation46_spill] sm:$0xff]  ;;  %v5494_v4 = vlaneseq }
 0x48b   : > { %v2562_v32 = vadd.f32 %v5140_v2, %v5482_v18  ;;  %v2847_v33 = vadd.f32 %v3626_v8, %v2815_v49  ;;  %v2785_v30 = vsub.f32 %v2753_v55, %v3628_v36  ;;  %v2956_v25 = vadd.f32 %v2955_v12, %v2954_v20  ;;  %p3694_p2 = por %p3693_p13, %p3692_p9 }
 0x48c   : > { %v2790_v21 = vmul.f32 %v2758_v3, %v5483_v56  ;;  %2878 = vst [vmem:[%s5061_s30 + $0xe0] sm:$0xff] %v2846_v57  ;;  %v2848_v45 = vadd.f32 %v3627_v51, %v2816_v60  ;;  %v2759_v58 = vsub.f32 %v2727_v41, %v5484_v1  ;;  %v2564_v17 = vadd.f32 %v5146_v10, %v5482_v18 }
 0x48d   : > { %v2728_v54 = vadd.f32 %v5485_v14, %v2562_v32  ;;  %2879 = vst [vmem:[%s5061_s30 + $0xe8] sm:$0xff] %v2847_v33  ;;  %v2817_v2 = vmul.f32 %v2785_v30, %v5462_v19  ;;  %v2959_v47 = vcombine.low %v2935_v42, %v2956_v25  ;;  %v5488_v19 = vld [vmem:[#allocation29_spill] sm:$0xff]  ;;  %vm2978_vm0 = vcmp.lt.s32.totalorder %v5494_v4, 256  ;;  %p3695_p0 = pnand %p3694_p2, %p3688_p8 }
 0x48e   : > { %v2822_v35 = vadd.f32 %v5480_v6, %v2790_v21  ;;  %2880 = vst [vmem:[%s5061_s30 + $0xf0] sm:$0xff] %v2848_v45  ;;  %v2791_v50 = vmul.f32 %v2759_v58, %v5483_v56  ;;  %v2729_v11 = vadd.f32 %v5487_v46, %v2564_v17 }
 0x48f   : > { %v2760_v15 = vsub.f32 %v2728_v54, %v5486_v26  ;;  %v2849_v10 = vadd.f32 %v3628_v36, %v2817_v2  ;;  %v2966_v0 = vrot.slane %v2959_v47, %v5488_v19 }
 0x490   : > { %2854 = vst [vmem:[%s5061_s30 + $0x20] sm:$0xff] %v2822_v35  ;;  %v2823_v62 = vadd.f32 %v5484_v1, %v2791_v50  ;;  %v2761_v63 = vsub.f32 %v2729_v11, %v5490_v24 }
 0x491   : > { %v2792_v8 = vmul.f32 %v2760_v15, %v5489_v44  ;;  %2881 = vst [vmem:[%s5061_s30 + $0xf8] sm:$0xff] %v2849_v10  ;;  %v2973_v38 = vrot.slane %v2966_v0, %v5488_v19 }
 0x492   : > { %2855 = vst [vmem:[%s5061_s30 + $0x28] sm:$0xff] %v2823_v62  ;;  %v2793_v13 = vmul.f32 %v2761_v63, %v5489_v44 }
 0x493   : > { %v2824_v40 = vadd.f32 %v5486_v26, %v2792_v8  ;;  %v2975_v51 = vadd.f32 %v2973_v38, %v2882_v27 }
 0x494   : > { %v2825_v59 = vadd.f32 %v5490_v24, %v2793_v13 }
 0x495   : > { %2856 = vst [vmem:[%s5061_s30 + $0x30] sm:$0xff] %v2824_v40  ;;  %2980 = vst.msk [vmem:[%s548_s18] sm:$0x3] %vm2978_vm0, %v2975_v51 }
 0x496   : > { %2857 = vst [vmem:[%s5061_s30 + $0x38] sm:$0xff] %v2825_v59 }
 0x497   : > { %3698 = shalt.err (!%p3695_p0)
}
 0x498   : > { %s3699_s30 = scalar_lea.hbm %s5290_s13, 32  ;;  %s3703_s28 = scalar_lea.hbm %s5495_s29, 64 }
 0x499   : > { %p3700_p5 = scmp.ne.s32.totalorder %s5290_s13, %s3699_s30  ;;  %p3704_p11 = scmp.lt.u32.totalorder %s5290_s13, %s5495_s29 }
 0x49a   : > { %p3705_p12 = scmp.lt.u32.totalorder %s3703_s28, %s3699_s30  ;;  %p3707_p7 = scmp.lt.u32.totalorder %s3699_s30, %s5290_s13 }
 0x49b   : > { %p3701_p6 = pnand %p3700_p5, %p5496_p4 }
 0x49c   : > { %p3706_p3 = por %p3705_p12, %p3704_p11 }
 0x49d   : > { %p3702_p10 = pneg %p3701_p6 }
 0x49e   : > { %p3708_p8 = por %p3707_p7, %p3706_p3 }
 0x4a0   : > { %p3709_p9 = pnand %p3708_p8, %p3702_p10 }
 0x4a2   : > { %3712 = shalt.err (!%p3709_p9)
}
 0x4a3   : > { %3292 = dma.vmem_to_hbm [thread:$0]  (%p5496_p4), %s5292_s11, 32, %s5290_s13, %s2987_s16  }
 0x4a4   : > { %s2982_s12 = scalar_lea.sflag [#allocation5], %s4061_s26  ;;  %s3713_s20 = scalar_lea.vmem %s5280_s17, 4096 }
 0x4a5   : > { %p3714_p13 = scmp.ne.s32.totalorder %s5280_s17, %s3713_s20  ;;  %s3796_s30 = smov [#allocation8]  }
 0x4a6   : > { %s3717_s18 = sshll.u32 %s3796_s30, 4  ;;  %s3718_s18 = int_to_ptr.vmem [resolvable:$false] %s3717_s18 }
 0x4a7   : > { %p3715_p2 = pnand %p3714_p13, %p5496_p4  ;;  %s3719_s25 = scalar_lea.vmem %s3718_s18, 8192 }
 0x4a8   : > { %p3720_p5 = scmp.lt.s32.totalorder %s5280_s17, %s3718_s18  ;;  %p3721_p6 = scmp.lt.s32.totalorder %s3719_s25, %s3713_s20 }
 0x4a9   : > { %p3716_p0 = pneg %p3715_p2 }
 0x4aa   : > { %p3722_p10 = por %p3721_p6, %p3720_p5 }
 0x4ac   : > { %p3723_p11 = pnand %p3722_p10, %p3716_p0 }
 0x4ae   : > { %3726 = shalt.err (!%p3723_p11)
}
 0x4af   : > { %s3727_s11 = scalar_lea.hbm %s5278_s15, 4096  ;;  %s3731_s28 = scalar_lea.hbm %s5492_s27, 8192 }
 0x4b0   : > { %p3728_p12 = scmp.ne.s32.totalorder %s5278_s15, %s3727_s11  ;;  %p3732_p8 = scmp.lt.u32.totalorder %s5278_s15, %s5492_s27 }
 0x4b1   : > { %p3733_p9 = scmp.lt.u32.totalorder %s3731_s28, %s3727_s11  ;;  %p3735_p2 = scmp.lt.u32.totalorder %s3727_s11, %s5278_s15 }
 0x4b2   : > { %p3729_p3 = pnand %p3728_p12, %p5496_p4 }
 0x4b3   : > { %p3734_p13 = por %p3733_p9, %p3732_p8 }
 0x4b4   : > { %p3730_p7 = pneg %p3729_p3 }
 0x4b5   : > { %p3736_p0 = por %p3735_p2, %p3734_p13 }
 0x4b7   : > { %p3737_p5 = pnand %p3736_p0, %p3730_p7 }
 0x4b9   : > { %3740 = shalt.err (!%p3737_p5)
}
 0x4ba   : > { %s3797_s20 = smov 256   ;;  %s3798_s30 = smov 512  }
 0x4bb   : > { %s3799_s18 = smov 16  }
 0x4bc   : > { %3291 = dma.vmem_to_hbm [thread:$0]  (%p5496_p4), %s5280_s17, 4096, %s5278_s15, %s2982_s12, %s3797_s20, %s3798_s30, %s3799_s18  }
 0x4bd PF: > { %s5497_s25 = sld [smem:[#allocation15_spill]]  ;;  %s5498_s13 = sld [smem:[#allocation19_spill]] }
 0x4c3   : > { %s3029_s16 = sand.u32 1, %s5497_s25   ;;  %p5499_p6 = scmp.ne.s32.totalorder %s5498_s13, 0 }
 0x4c4   : > { %s3030_s11 = scalar_lea.sflag [#allocation5], %s3029_s16 }
 0x4c5   : > { %p3303_p10 = pnand %p3149_p1, %p5499_p6 }
 0x4c7   : > { %3766 = dma.done.wait (!%p3303_p10), %s3030_s11, 4096  }
 0x4c8   : > { %3768 = vsyncadd (!%p3303_p10), %s3030_s11, 4294963200  ;;  %s3039_s28 = scalar_lea.sflag [#allocation10], %s3029_s16 }
 0x4c9   : > { %3770 = dma.done.wait (!%p3303_p10), %s3039_s28, 32  }
 0x4ca   : > { %3772 = vsyncadd (!%p3303_p10), %s3039_s28, 4294967264  ;;  %s5500_s24 = sld [smem:[#allocation16_spill]]  ;;  %s5501_s19 = sld [smem:[#allocation17_spill]] }
 0x4cb   : > { %s5502_s21 = smov %s3779_s22  ;;  %s5503_s22 = smov %s3783_s23 }
 0x4d0   : > { %p28_p4 = scmp.ge.s32.totalorder %s5500_s24, 4   ;;  %s5504_s23 = smov %s5501_s19 }
 0x4d2   :  { %30 = sbr.rel (!%p28_p4) target bundleno = 10 (0xa), region = 156 }
 0x4d9   :  { %3044 = vsyncpa [#allocation4], 1 }
 0x4da   :  { %3046 = vsyncpa [#allocation4 + $0x1], 1 }
 0x4db   :  { %3047 = vsyncpa [#allocation7], 1 }
 0x4dc   :  { %3048 = vsyncpa [#allocation5], 1 }
 0x4dd   :  { %3050 = vsyncpa [#allocation5 + $0x1], 1 }
 0x4de   :  { %3051 = vsyncpa [#allocation10], 1 }
 0x4df   :  { %3053 = vsyncpa [#allocation10 + $0x1], 1 }

</bundles_post_ra>
